<compile_context>
chip_gen: v6e
topology: v6e:2x2x1
jax: 0.10.0
libtpu: 0.0.40
codegen_flags: <defaults>
</compile_context>

<pallas_src>
import functools

import jax
import jax.numpy as jnp
from jax.experimental import pallas as pl
from jax.experimental.pallas import tpu as pltpu

f32 = jnp.float32
bf16 = jnp.bfloat16


def rwkv7_att_kernel(
    # sequence-chunked data
    x_ref, s1_ref, s2_ref, vf_ref,
    # recurrence helpers: block-diag head indicator (L,L) bf16, diag selector (N,L) f32
    ebd_ref, pm_ref,
    # per-head reduce / broadcast indicators: (H,NH) bf16 and (NH,H) f32
    e_ref, et_ref,
    # ln_1 + token-shift lerp coefficients
    ln1w_ref, ln1b_ref,
    xr_ref, xw_ref, xk_ref, xv_ref, xa_ref, xg_ref,
    # dense projections, stored (in, out), bf16
    wr_ref, wk_ref, wv_ref, wo_ref,
    # time-decay lora (bf16) + bias (f32)
    w1_ref, w2_ref, w0_ref,
    # in-context-lr lora
    a1_ref, a2_ref, a0_ref,
    # value-residual lora
    v1_ref, v2_ref, v0_ref,
    # gate lora
    g1_ref, g2_ref,
    # per-head params, flattened to (1, H)
    kkp_ref, kap_ref, rkp_ref,
    # ln_x affine
    lnxw_ref, lnxb_ref,
    # outputs
    out_ref, s1o_ref, s2o_ref,
    # scratch: six flat (CT, H) staging buffers (r_s doubles as the per-token output)
    r_s, w_s, k_s, v_s, a_s, b_s,
):
    CT, H = x_ref.shape
    NG, N, L = s2_ref.shape
    c = pl.program_id(0)

    dotf = functools.partial(jnp.dot, preferred_element_type=f32)

    def mxu(lhs, wref):
        # bf16 operands on the MXU, f32 accumulation.
        return dotf(lhs.astype(bf16), wref[...])

    def head_reduce(vals):          # (M, H) -> (M, NH), bf16 MXU
        return dotf(vals.astype(bf16), e_ref[...])

    def head_bcast(vals):           # (M, NH) -> (M, H); 0/1 weights, keep f32
        return dotf(vals, et_ref[...])

    # Seed the cross-chunk carries once; both carry out-blocks are resident in VMEM.
    @pl.when(c == 0)
    def _():
        s1o_ref[...] = s1_ref[...]
        s2o_ref[...] = s2_ref[...]

    xin = x_ref[...]                                    # (CT, H) raw residual input

    # --- ln_1 (LayerNorm over hidden, eps=1e-5) ---
    mu = jnp.mean(xin, axis=-1, keepdims=True)
    xc = xin - mu
    var = jnp.mean(xc * xc, axis=-1, keepdims=True)
    xn = xc * jax.lax.rsqrt(var + 1e-5) * ln1w_ref[...] + ln1b_ref[...]

    # --- token shift: sx[t] = prev_token(t) - x[t]; prev of row 0 comes from carry ---
    prev = s1o_ref[...]                                 # (1, H) last xn of prev chunk
    past = jnp.concatenate([prev, xn[:CT - 1, :]], axis=0)
    s1o_ref[...] = xn[CT - 1:CT, :]                     # update carry / final state1
    sx = past - xn

    xr = xn + sx * xr_ref[...]
    xw = xn + sx * xw_ref[...]
    xk = xn + sx * xk_ref[...]
    xv = xn + sx * xv_ref[...]
    xa = xn + sx * xa_ref[...]
    xg = xn + sx * xg_ref[...]

    # --- projections / LoRAs (bf16 MXU, f32 elementwise) ---
    r = mxu(xr, wr_ref)                                 # (CT, H)
    k = mxu(xk, wk_ref)
    v = mxu(xv, wv_ref)
    gate = mxu(jax.nn.sigmoid(mxu(xg, g1_ref)), g2_ref)
    a_sig = jax.nn.sigmoid(mxu(mxu(xa, a1_ref), a2_ref) + a0_ref[...])
    td = mxu(jnp.tanh(mxu(xw, w1_ref)), w2_ref) + w0_ref[...]
    w = jnp.exp(-0.606531 * jax.nn.sigmoid(td))
    vg = jax.nn.sigmoid(mxu(mxu(xv, v1_ref), v2_ref) + v0_ref[...])

    # --- per-head mixing, kept lane-dense in (CT, H) ---
    kk = k * kkp_ref[...]
    k_mix = k * (1.0 + (a_sig - 1.0) * kap_ref[...])
    v_mix = v + (vf_ref[...] - v) * vg                  # value residual (layer_id != 0)

    # fused per-head reduces: [sum(kk^2) ; sum(r * k_mix * r_k)] in one bf16 matmul
    red = head_reduce(jnp.concatenate([kk * kk, r * k_mix * rkp_ref[...]], axis=0))
    inv_norm = 1.0 / (jnp.sqrt(red[:CT]) + 1e-12)       # l2norm denom per head
    bc = head_bcast(jnp.concatenate([inv_norm, red[CT:]], axis=0))
    kk = kk * bc[:CT]                                   # l2-normalized kk
    rk_bonus = bc[CT:]                                  # per-head sum(r*k*r_k), bcast

    b = kk * a_sig
    a_neg = -kk

    # --- stage flat per-token operands (no (CT,NH,N) relayouts) ---
    r_s[...] = r
    w_s[...] = w
    k_s[...] = k_mix
    v_s[...] = v_mix
    a_s[...] = a_neg
    b_s[...] = b

    # --- WKV7 recurrence, head-group-outer / token-inner ---
    # Packed group state st[iv, g*N + jk] = S_head[iv, jk] (N rows x L lanes, f32) is
    # the fori_loop carry.  Per token: one stacked (2N,L)x(L,L) bf16 MXU matmul gives
    # both the per-head "S @ a" (broadcast back over the head's lanes) and the value
    # re-broadcast v_b[iv, g*N+jk] = v_g[iv]; a second (N,L)x(L,L) matmul + diagonal
    # select reads out y_t = S_t @ r_t into the flat output row.
    ebd = ebd_ref[...]                                  # (L, L) bf16 block-diag ones
    pm = pm_ref[...]                                    # (N, L) f32, pm[i,m]=(m%N==i)
    unroll = True if CT <= 16 else 4

    def make_step(goff):
        lane = pl.ds(goff, L)

        def step(i, st):
            row = pl.ds(i, 1)
            r_i = r_s[row, lane]
            w_i = w_s[row, lane]
            k_i = k_s[row, lane]
            v_i = v_s[row, lane]
            a_i = a_s[row, lane]
            b_i = b_s[row, lane]
            packed = jnp.concatenate([st * a_i, pm * v_i], axis=0)     # (2N, L)
            sb = dotf(packed.astype(bf16), ebd)
            sa_b = sb[:N]                                              # (S@a) bcast
            v_b = sb[N:]                                               # v re-bcast
            st = st * w_i + sa_b * b_i + v_b * k_i
            yb = dotf((st * r_i).astype(bf16), ebd)
            r_s[row, lane] = jnp.sum(yb * pm, axis=0, keepdims=True)   # y_t = S@r
            return st

        return step

    for g in range(NG):
        st0 = s2o_ref[g]
        stf = jax.lax.fori_loop(0, CT, make_step(g * L), st0, unroll=unroll)
        s2o_ref[g] = stf                                # once per chunk per group

    # --- ln_x: per-head LayerNorm (identity affine, eps=0.00064), flat affine,
    #     done lane-dense via the per-head indicator matmuls ---
    y = r_s[...]
    mean = head_reduce(y) * (1.0 / N)
    yc = y - head_bcast(mean)
    var2 = head_reduce(yc * yc) * (1.0 / N)
    y = yc * head_bcast(jax.lax.rsqrt(var2 + 0.00064))
    y = y * lnxw_ref[...] + lnxb_ref[...]

    # --- bonus term, gate, output projection, residual ---
    y = (y + rk_bonus * v_s[...]) * gate
    out_ref[...] = xin + mxu(y, wo_ref)


def rwkv7_self_attention(x, state1, state2, v_first, p, *, chunk=128):
    """x: (1, T, H); state1: (1, 1, H); state2: (NH, N, N); v_first: (T, NH, N).

    chunk: sequence tile per grid step (use 256 on v6e to fill its 256-wide MXU)."""
    B, T, H = x.shape
    assert B == 1, "prefill kernel assumes batch == 1"
    NH, N = p["k_k"].shape
    assert NH * N == H

    # Head-group lane packing: G heads share up to 128 lanes (L = G*N).
    G = max(1, min(128 // N, NH)) if N <= 128 else 1
    while NH % G:
        G -= 1
    L = G * N
    NG = NH // G

    CT = T if T <= chunk else chunk
    if CT < T:
        assert T % CT == 0 and CT % 8 == 0
    n_chunks = T // CT

    vecp = lambda a: jnp.asarray(a, f32).reshape(1, H)
    matp = lambda a: jnp.asarray(a, bf16)

    # packed state: s2p[gr, iv, g*N + jk] = state2[gr*G + g, iv, jk]
    s2p = (jnp.asarray(state2, f32)
           .reshape(NG, G, N, N).transpose(0, 2, 1, 3).reshape(NG, N, L))

    lanes = jnp.arange(L)
    ebd = (lanes[:, None] // N == lanes[None, :] // N).astype(bf16)        # (L, L)
    pmask = (jnp.arange(N)[:, None] == (lanes[None, :] % N)).astype(f32)   # (N, L)
    e_mat = (jnp.arange(H)[:, None] // N == jnp.arange(NH)[None, :]).astype(bf16)
    et_mat = (jnp.arange(NH)[:, None] == jnp.arange(H)[None, :] // N).astype(f32)

    inputs = [
        jnp.asarray(x[0], f32),                          # (T, H)
        jnp.array(state1, dtype=f32).reshape(1, H),      # fresh buffer (aliased out)
        s2p,                                             # fresh buffer (aliased out)
        jnp.asarray(v_first, f32).reshape(T, H),
        ebd, pmask, e_mat, et_mat,
        vecp(p["ln1_w"]), vecp(p["ln1_b"]),
        vecp(p["x_r"]), vecp(p["x_w"]), vecp(p["x_k"]),
        vecp(p["x_v"]), vecp(p["x_a"]), vecp(p["x_g"]),
        matp(p["w_r"]), matp(p["w_k"]), matp(p["w_v"]), matp(p["w_o"]),
        matp(p["w1"]), matp(p["w2"]), vecp(p["w0"]),
        matp(p["a1"]), matp(p["a2"]), vecp(p["a0"]),
        matp(p["v1"]), matp(p["v2"]), vecp(p["v0"]),
        matp(p["g1"]), matp(p["g2"]),
        vecp(p["k_k"]), vecp(p["k_a"]), vecp(p["r_k"]),
        vecp(p["lnx_w"]), vecp(p["lnx_b"]),
    ]

    chunked = lambda: pl.BlockSpec((CT, H), lambda c: (c, 0))
    # whole array lives in VMEM for the call duration: single copy, no double-buffering
    vmem_res = pl.BlockSpec(memory_space=pltpu.MemorySpace.VMEM)

    in_specs = [
        chunked(),                                        # x
        pl.BlockSpec((1, H), lambda c: (0, 0)),           # state1 carry seed
        pl.BlockSpec((NG, N, L), lambda c: (0, 0, 0)),    # packed state2 seed
        chunked(),                                        # v_first
    ] + [vmem_res] * (len(inputs) - 4)

    out_shape = (
        jax.ShapeDtypeStruct((T, H), f32),
        jax.ShapeDtypeStruct((1, H), f32),
        jax.ShapeDtypeStruct((NG, N, L), f32),
    )
    out_specs = [
        chunked(),
        pl.BlockSpec((1, H), lambda c: (0, 0)),
        pl.BlockSpec((NG, N, L), lambda c: (0, 0, 0)),
    ]

    scratch = [pltpu.VMEM((CT, H), f32) for _ in range(6)]

    # Scoped VMEM: ~85% of physical capacity (v7x only has 64 MiB per TensorCore).
    try:
        cap = int(pltpu.get_tpu_info().vmem_capacity_bytes)
    except Exception:
        cap = 64 * 1024 * 1024
    vmem_limit = int(min(cap * 0.85, 100 * 1024 * 1024))

    d_lora = (p["w1"].shape[1] + p["a1"].shape[1]
              + p["v1"].shape[1] + p["g1"].shape[1])
    cost = pl.CostEstimate(
        flops=int(2 * T * H * (4 * H + 2 * d_lora) + 6 * T * NG * N * L * L),
        transcendentals=int(6 * T * H),
        bytes_accessed=int(sum(int(a.size) * a.dtype.itemsize for a in inputs)
                           + (T * H + H + NG * N * L) * 4),
    )

    grid_spec = pltpu.PrefetchScalarGridSpec(
        num_scalar_prefetch=0,
        grid=(n_chunks,),
        in_specs=in_specs,
        out_specs=out_specs,
        scratch_shapes=scratch,
    )

    out, s1o, s2o = pl.pallas_call(
        rwkv7_att_kernel,
        out_shape=out_shape,
        grid_spec=grid_spec,
        input_output_aliases={1: 1, 2: 2},    # carry buffers reuse the input HBM
        compiler_params=pltpu.CompilerParams(
            dimension_semantics=("arbitrary",),   # state carried across chunks
            vmem_limit_bytes=vmem_limit,
        ),
        cost_estimate=cost,
    )(*inputs)

    s2o = s2o.reshape(NG, N, G, N).transpose(0, 2, 1, 3).reshape(NH, N, N)
    return out.reshape(1, T, H), s1o.reshape(1, 1, H), s2o


def _ref_forward(x, state1, state2, v_first, p):
    """Pure-JAX reference with the same dtype policy (bf16 matmuls, f32 elsewhere)."""
    T, H = x.shape[1], x.shape[2]
    NH, N = p["k_k"].shape
    bmm = lambda a, b: jnp.dot(a.astype(bf16), b.astype(bf16),
                               preferred_element_type=f32)
    xf = x[0].astype(f32)

    mu = xf.mean(-1, keepdims=True)
    var = ((xf - mu) ** 2).mean(-1, keepdims=True)
    xn = (xf - mu) * jax.lax.rsqrt(var + 1e-5) * p["ln1_w"] + p["ln1_b"]

    past = jnp.concatenate([state1.reshape(1, H).astype(f32), xn[:-1]], 0)
    sx = past - xn
    xr, xw, xk, xv, xa, xg = (xn + sx * p[n]
                              for n in ["x_r", "x_w", "x_k", "x_v", "x_a", "x_g"])

    r = bmm(xr, p["w_r"])
    k = bmm(xk, p["w_k"])
    v = bmm(xv, p["w_v"])
    gate = bmm(jax.nn.sigmoid(bmm(xg, p["g1"])), p["g2"])
    a = jax.nn.sigmoid(bmm(bmm(xa, p["a1"]), p["a2"]) + p["a0"])
    td = bmm(jnp.tanh(bmm(xw, p["w1"])), p["w2"]) + p["w0"]
    w = jnp.exp(-0.606531 * jax.nn.sigmoid(td))
    vg = jax.nn.sigmoid(bmm(bmm(xv, p["v1"]), p["v2"]) + p["v0"])

    r3, k3, v3 = (t.reshape(T, NH, N) for t in (r, k, v))
    a3, w3, vg3 = (t.reshape(T, NH, N) for t in (a, w, vg))
    kk = k3 * p["k_k"][None]
    kk = kk / (jnp.sqrt(jnp.sum(kk * kk, -1, keepdims=True)) + 1e-12)
    k3 = k3 * (1.0 + (a3 - 1.0) * p["k_a"][None])
    v3 = v3 + (v_first.astype(f32) - v3) * vg3
    b3 = kk * a3
    an3 = -kk

    st = state2.astype(f32)
    ys = []
    for i in range(T):
        sa = jnp.einsum("hvk,hk->hv", st, an3[i])
        st = (st * w3[i][:, None, :] + sa[:, :, None] * b3[i][:, None, :]
              + v3[i][:, :, None] * k3[i][:, None, :])
        ys.append(jnp.einsum("hvk,hk->hv", st, r3[i]))
    y3 = jnp.stack(ys, 0)

    mu2 = y3.mean(-1, keepdims=True)
    var2 = ((y3 - mu2) ** 2).mean(-1, keepdims=True)
    y = ((y3 - mu2) * jax.lax.rsqrt(var2 + 0.00064)).reshape(T, H)
    y = y * p["lnx_w"] + p["lnx_b"]
    rkv = (jnp.sum(r3 * k3 * p["r_k"][None], -1, keepdims=True) * v3).reshape(T, H)
    y = (y + rkv) * gate
    y = bmm(y, p["w_o"])
    return (xf + y)[None], xn[T - 1:T].reshape(1, 1, H), st


def init_params(key, H, NH, N, d_decay, d_aaa, d_gate, d_mv):
    ks = list(jax.random.split(key, 32))
    it = iter(ks)

    def mat(i, o):
        return jax.random.normal(next(it), (i, o), f32) / jnp.sqrt(float(i))

    def vec(n, scale):
        return jax.random.normal(next(it), (n,), f32) * scale

    p = {}
    p["ln1_w"] = 1.0 + vec(H, 0.02)
    p["ln1_b"] = vec(H, 0.02)
    for name in ["x_r", "x_w", "x_k", "x_v", "x_a", "x_g"]:
        p[name] = jax.random.uniform(next(it), (H,), f32)
    p["w_r"] = mat(H, H)
    p["w_k"] = mat(H, H)
    p["w_v"] = mat(H, H)
    p["w_o"] = mat(H, H)
    p["w1"] = mat(H, d_decay); p["w2"] = mat(d_decay, H); p["w0"] = vec(H, 0.5)
    p["a1"] = mat(H, d_aaa);   p["a2"] = mat(d_aaa, H);   p["a0"] = vec(H, 0.5)
    p["v1"] = mat(H, d_mv);    p["v2"] = mat(d_mv, H);    p["v0"] = vec(H, 0.5)
    p["g1"] = mat(H, d_gate);  p["g2"] = mat(d_gate, H)
    p["k_k"] = jax.random.normal(next(it), (NH, N), f32) * 0.5
    p["k_a"] = 1.0 + jax.random.normal(next(it), (NH, N), f32) * 0.5
    p["r_k"] = jax.random.normal(next(it), (NH, N), f32) * 0.5
    p["lnx_w"] = 1.0 + vec(H, 0.02)
    p["lnx_b"] = vec(H, 0.02)
    return p


if __name__ == "__main__":
    # Small, module-consistent shapes: hidden=64, head_size=32 -> 2 heads, seq=16,
    # processed as two 8-token chunks to exercise the cross-chunk carries.
    H, N, T = 64, 32, 16
    NH = H // N
    D_DECAY, D_AAA, D_GATE, D_MV = 16, 16, 32, 16

    key = jax.random.PRNGKey(0)
    k_x, k_p, k_s1, k_s2, k_vf = jax.random.split(key, 5)
    params = init_params(k_p, H, NH, N, D_DECAY, D_AAA, D_GATE, D_MV)

    x = jax.random.normal(k_x, (1, T, H), f32)
    state1 = jax.random.normal(k_s1, (1, 1, H), f32)
    state2 = jax.random.normal(k_s2, (NH, N, N), f32) * 0.1
    v_first = jax.random.normal(k_vf, (T, NH, N), f32)

    # Reference first (the kernel aliases/donates its state input buffers).
    ref_out, ref_s1, ref_s2 = _ref_forward(x, state1, state2, v_first, params)
    jax.block_until_ready((ref_out, ref_s1, ref_s2))

    out, state1_out, state2_out = rwkv7_self_attention(
        x, state1, state2, v_first, params, chunk=8)
    jax.block_until_ready((out, state1_out, state2_out))

    assert out.shape == (1, T, H)
    assert state1_out.shape == (1, 1, H)
    assert state2_out.shape == (NH, N, N)
    assert bool(jnp.all(jnp.isfinite(out)))
    tol = dict(atol=2e-2, rtol=2e-2)
    assert bool(jnp.allclose(out, ref_out, **tol)), "output mismatch vs reference"
    assert bool(jnp.allclose(state1_out, ref_s1, **tol)), "state1 mismatch vs reference"
    assert bool(jnp.allclose(state2_out, ref_s2, **tol)), "state2 mismatch vs reference"
    print("KERNEL_OK")
</pallas_src>

<mosaic_0001>
module attributes {stable_mosaic.version = 11 : i64} {
  func.func @rwkv7_att_kernel(%arg0: i32, %arg1: memref<8x64xf32, #tpu.memory_space<vmem>>, %arg2: memref<1x64xf32, #tpu.memory_space<vmem>>, %arg3: memref<1x32x64xf32, #tpu.memory_space<vmem>>, %arg4: memref<8x64xf32, #tpu.memory_space<vmem>>, %arg5: memref<64x64xbf16, #tpu.memory_space<vmem>>, %arg6: memref<32x64xf32, #tpu.memory_space<vmem>>, %arg7: memref<64x2xbf16, #tpu.memory_space<vmem>>, %arg8: memref<2x64xf32, #tpu.memory_space<vmem>>, %arg9: memref<1x64xf32, #tpu.memory_space<vmem>>, %arg10: memref<1x64xf32, #tpu.memory_space<vmem>>, %arg11: memref<1x64xf32, #tpu.memory_space<vmem>>, %arg12: memref<1x64xf32, #tpu.memory_space<vmem>>, %arg13: memref<1x64xf32, #tpu.memory_space<vmem>>, %arg14: memref<1x64xf32, #tpu.memory_space<vmem>>, %arg15: memref<1x64xf32, #tpu.memory_space<vmem>>, %arg16: memref<1x64xf32, #tpu.memory_space<vmem>>, %arg17: memref<64x64xbf16, #tpu.memory_space<vmem>>, %arg18: memref<64x64xbf16, #tpu.memory_space<vmem>>, %arg19: memref<64x64xbf16, #tpu.memory_space<vmem>>, %arg20: memref<64x64xbf16, #tpu.memory_space<vmem>>, %arg21: memref<64x16xbf16, #tpu.memory_space<vmem>>, %arg22: memref<16x64xbf16, #tpu.memory_space<vmem>>, %arg23: memref<1x64xf32, #tpu.memory_space<vmem>>, %arg24: memref<64x16xbf16, #tpu.memory_space<vmem>>, %arg25: memref<16x64xbf16, #tpu.memory_space<vmem>>, %arg26: memref<1x64xf32, #tpu.memory_space<vmem>>, %arg27: memref<64x16xbf16, #tpu.memory_space<vmem>>, %arg28: memref<16x64xbf16, #tpu.memory_space<vmem>>, %arg29: memref<1x64xf32, #tpu.memory_space<vmem>>, %arg30: memref<64x32xbf16, #tpu.memory_space<vmem>>, %arg31: memref<32x64xbf16, #tpu.memory_space<vmem>>, %arg32: memref<1x64xf32, #tpu.memory_space<vmem>>, %arg33: memref<1x64xf32, #tpu.memory_space<vmem>>, %arg34: memref<1x64xf32, #tpu.memory_space<vmem>>, %arg35: memref<1x64xf32, #tpu.memory_space<vmem>>, %arg36: memref<1x64xf32, #tpu.memory_space<vmem>>, %arg37: memref<8x64xf32, #tpu.memory_space<vmem>>, %arg38: memref<1x64xf32, #tpu.memory_space<vmem>>, %arg39: memref<1x32x64xf32, #tpu.memory_space<vmem>>, %arg40: memref<8x64xf32, #tpu.memory_space<vmem>>, %arg41: memref<8x64xf32, #tpu.memory_space<vmem>>, %arg42: memref<8x64xf32, #tpu.memory_space<vmem>>, %arg43: memref<8x64xf32, #tpu.memory_space<vmem>>, %arg44: memref<8x64xf32, #tpu.memory_space<vmem>>, %arg45: memref<8x64xf32, #tpu.memory_space<vmem>>) attributes {dimension_semantics = [#tpu.dimension_semantics<arbitrary>], iteration_bounds = array<i64: 2>, scalar_prefetch = 0 : i64, scratch_operands = 6 : i64, tpu.core_type = #tpu.core_type<tc>, window_params = [{transform_indices = @transform_0, window_bounds = array<i64: 8, 64>}, {pipeline_mode = #tpu.pipeline_mode<synchronous>, transform_indices = @transform_1, window_bounds = array<i64: 1, 64>}, {pipeline_mode = #tpu.pipeline_mode<synchronous>, transform_indices = @transform_2, window_bounds = array<i64: 1, 32, 64>}, {transform_indices = @transform_3, window_bounds = array<i64: 8, 64>}, {pipeline_mode = #tpu.pipeline_mode<synchronous>, transform_indices = @transform_4, window_bounds = array<i64: 64, 64>}, {pipeline_mode = #tpu.pipeline_mode<synchronous>, transform_indices = @transform_5, window_bounds = array<i64: 32, 64>}, {pipeline_mode = #tpu.pipeline_mode<synchronous>, transform_indices = @transform_6, window_bounds = array<i64: 64, 2>}, {pipeline_mode = #tpu.pipeline_mode<synchronous>, transform_indices = @transform_7, window_bounds = array<i64: 2, 64>}, {pipeline_mode = #tpu.pipeline_mode<synchronous>, transform_indices = @transform_8, window_bounds = array<i64: 1, 64>}, {pipeline_mode = #tpu.pipeline_mode<synchronous>, transform_indices = @transform_9, window_bounds = array<i64: 1, 64>}, {pipeline_mode = #tpu.pipeline_mode<synchronous>, transform_indices = @transform_10, window_bounds = array<i64: 1, 64>}, {pipeline_mode = #tpu.pipeline_mode<synchronous>, transform_indices = @transform_11, window_bounds = array<i64: 1, 64>}, {pipeline_mode = #tpu.pipeline_mode<synchronous>, transform_indices = @transform_12, window_bounds = array<i64: 1, 64>}, {pipeline_mode = #tpu.pipeline_mode<synchronous>, transform_indices = @transform_13, window_bounds = array<i64: 1, 64>}, {pipeline_mode = #tpu.pipeline_mode<synchronous>, transform_indices = @transform_14, window_bounds = array<i64: 1, 64>}, {pipeline_mode = #tpu.pipeline_mode<synchronous>, transform_indices = @transform_15, window_bounds = array<i64: 1, 64>}, {pipeline_mode = #tpu.pipeline_mode<synchronous>, transform_indices = @transform_16, window_bounds = array<i64: 64, 64>}, {pipeline_mode = #tpu.pipeline_mode<synchronous>, transform_indices = @transform_17, window_bounds = array<i64: 64, 64>}, {pipeline_mode = #tpu.pipeline_mode<synchronous>, transform_indices = @transform_18, window_bounds = array<i64: 64, 64>}, {pipeline_mode = #tpu.pipeline_mode<synchronous>, transform_indices = @transform_19, window_bounds = array<i64: 64, 64>}, {pipeline_mode = #tpu.pipeline_mode<synchronous>, transform_indices = @transform_20, window_bounds = array<i64: 64, 16>}, {pipeline_mode = #tpu.pipeline_mode<synchronous>, transform_indices = @transform_21, window_bounds = array<i64: 16, 64>}, {pipeline_mode = #tpu.pipeline_mode<synchronous>, transform_indices = @transform_22, window_bounds = array<i64: 1, 64>}, {pipeline_mode = #tpu.pipeline_mode<synchronous>, transform_indices = @transform_23, window_bounds = array<i64: 64, 16>}, {pipeline_mode = #tpu.pipeline_mode<synchronous>, transform_indices = @transform_24, window_bounds = array<i64: 16, 64>}, {pipeline_mode = #tpu.pipeline_mode<synchronous>, transform_indices = @transform_25, window_bounds = array<i64: 1, 64>}, {pipeline_mode = #tpu.pipeline_mode<synchronous>, transform_indices = @transform_26, window_bounds = array<i64: 64, 16>}, {pipeline_mode = #tpu.pipeline_mode<synchronous>, transform_indices = @transform_27, window_bounds = array<i64: 16, 64>}, {pipeline_mode = #tpu.pipeline_mode<synchronous>, transform_indices = @transform_28, window_bounds = array<i64: 1, 64>}, {pipeline_mode = #tpu.pipeline_mode<synchronous>, transform_indices = @transform_29, window_bounds = array<i64: 64, 32>}, {pipeline_mode = #tpu.pipeline_mode<synchronous>, transform_indices = @transform_30, window_bounds = array<i64: 32, 64>}, {pipeline_mode = #tpu.pipeline_mode<synchronous>, transform_indices = @transform_31, window_bounds = array<i64: 1, 64>}, {pipeline_mode = #tpu.pipeline_mode<synchronous>, transform_indices = @transform_32, window_bounds = array<i64: 1, 64>}, {pipeline_mode = #tpu.pipeline_mode<synchronous>, transform_indices = @transform_33, window_bounds = array<i64: 1, 64>}, {pipeline_mode = #tpu.pipeline_mode<synchronous>, transform_indices = @transform_34, window_bounds = array<i64: 1, 64>}, {pipeline_mode = #tpu.pipeline_mode<synchronous>, transform_indices = @transform_35, window_bounds = array<i64: 1, 64>}, {transform_indices = @transform_36, window_bounds = array<i64: 8, 64>}, {pipeline_mode = #tpu.pipeline_mode<synchronous>, transform_indices = @transform_37, window_bounds = array<i64: 1, 64>}, {pipeline_mode = #tpu.pipeline_mode<synchronous>, transform_indices = @transform_38, window_bounds = array<i64: 1, 32, 64>}]} {
    %c0_i32 = arith.constant 0 : i32
    %0 = arith.cmpi eq, %arg0, %c0_i32 : i32
    %1 = arith.extui %0 : i1 to i32
    %c0_i32_0 = arith.constant 0 : i32
    %2 = arith.cmpi ne, %1, %c0_i32_0 : i32
    scf.if %2 {
      %c0_220 = arith.constant 0 : index
      %c0_221 = arith.constant 0 : index
      %515 = vector.load %arg2[%c0_220, %c0_221] : memref<1x64xf32, #tpu.memory_space<vmem>>, vector<1x64xf32>
      %c0_222 = arith.constant 0 : index
      %c0_223 = arith.constant 0 : index
      %516 = vector.load %arg38[%c0_222, %c0_223] : memref<1x64xf32, #tpu.memory_space<vmem>>, vector<1x64xf32>
      tpu.vector_store %arg38[%c0_222, %c0_223], %515 {strides = array<i32>} : memref<1x64xf32, #tpu.memory_space<vmem>>, vector<1x64xf32>,
      %c0_224 = arith.constant 0 : index
      %c0_225 = arith.constant 0 : index
      %c0_226 = arith.constant 0 : index
      %517 = vector.load %arg3[%c0_224, %c0_225, %c0_226] : memref<1x32x64xf32, #tpu.memory_space<vmem>>, vector<1x32x64xf32>
      %c0_227 = arith.constant 0 : index
      %c0_228 = arith.constant 0 : index
      %c0_229 = arith.constant 0 : index
      %518 = vector.load %arg39[%c0_227, %c0_228, %c0_229] : memref<1x32x64xf32, #tpu.memory_space<vmem>>, vector<1x32x64xf32>
      tpu.vector_store %arg39[%c0_227, %c0_228, %c0_229], %517 {strides = array<i32>} : memref<1x32x64xf32, #tpu.memory_space<vmem>>, vector<1x32x64xf32>,
    } else {
    }
    %c0 = arith.constant 0 : index
    %c0_1 = arith.constant 0 : index
    %3 = vector.load %arg1[%c0, %c0_1] : memref<8x64xf32, #tpu.memory_space<vmem>>, vector<8x64xf32>
    %cst = arith.constant dense<0.000000e+00> : vector<8xf32>
    %4 = vector.multi_reduction <add>, %3, %cst [1] : vector<8x64xf32> to vector<8xf32>
    %5 = vector.shape_cast %4 : vector<8xf32> to vector<8x1xf32>
    %cst_2 = arith.constant 6.400000e+01 : f32
    %6 = vector.broadcast %cst_2 : f32 to vector<8x1xf32>
    %7 = arith.divf %5, %6 : vector<8x1xf32>
    %8 = vector.broadcast %7 : vector<8x1xf32> to vector<8x64xf32>
    %9 = arith.subf %3, %8 : vector<8x64xf32>
    %10 = arith.mulf %9, %9 : vector<8x64xf32>
    %cst_3 = arith.constant dense<0.000000e+00> : vector<8xf32>
    %11 = vector.multi_reduction <add>, %10, %cst_3 [1] : vector<8x64xf32> to vector<8xf32>
    %12 = vector.shape_cast %11 : vector<8xf32> to vector<8x1xf32>
    %cst_4 = arith.constant 6.400000e+01 : f32
    %13 = vector.broadcast %cst_4 : f32 to vector<8x1xf32>
    %14 = arith.divf %12, %13 : vector<8x1xf32>
    %cst_5 = arith.constant 9.99999974E-6 : f32
    %15 = vector.broadcast %cst_5 : f32 to vector<8x1xf32>
    %16 = arith.addf %14, %15 : vector<8x1xf32>
    %17 = math.rsqrt %16 : vector<8x1xf32>
    %18 = vector.broadcast %17 : vector<8x1xf32> to vector<8x64xf32>
    %19 = arith.mulf %9, %18 : vector<8x64xf32>
    %c0_6 = arith.constant 0 : index
    %c0_7 = arith.constant 0 : index
    %20 = vector.load %arg9[%c0_6, %c0_7] : memref<1x64xf32, #tpu.memory_space<vmem>>, vector<1x64xf32>
    %21 = vector.broadcast %20 : vector<1x64xf32> to vector<8x64xf32>
    %22 = arith.mulf %19, %21 : vector<8x64xf32>
    %c0_8 = arith.constant 0 : index
    %c0_9 = arith.constant 0 : index
    %23 = vector.load %arg10[%c0_8, %c0_9] : memref<1x64xf32, #tpu.memory_space<vmem>>, vector<1x64xf32>
    %24 = vector.broadcast %23 : vector<1x64xf32> to vector<8x64xf32>
    %25 = arith.addf %22, %24 : vector<8x64xf32>
    %c0_10 = arith.constant 0 : index
    %c0_11 = arith.constant 0 : index
    %26 = vector.load %arg38[%c0_10, %c0_11] : memref<1x64xf32, #tpu.memory_space<vmem>>, vector<1x64xf32>
    %27 = vector.extract_strided_slice %25 {offsets = [0, 0], sizes = [7, 64], strides = [1, 1]} : vector<8x64xf32> to vector<7x64xf32>
    %28 = tpu.concatenate %26, %27 in 0 : vector<1x64xf32>, vector<7x64xf32> -> vector<8x64xf32>
    %29 = vector.extract_strided_slice %25 {offsets = [7, 0], sizes = [1, 64], strides = [1, 1]} : vector<8x64xf32> to vector<1x64xf32>
    %c0_12 = arith.constant 0 : index
    %c0_13 = arith.constant 0 : index
    %30 = vector.load %arg38[%c0_12, %c0_13] : memref<1x64xf32, #tpu.memory_space<vmem>>, vector<1x64xf32>
    tpu.vector_store %arg38[%c0_12, %c0_13], %29 {strides = array<i32>} : memref<1x64xf32, #tpu.memory_space<vmem>>, vector<1x64xf32>,
    %31 = arith.subf %28, %25 : vector<8x64xf32>
    %c0_14 = arith.constant 0 : index
    %c0_15 = arith.constant 0 : index
    %32 = vector.load %arg11[%c0_14, %c0_15] : memref<1x64xf32, #tpu.memory_space<vmem>>, vector<1x64xf32>
    %33 = vector.broadcast %32 : vector<1x64xf32> to vector<8x64xf32>
    %34 = arith.mulf %31, %33 : vector<8x64xf32>
    %35 = arith.addf %25, %34 : vector<8x64xf32>
    %c0_16 = arith.constant 0 : index
    %c0_17 = arith.constant 0 : index
    %36 = vector.load %arg12[%c0_16, %c0_17] : memref<1x64xf32, #tpu.memory_space<vmem>>, vector<1x64xf32>
    %37 = vector.broadcast %36 : vector<1x64xf32> to vector<8x64xf32>
    %38 = arith.mulf %31, %37 : vector<8x64xf32>
    %39 = arith.addf %25, %38 : vector<8x64xf32>
    %c0_18 = arith.constant 0 : index
    %c0_19 = arith.constant 0 : index
    %40 = vector.load %arg13[%c0_18, %c0_19] : memref<1x64xf32, #tpu.memory_space<vmem>>, vector<1x64xf32>
    %41 = vector.broadcast %40 : vector<1x64xf32> to vector<8x64xf32>
    %42 = arith.mulf %31, %41 : vector<8x64xf32>
    %43 = arith.addf %25, %42 : vector<8x64xf32>
    %c0_20 = arith.constant 0 : index
    %c0_21 = arith.constant 0 : index
    %44 = vector.load %arg14[%c0_20, %c0_21] : memref<1x64xf32, #tpu.memory_space<vmem>>, vector<1x64xf32>
    %45 = vector.broadcast %44 : vector<1x64xf32> to vector<8x64xf32>
    %46 = arith.mulf %31, %45 : vector<8x64xf32>
    %47 = arith.addf %25, %46 : vector<8x64xf32>
    %c0_22 = arith.constant 0 : index
    %c0_23 = arith.constant 0 : index
    %48 = vector.load %arg15[%c0_22, %c0_23] : memref<1x64xf32, #tpu.memory_space<vmem>>, vector<1x64xf32>
    %49 = vector.broadcast %48 : vector<1x64xf32> to vector<8x64xf32>
    %50 = arith.mulf %31, %49 : vector<8x64xf32>
    %51 = arith.addf %25, %50 : vector<8x64xf32>
    %c0_24 = arith.constant 0 : index
    %c0_25 = arith.constant 0 : index
    %52 = vector.load %arg16[%c0_24, %c0_25] : memref<1x64xf32, #tpu.memory_space<vmem>>, vector<1x64xf32>
    %53 = vector.broadcast %52 : vector<1x64xf32> to vector<8x64xf32>
    %54 = arith.mulf %31, %53 : vector<8x64xf32>
    %55 = arith.addf %25, %54 : vector<8x64xf32>
    %56 = arith.truncf %35 : vector<8x64xf32> to vector<8x64xbf16>
    %c0_26 = arith.constant 0 : index
    %c0_27 = arith.constant 0 : index
    %57 = vector.load %arg17[%c0_26, %c0_27] : memref<64x64xbf16, #tpu.memory_space<vmem>>, vector<64x64xbf16>
    %cst_28 = arith.constant dense<0.000000e+00> : vector<8x64xf32>
    %58 = tpu.matmul %56, %57, %cst_28 {dimension_numbers = #tpu.dot_dimension_numbers<[1], [0], [0], [1], [0, 0, 1, 1], [], []>} : vector<8x64xbf16>, vector<64x64xbf16>, vector<8x64xf32> -> vector<8x64xf32>
    %59 = arith.truncf %43 : vector<8x64xf32> to vector<8x64xbf16>
    %c0_29 = arith.constant 0 : index
    %c0_30 = arith.constant 0 : index
    %60 = vector.load %arg18[%c0_29, %c0_30] : memref<64x64xbf16, #tpu.memory_space<vmem>>, vector<64x64xbf16>
    %cst_31 = arith.constant dense<0.000000e+00> : vector<8x64xf32>
    %61 = tpu.matmul %59, %60, %cst_31 {dimension_numbers = #tpu.dot_dimension_numbers<[1], [0], [0], [1], [0, 0, 1, 1], [], []>} : vector<8x64xbf16>, vector<64x64xbf16>, vector<8x64xf32> -> vector<8x64xf32>
    %62 = arith.truncf %47 : vector<8x64xf32> to vector<8x64xbf16>
    %c0_32 = arith.constant 0 : index
    %c0_33 = arith.constant 0 : index
    %63 = vector.load %arg19[%c0_32, %c0_33] : memref<64x64xbf16, #tpu.memory_space<vmem>>, vector<64x64xbf16>
    %cst_34 = arith.constant dense<0.000000e+00> : vector<8x64xf32>
    %64 = tpu.matmul %62, %63, %cst_34 {dimension_numbers = #tpu.dot_dimension_numbers<[1], [0], [0], [1], [0, 0, 1, 1], [], []>} : vector<8x64xbf16>, vector<64x64xbf16>, vector<8x64xf32> -> vector<8x64xf32>
    %65 = arith.truncf %55 : vector<8x64xf32> to vector<8x64xbf16>
    %c0_35 = arith.constant 0 : index
    %c0_36 = arith.constant 0 : index
    %66 = vector.load %arg30[%c0_35, %c0_36] : memref<64x32xbf16, #tpu.memory_space<vmem>>, vector<64x32xbf16>
    %cst_37 = arith.constant dense<0.000000e+00> : vector<8x32xf32>
    %67 = tpu.matmul %65, %66, %cst_37 {dimension_numbers = #tpu.dot_dimension_numbers<[1], [0], [0], [1], [0, 0, 1, 1], [], []>} : vector<8x64xbf16>, vector<64x32xbf16>, vector<8x32xf32> -> vector<8x32xf32>
    %68 = arith.negf %67 : vector<8x32xf32>
    %69 = math.exp %68 : vector<8x32xf32>
    %cst_38 = arith.constant 1.000000e+00 : f32
    %70 = vector.broadcast %cst_38 : f32 to vector<8x32xf32>
    %71 = arith.addf %70, %69 : vector<8x32xf32>
    %72 = arith.divf %70, %71 : vector<8x32xf32>
    %73 = arith.truncf %72 : vector<8x32xf32> to vector<8x32xbf16>
    %c0_39 = arith.constant 0 : index
    %c0_40 = arith.constant 0 : index
    %74 = vector.load %arg31[%c0_39, %c0_40] : memref<32x64xbf16, #tpu.memory_space<vmem>>, vector<32x64xbf16>
    %cst_41 = arith.constant dense<0.000000e+00> : vector<8x64xf32>
    %75 = tpu.matmul %73, %74, %cst_41 {dimension_numbers = #tpu.dot_dimension_numbers<[1], [0], [0], [1], [0, 0, 1, 1], [], []>} : vector<8x32xbf16>, vector<32x64xbf16>, vector<8x64xf32> -> vector<8x64xf32>
    %76 = arith.truncf %51 : vector<8x64xf32> to vector<8x64xbf16>
    %c0_42 = arith.constant 0 : index
    %c0_43 = arith.constant 0 : index
    %77 = vector.load %arg24[%c0_42, %c0_43] : memref<64x16xbf16, #tpu.memory_space<vmem>>, vector<64x16xbf16>
    %cst_44 = arith.constant dense<0.000000e+00> : vector<8x16xf32>
    %78 = tpu.matmul %76, %77, %cst_44 {dimension_numbers = #tpu.dot_dimension_numbers<[1], [0], [0], [1], [0, 0, 1, 1], [], []>} : vector<8x64xbf16>, vector<64x16xbf16>, vector<8x16xf32> -> vector<8x16xf32>
    %79 = arith.truncf %78 : vector<8x16xf32> to vector<8x16xbf16>
    %c0_45 = arith.constant 0 : index
    %c0_46 = arith.constant 0 : index
    %80 = vector.load %arg25[%c0_45, %c0_46] : memref<16x64xbf16, #tpu.memory_space<vmem>>, vector<16x64xbf16>
    %cst_47 = arith.constant dense<0.000000e+00> : vector<8x64xf32>
    %81 = tpu.matmul %79, %80, %cst_47 {dimension_numbers = #tpu.dot_dimension_numbers<[1], [0], [0], [1], [0, 0, 1, 1], [], []>} : vector<8x16xbf16>, vector<16x64xbf16>, vector<8x64xf32> -> vector<8x64xf32>
    %c0_48 = arith.constant 0 : index
    %c0_49 = arith.constant 0 : index
    %82 = vector.load %arg26[%c0_48, %c0_49] : memref<1x64xf32, #tpu.memory_space<vmem>>, vector<1x64xf32>
    %83 = vector.broadcast %82 : vector<1x64xf32> to vector<8x64xf32>
    %84 = arith.addf %81, %83 : vector<8x64xf32>
    %85 = arith.negf %84 : vector<8x64xf32>
    %86 = math.exp %85 : vector<8x64xf32>
    %cst_50 = arith.constant 1.000000e+00 : f32
    %87 = vector.broadcast %cst_50 : f32 to vector<8x64xf32>
    %88 = arith.addf %87, %86 : vector<8x64xf32>
    %89 = arith.divf %87, %88 : vector<8x64xf32>
    %90 = arith.truncf %39 : vector<8x64xf32> to vector<8x64xbf16>
    %c0_51 = arith.constant 0 : index
    %c0_52 = arith.constant 0 : index
    %91 = vector.load %arg21[%c0_51, %c0_52] : memref<64x16xbf16, #tpu.memory_space<vmem>>, vector<64x16xbf16>
    %cst_53 = arith.constant dense<0.000000e+00> : vector<8x16xf32>
    %92 = tpu.matmul %90, %91, %cst_53 {dimension_numbers = #tpu.dot_dimension_numbers<[1], [0], [0], [1], [0, 0, 1, 1], [], []>} : vector<8x64xbf16>, vector<64x16xbf16>, vector<8x16xf32> -> vector<8x16xf32>
    %93 = math.tanh %92 : vector<8x16xf32>
    %94 = arith.truncf %93 : vector<8x16xf32> to vector<8x16xbf16>
    %c0_54 = arith.constant 0 : index
    %c0_55 = arith.constant 0 : index
    %95 = vector.load %arg22[%c0_54, %c0_55] : memref<16x64xbf16, #tpu.memory_space<vmem>>, vector<16x64xbf16>
    %cst_56 = arith.constant dense<0.000000e+00> : vector<8x64xf32>
    %96 = tpu.matmul %94, %95, %cst_56 {dimension_numbers = #tpu.dot_dimension_numbers<[1], [0], [0], [1], [0, 0, 1, 1], [], []>} : vector<8x16xbf16>, vector<16x64xbf16>, vector<8x64xf32> -> vector<8x64xf32>
    %c0_57 = arith.constant 0 : index
    %c0_58 = arith.constant 0 : index
    %97 = vector.load %arg23[%c0_57, %c0_58] : memref<1x64xf32, #tpu.memory_space<vmem>>, vector<1x64xf32>
    %98 = vector.broadcast %97 : vector<1x64xf32> to vector<8x64xf32>
    %99 = arith.addf %96, %98 : vector<8x64xf32>
    %100 = arith.negf %99 : vector<8x64xf32>
    %101 = math.exp %100 : vector<8x64xf32>
    %cst_59 = arith.constant 1.000000e+00 : f32
    %102 = vector.broadcast %cst_59 : f32 to vector<8x64xf32>
    %103 = arith.addf %102, %101 : vector<8x64xf32>
    %104 = arith.divf %102, %103 : vector<8x64xf32>
    %cst_60 = arith.constant -6.065310e-01 : f32
    %105 = vector.broadcast %cst_60 : f32 to vector<8x64xf32>
    %106 = arith.mulf %105, %104 : vector<8x64xf32>
    %107 = math.exp %106 : vector<8x64xf32>
    %108 = arith.truncf %47 : vector<8x64xf32> to vector<8x64xbf16>
    %c0_61 = arith.constant 0 : index
    %c0_62 = arith.constant 0 : index
    %109 = vector.load %arg27[%c0_61, %c0_62] : memref<64x16xbf16, #tpu.memory_space<vmem>>, vector<64x16xbf16>
    %cst_63 = arith.constant dense<0.000000e+00> : vector<8x16xf32>
    %110 = tpu.matmul %108, %109, %cst_63 {dimension_numbers = #tpu.dot_dimension_numbers<[1], [0], [0], [1], [0, 0, 1, 1], [], []>} : vector<8x64xbf16>, vector<64x16xbf16>, vector<8x16xf32> -> vector<8x16xf32>
    %111 = arith.truncf %110 : vector<8x16xf32> to vector<8x16xbf16>
    %c0_64 = arith.constant 0 : index
    %c0_65 = arith.constant 0 : index
    %112 = vector.load %arg28[%c0_64, %c0_65] : memref<16x64xbf16, #tpu.memory_space<vmem>>, vector<16x64xbf16>
    %cst_66 = arith.constant dense<0.000000e+00> : vector<8x64xf32>
    %113 = tpu.matmul %111, %112, %cst_66 {dimension_numbers = #tpu.dot_dimension_numbers<[1], [0], [0], [1], [0, 0, 1, 1], [], []>} : vector<8x16xbf16>, vector<16x64xbf16>, vector<8x64xf32> -> vector<8x64xf32>
    %c0_67 = arith.constant 0 : index
    %c0_68 = arith.constant 0 : index
    %114 = vector.load %arg29[%c0_67, %c0_68] : memref<1x64xf32, #tpu.memory_space<vmem>>, vector<1x64xf32>
    %115 = vector.broadcast %114 : vector<1x64xf32> to vector<8x64xf32>
    %116 = arith.addf %113, %115 : vector<8x64xf32>
    %117 = arith.negf %116 : vector<8x64xf32>
    %118 = math.exp %117 : vector<8x64xf32>
    %cst_69 = arith.constant 1.000000e+00 : f32
    %119 = vector.broadcast %cst_69 : f32 to vector<8x64xf32>
    %120 = arith.addf %119, %118 : vector<8x64xf32>
    %121 = arith.divf %119, %120 : vector<8x64xf32>
    %c0_70 = arith.constant 0 : index
    %c0_71 = arith.constant 0 : index
    %122 = vector.load %arg32[%c0_70, %c0_71] : memref<1x64xf32, #tpu.memory_space<vmem>>, vector<1x64xf32>
    %123 = vector.broadcast %122 : vector<1x64xf32> to vector<8x64xf32>
    %124 = arith.mulf %61, %123 : vector<8x64xf32>
    %cst_72 = arith.constant 1.000000e+00 : f32
    %125 = vector.broadcast %cst_72 : f32 to vector<8x64xf32>
    %126 = arith.subf %89, %125 : vector<8x64xf32>
    %c0_73 = arith.constant 0 : index
    %c0_74 = arith.constant 0 : index
    %127 = vector.load %arg33[%c0_73, %c0_74] : memref<1x64xf32, #tpu.memory_space<vmem>>, vector<1x64xf32>
    %128 = vector.broadcast %127 : vector<1x64xf32> to vector<8x64xf32>
    %129 = arith.mulf %126, %128 : vector<8x64xf32>
    %cst_75 = arith.constant 1.000000e+00 : f32
    %130 = vector.broadcast %cst_75 : f32 to vector<8x64xf32>
    %131 = arith.addf %130, %129 : vector<8x64xf32>
    %132 = arith.mulf %61, %131 : vector<8x64xf32>
    %c0_76 = arith.constant 0 : index
    %c0_77 = arith.constant 0 : index
    %133 = vector.load %arg4[%c0_76, %c0_77] : memref<8x64xf32, #tpu.memory_space<vmem>>, vector<8x64xf32>
    %134 = arith.subf %133, %64 : vector<8x64xf32>
    %135 = arith.mulf %134, %121 : vector<8x64xf32>
    %136 = arith.addf %64, %135 : vector<8x64xf32>
    %137 = arith.mulf %124, %124 : vector<8x64xf32>
    %138 = arith.mulf %58, %132 : vector<8x64xf32>
    %c0_78 = arith.constant 0 : index
    %c0_79 = arith.constant 0 : index
    %139 = vector.load %arg34[%c0_78, %c0_79] : memref<1x64xf32, #tpu.memory_space<vmem>>, vector<1x64xf32>
    %140 = vector.broadcast %139 : vector<1x64xf32> to vector<8x64xf32>
    %141 = arith.mulf %138, %140 : vector<8x64xf32>
    %142 = tpu.concatenate %137, %141 in 0 : vector<8x64xf32>, vector<8x64xf32> -> vector<16x64xf32>
    %143 = arith.truncf %142 : vector<16x64xf32> to vector<16x64xbf16>
    %c0_80 = arith.constant 0 : index
    %c0_81 = arith.constant 0 : index
    %144 = vector.load %arg7[%c0_80, %c0_81] : memref<64x2xbf16, #tpu.memory_space<vmem>>, vector<64x2xbf16>
    %cst_82 = arith.constant dense<0.000000e+00> : vector<16x2xf32>
    %145 = tpu.matmul %143, %144, %cst_82 {dimension_numbers = #tpu.dot_dimension_numbers<[1], [0], [0], [1], [0, 0, 1, 1], [], []>} : vector<16x64xbf16>, vector<64x2xbf16>, vector<16x2xf32> -> vector<16x2xf32>
    %146 = vector.extract_strided_slice %145 {offsets = [0, 0], sizes = [8, 2], strides = [1, 1]} : vector<16x2xf32> to vector<8x2xf32>
    %147 = math.sqrt %146 : vector<8x2xf32>
    %cst_83 = arith.constant 9.99999996E-13 : f32
    %148 = vector.broadcast %cst_83 : f32 to vector<8x2xf32>
    %149 = arith.addf %147, %148 : vector<8x2xf32>
    %cst_84 = arith.constant 1.000000e+00 : f32
    %150 = vector.broadcast %cst_84 : f32 to vector<8x2xf32>
    %151 = arith.divf %150, %149 : vector<8x2xf32>
    %152 = vector.extract_strided_slice %145 {offsets = [8, 0], sizes = [8, 2], strides = [1, 1]} : vector<16x2xf32> to vector<8x2xf32>
    %153 = tpu.concatenate %151, %152 in 0 : vector<8x2xf32>, vector<8x2xf32> -> vector<16x2xf32>
    %c0_85 = arith.constant 0 : index
    %c0_86 = arith.constant 0 : index
    %154 = vector.load %arg8[%c0_85, %c0_86] : memref<2x64xf32, #tpu.memory_space<vmem>>, vector<2x64xf32>
    %cst_87 = arith.constant dense<0.000000e+00> : vector<16x64xf32>
    %155 = tpu.matmul %153, %154, %cst_87 {dimension_numbers = #tpu.dot_dimension_numbers<[1], [0], [0], [1], [0, 0, 1, 1], [], []>} : vector<16x2xf32>, vector<2x64xf32>, vector<16x64xf32> -> vector<16x64xf32>
    %156 = vector.extract_strided_slice %155 {offsets = [0, 0], sizes = [8, 64], strides = [1, 1]} : vector<16x64xf32> to vector<8x64xf32>
    %157 = arith.mulf %124, %156 : vector<8x64xf32>
    %158 = vector.extract_strided_slice %155 {offsets = [8, 0], sizes = [8, 64], strides = [1, 1]} : vector<16x64xf32> to vector<8x64xf32>
    %159 = arith.mulf %157, %89 : vector<8x64xf32>
    %cst_88 = arith.constant 0.000000e+00 : f32
    %160 = vector.broadcast %cst_88 : f32 to vector<8x64xf32>
    %161 = arith.subf %160, %157 : vector<8x64xf32>
    %c0_89 = arith.constant 0 : index
    %c0_90 = arith.constant 0 : index
    %162 = vector.load %arg40[%c0_89, %c0_90] : memref<8x64xf32, #tpu.memory_space<vmem>>, vector<8x64xf32>
    tpu.vector_store %arg40[%c0_89, %c0_90], %58 {strides = array<i32>} : memref<8x64xf32, #tpu.memory_space<vmem>>, vector<8x64xf32>,
    %c0_91 = arith.constant 0 : index
    %c0_92 = arith.constant 0 : index
    %163 = vector.load %arg41[%c0_91, %c0_92] : memref<8x64xf32, #tpu.memory_space<vmem>>, vector<8x64xf32>
    tpu.vector_store %arg41[%c0_91, %c0_92], %107 {strides = array<i32>} : memref<8x64xf32, #tpu.memory_space<vmem>>, vector<8x64xf32>,
    %c0_93 = arith.constant 0 : index
    %c0_94 = arith.constant 0 : index
    %164 = vector.load %arg42[%c0_93, %c0_94] : memref<8x64xf32, #tpu.memory_space<vmem>>, vector<8x64xf32>
    tpu.vector_store %arg42[%c0_93, %c0_94], %132 {strides = array<i32>} : memref<8x64xf32, #tpu.memory_space<vmem>>, vector<8x64xf32>,
    %c0_95 = arith.constant 0 : index
    %c0_96 = arith.constant 0 : index
    %165 = vector.load %arg43[%c0_95, %c0_96] : memref<8x64xf32, #tpu.memory_space<vmem>>, vector<8x64xf32>
    tpu.vector_store %arg43[%c0_95, %c0_96], %136 {strides = array<i32>} : memref<8x64xf32, #tpu.memory_space<vmem>>, vector<8x64xf32>,
    %c0_97 = arith.constant 0 : index
    %c0_98 = arith.constant 0 : index
    %166 = vector.load %arg44[%c0_97, %c0_98] : memref<8x64xf32, #tpu.memory_space<vmem>>, vector<8x64xf32>
    tpu.vector_store %arg44[%c0_97, %c0_98], %161 {strides = array<i32>} : memref<8x64xf32, #tpu.memory_space<vmem>>, vector<8x64xf32>,
    %c0_99 = arith.constant 0 : index
    %c0_100 = arith.constant 0 : index
    %167 = vector.load %arg45[%c0_99, %c0_100] : memref<8x64xf32, #tpu.memory_space<vmem>>, vector<8x64xf32>
    tpu.vector_store %arg45[%c0_99, %c0_100], %159 {strides = array<i32>} : memref<8x64xf32, #tpu.memory_space<vmem>>, vector<8x64xf32>,
    %c0_101 = arith.constant 0 : index
    %c0_102 = arith.constant 0 : index
    %168 = vector.load %arg5[%c0_101, %c0_102] : memref<64x64xbf16, #tpu.memory_space<vmem>>, vector<64x64xbf16>
    %c0_103 = arith.constant 0 : index
    %c0_104 = arith.constant 0 : index
    %169 = vector.load %arg6[%c0_103, %c0_104] : memref<32x64xf32, #tpu.memory_space<vmem>>, vector<32x64xf32>
    %c0_105 = arith.constant 0 : index
    %c0_106 = arith.constant 0 : index
    %c0_107 = arith.constant 0 : index
    %170 = vector.load %arg39[%c0_105, %c0_106, %c0_107] : memref<1x32x64xf32, #tpu.memory_space<vmem>>, vector<1x32x64xf32>
    %171 = vector.shape_cast %170 : vector<1x32x64xf32> to vector<32x64xf32>
    %c0_i32_108 = arith.constant 0 : i32
    %172 = arith.index_cast %c0_i32_108 : i32 to index
    %c0_109 = arith.constant 0 : index
    %173 = vector.load %arg40[%172, %c0_109] : memref<8x64xf32, #tpu.memory_space<vmem>>, vector<1x64xf32>
    %174 = arith.index_cast %c0_i32_108 : i32 to index
    %c0_110 = arith.constant 0 : index
    %175 = vector.load %arg41[%174, %c0_110] : memref<8x64xf32, #tpu.memory_space<vmem>>, vector<1x64xf32>
    %176 = arith.index_cast %c0_i32_108 : i32 to index
    %c0_111 = arith.constant 0 : index
    %177 = vector.load %arg42[%176, %c0_111] : memref<8x64xf32, #tpu.memory_space<vmem>>, vector<1x64xf32>
    %178 = arith.index_cast %c0_i32_108 : i32 to index
    %c0_112 = arith.constant 0 : index
    %179 = vector.load %arg43[%178, %c0_112] : memref<8x64xf32, #tpu.memory_space<vmem>>, vector<1x64xf32>
    %180 = arith.index_cast %c0_i32_108 : i32 to index
    %c0_113 = arith.constant 0 : index
    %181 = vector.load %arg44[%180, %c0_113] : memref<8x64xf32, #tpu.memory_space<vmem>>, vector<1x64xf32>
    %182 = arith.index_cast %c0_i32_108 : i32 to index
    %c0_114 = arith.constant 0 : index
    %183 = vector.load %arg45[%182, %c0_114] : memref<8x64xf32, #tpu.memory_space<vmem>>, vector<1x64xf32>
    %184 = vector.broadcast %181 : vector<1x64xf32> to vector<32x64xf32>
    %185 = arith.mulf %171, %184 : vector<32x64xf32>
    %186 = vector.broadcast %179 : vector<1x64xf32> to vector<32x64xf32>
    %187 = arith.mulf %169, %186 : vector<32x64xf32>
    %188 = tpu.concatenate %185, %187 in 0 : vector<32x64xf32>, vector<32x64xf32> -> vector<64x64xf32>
    %189 = arith.truncf %188 : vector<64x64xf32> to vector<64x64xbf16>
    %cst_115 = arith.constant dense<0.000000e+00> : vector<64x64xf32>
    %190 = tpu.matmul %189, %168, %cst_115 {dimension_numbers = #tpu.dot_dimension_numbers<[1], [0], [0], [1], [0, 0, 1, 1], [], []>} : vector<64x64xbf16>, vector<64x64xbf16>, vector<64x64xf32> -> vector<64x64xf32>
    %191 = vector.extract_strided_slice %190 {offsets = [0, 0], sizes = [32, 64], strides = [1, 1]} : vector<64x64xf32> to vector<32x64xf32>
    %192 = vector.extract_strided_slice %190 {offsets = [32, 0], sizes = [32, 64], strides = [1, 1]} : vector<64x64xf32> to vector<32x64xf32>
    %193 = vector.broadcast %175 : vector<1x64xf32> to vector<32x64xf32>
    %194 = arith.mulf %171, %193 : vector<32x64xf32>
    %195 = vector.broadcast %183 : vector<1x64xf32> to vector<32x64xf32>
    %196 = arith.mulf %191, %195 : vector<32x64xf32>
    %197 = arith.addf %194, %196 : vector<32x64xf32>
    %198 = vector.broadcast %177 : vector<1x64xf32> to vector<32x64xf32>
    %199 = arith.mulf %192, %198 : vector<32x64xf32>
    %200 = arith.addf %197, %199 : vector<32x64xf32>
    %201 = vector.broadcast %173 : vector<1x64xf32> to vector<32x64xf32>
    %202 = arith.mulf %200, %201 : vector<32x64xf32>
    %203 = arith.truncf %202 : vector<32x64xf32> to vector<32x64xbf16>
    %cst_116 = arith.constant dense<0.000000e+00> : vector<32x64xf32>
    %204 = tpu.matmul %203, %168, %cst_116 {dimension_numbers = #tpu.dot_dimension_numbers<[1], [0], [0], [1], [0, 0, 1, 1], [], []>} : vector<32x64xbf16>, vector<64x64xbf16>, vector<32x64xf32> -> vector<32x64xf32>
    %205 = arith.mulf %204, %169 : vector<32x64xf32>
    %cst_117 = arith.constant dense<0.000000e+00> : vector<64xf32>
    %206 = vector.multi_reduction <add>, %205, %cst_117 [0] : vector<32x64xf32> to vector<64xf32>
    %207 = vector.shape_cast %206 : vector<64xf32> to vector<1x64xf32>
    %208 = arith.index_cast %c0_i32_108 : i32 to index
    %c0_118 = arith.constant 0 : index
    %209 = vector.load %arg40[%208, %c0_118] : memref<8x64xf32, #tpu.memory_space<vmem>>, vector<1x64xf32>
    tpu.vector_store %arg40[%208, %c0_118], %207 {strides = array<i32>} : memref<8x64xf32, #tpu.memory_space<vmem>>, vector<1x64xf32>,
    %c1_i32 = arith.constant 1 : i32
    %210 = arith.index_cast %c1_i32 : i32 to index
    %c0_119 = arith.constant 0 : index
    %211 = vector.load %arg40[%210, %c0_119] : memref<8x64xf32, #tpu.memory_space<vmem>>, vector<1x64xf32>
    %212 = arith.index_cast %c1_i32 : i32 to index
    %c0_120 = arith.constant 0 : index
    %213 = vector.load %arg41[%212, %c0_120] : memref<8x64xf32, #tpu.memory_space<vmem>>, vector<1x64xf32>
    %214 = arith.index_cast %c1_i32 : i32 to index
    %c0_121 = arith.constant 0 : index
    %215 = vector.load %arg42[%214, %c0_121] : memref<8x64xf32, #tpu.memory_space<vmem>>, vector<1x64xf32>
    %216 = arith.index_cast %c1_i32 : i32 to index
    %c0_122 = arith.constant 0 : index
    %217 = vector.load %arg43[%216, %c0_122] : memref<8x64xf32, #tpu.memory_space<vmem>>, vector<1x64xf32>
    %218 = arith.index_cast %c1_i32 : i32 to index
    %c0_123 = arith.constant 0 : index
    %219 = vector.load %arg44[%218, %c0_123] : memref<8x64xf32, #tpu.memory_space<vmem>>, vector<1x64xf32>
    %220 = arith.index_cast %c1_i32 : i32 to index
    %c0_124 = arith.constant 0 : index
    %221 = vector.load %arg45[%220, %c0_124] : memref<8x64xf32, #tpu.memory_space<vmem>>, vector<1x64xf32>
    %222 = vector.broadcast %219 : vector<1x64xf32> to vector<32x64xf32>
    %223 = arith.mulf %200, %222 : vector<32x64xf32>
    %224 = vector.broadcast %217 : vector<1x64xf32> to vector<32x64xf32>
    %225 = arith.mulf %169, %224 : vector<32x64xf32>
    %226 = tpu.concatenate %223, %225 in 0 : vector<32x64xf32>, vector<32x64xf32> -> vector<64x64xf32>
    %227 = arith.truncf %226 : vector<64x64xf32> to vector<64x64xbf16>
    %cst_125 = arith.constant dense<0.000000e+00> : vector<64x64xf32>
    %228 = tpu.matmul %227, %168, %cst_125 {dimension_numbers = #tpu.dot_dimension_numbers<[1], [0], [0], [1], [0, 0, 1, 1], [], []>} : vector<64x64xbf16>, vector<64x64xbf16>, vector<64x64xf32> -> vector<64x64xf32>
    %229 = vector.extract_strided_slice %228 {offsets = [0, 0], sizes = [32, 64], strides = [1, 1]} : vector<64x64xf32> to vector<32x64xf32>
    %230 = vector.extract_strided_slice %228 {offsets = [32, 0], sizes = [32, 64], strides = [1, 1]} : vector<64x64xf32> to vector<32x64xf32>
    %231 = vector.broadcast %213 : vector<1x64xf32> to vector<32x64xf32>
    %232 = arith.mulf %200, %231 : vector<32x64xf32>
    %233 = vector.broadcast %221 : vector<1x64xf32> to vector<32x64xf32>
    %234 = arith.mulf %229, %233 : vector<32x64xf32>
    %235 = arith.addf %232, %234 : vector<32x64xf32>
    %236 = vector.broadcast %215 : vector<1x64xf32> to vector<32x64xf32>
    %237 = arith.mulf %230, %236 : vector<32x64xf32>
    %238 = arith.addf %235, %237 : vector<32x64xf32>
    %239 = vector.broadcast %211 : vector<1x64xf32> to vector<32x64xf32>
    %240 = arith.mulf %238, %239 : vector<32x64xf32>
    %241 = arith.truncf %240 : vector<32x64xf32> to vector<32x64xbf16>
    %cst_126 = arith.constant dense<0.000000e+00> : vector<32x64xf32>
    %242 = tpu.matmul %241, %168, %cst_126 {dimension_numbers = #tpu.dot_dimension_numbers<[1], [0], [0], [1], [0, 0, 1, 1], [], []>} : vector<32x64xbf16>, vector<64x64xbf16>, vector<32x64xf32> -> vector<32x64xf32>
    %243 = arith.mulf %242, %169 : vector<32x64xf32>
    %cst_127 = arith.constant dense<0.000000e+00> : vector<64xf32>
    %244 = vector.multi_reduction <add>, %243, %cst_127 [0] : vector<32x64xf32> to vector<64xf32>
    %245 = vector.shape_cast %244 : vector<64xf32> to vector<1x64xf32>
    %246 = arith.index_cast %c1_i32 : i32 to index
    %c0_128 = arith.constant 0 : index
    %247 = vector.load %arg40[%246, %c0_128] : memref<8x64xf32, #tpu.memory_space<vmem>>, vector<1x64xf32>
    tpu.vector_store %arg40[%246, %c0_128], %245 {strides = array<i32>} : memref<8x64xf32, #tpu.memory_space<vmem>>, vector<1x64xf32>,
    %c2_i32 = arith.constant 2 : i32
    %248 = arith.index_cast %c2_i32 : i32 to index
    %c0_129 = arith.constant 0 : index
    %249 = vector.load %arg40[%248, %c0_129] : memref<8x64xf32, #tpu.memory_space<vmem>>, vector<1x64xf32>
    %250 = arith.index_cast %c2_i32 : i32 to index
    %c0_130 = arith.constant 0 : index
    %251 = vector.load %arg41[%250, %c0_130] : memref<8x64xf32, #tpu.memory_space<vmem>>, vector<1x64xf32>
    %252 = arith.index_cast %c2_i32 : i32 to index
    %c0_131 = arith.constant 0 : index
    %253 = vector.load %arg42[%252, %c0_131] : memref<8x64xf32, #tpu.memory_space<vmem>>, vector<1x64xf32>
    %254 = arith.index_cast %c2_i32 : i32 to index
    %c0_132 = arith.constant 0 : index
    %255 = vector.load %arg43[%254, %c0_132] : memref<8x64xf32, #tpu.memory_space<vmem>>, vector<1x64xf32>
    %256 = arith.index_cast %c2_i32 : i32 to index
    %c0_133 = arith.constant 0 : index
    %257 = vector.load %arg44[%256, %c0_133] : memref<8x64xf32, #tpu.memory_space<vmem>>, vector<1x64xf32>
    %258 = arith.index_cast %c2_i32 : i32 to index
    %c0_134 = arith.constant 0 : index
    %259 = vector.load %arg45[%258, %c0_134] : memref<8x64xf32, #tpu.memory_space<vmem>>, vector<1x64xf32>
    %260 = vector.broadcast %257 : vector<1x64xf32> to vector<32x64xf32>
    %261 = arith.mulf %238, %260 : vector<32x64xf32>
    %262 = vector.broadcast %255 : vector<1x64xf32> to vector<32x64xf32>
    %263 = arith.mulf %169, %262 : vector<32x64xf32>
    %264 = tpu.concatenate %261, %263 in 0 : vector<32x64xf32>, vector<32x64xf32> -> vector<64x64xf32>
    %265 = arith.truncf %264 : vector<64x64xf32> to vector<64x64xbf16>
    %cst_135 = arith.constant dense<0.000000e+00> : vector<64x64xf32>
    %266 = tpu.matmul %265, %168, %cst_135 {dimension_numbers = #tpu.dot_dimension_numbers<[1], [0], [0], [1], [0, 0, 1, 1], [], []>} : vector<64x64xbf16>, vector<64x64xbf16>, vector<64x64xf32> -> vector<64x64xf32>
    %267 = vector.extract_strided_slice %266 {offsets = [0, 0], sizes = [32, 64], strides = [1, 1]} : vector<64x64xf32> to vector<32x64xf32>
    %268 = vector.extract_strided_slice %266 {offsets = [32, 0], sizes = [32, 64], strides = [1, 1]} : vector<64x64xf32> to vector<32x64xf32>
    %269 = vector.broadcast %251 : vector<1x64xf32> to vector<32x64xf32>
    %270 = arith.mulf %238, %269 : vector<32x64xf32>
    %271 = vector.broadcast %259 : vector<1x64xf32> to vector<32x64xf32>
    %272 = arith.mulf %267, %271 : vector<32x64xf32>
    %273 = arith.addf %270, %272 : vector<32x64xf32>
    %274 = vector.broadcast %253 : vector<1x64xf32> to vector<32x64xf32>
    %275 = arith.mulf %268, %274 : vector<32x64xf32>
    %276 = arith.addf %273, %275 : vector<32x64xf32>
    %277 = vector.broadcast %249 : vector<1x64xf32> to vector<32x64xf32>
    %278 = arith.mulf %276, %277 : vector<32x64xf32>
    %279 = arith.truncf %278 : vector<32x64xf32> to vector<32x64xbf16>
    %cst_136 = arith.constant dense<0.000000e+00> : vector<32x64xf32>
    %280 = tpu.matmul %279, %168, %cst_136 {dimension_numbers = #tpu.dot_dimension_numbers<[1], [0], [0], [1], [0, 0, 1, 1], [], []>} : vector<32x64xbf16>, vector<64x64xbf16>, vector<32x64xf32> -> vector<32x64xf32>
    %281 = arith.mulf %280, %169 : vector<32x64xf32>
    %cst_137 = arith.constant dense<0.000000e+00> : vector<64xf32>
    %282 = vector.multi_reduction <add>, %281, %cst_137 [0] : vector<32x64xf32> to vector<64xf32>
    %283 = vector.shape_cast %282 : vector<64xf32> to vector<1x64xf32>
    %284 = arith.index_cast %c2_i32 : i32 to index
    %c0_138 = arith.constant 0 : index
    %285 = vector.load %arg40[%284, %c0_138] : memref<8x64xf32, #tpu.memory_space<vmem>>, vector<1x64xf32>
    tpu.vector_store %arg40[%284, %c0_138], %283 {strides = array<i32>} : memref<8x64xf32, #tpu.memory_space<vmem>>, vector<1x64xf32>,
    %c3_i32 = arith.constant 3 : i32
    %286 = arith.index_cast %c3_i32 : i32 to index
    %c0_139 = arith.constant 0 : index
    %287 = vector.load %arg40[%286, %c0_139] : memref<8x64xf32, #tpu.memory_space<vmem>>, vector<1x64xf32>
    %288 = arith.index_cast %c3_i32 : i32 to index
    %c0_140 = arith.constant 0 : index
    %289 = vector.load %arg41[%288, %c0_140] : memref<8x64xf32, #tpu.memory_space<vmem>>, vector<1x64xf32>
    %290 = arith.index_cast %c3_i32 : i32 to index
    %c0_141 = arith.constant 0 : index
    %291 = vector.load %arg42[%290, %c0_141] : memref<8x64xf32, #tpu.memory_space<vmem>>, vector<1x64xf32>
    %292 = arith.index_cast %c3_i32 : i32 to index
    %c0_142 = arith.constant 0 : index
    %293 = vector.load %arg43[%292, %c0_142] : memref<8x64xf32, #tpu.memory_space<vmem>>, vector<1x64xf32>
    %294 = arith.index_cast %c3_i32 : i32 to index
    %c0_143 = arith.constant 0 : index
    %295 = vector.load %arg44[%294, %c0_143] : memref<8x64xf32, #tpu.memory_space<vmem>>, vector<1x64xf32>
    %296 = arith.index_cast %c3_i32 : i32 to index
    %c0_144 = arith.constant 0 : index
    %297 = vector.load %arg45[%296, %c0_144] : memref<8x64xf32, #tpu.memory_space<vmem>>, vector<1x64xf32>
    %298 = vector.broadcast %295 : vector<1x64xf32> to vector<32x64xf32>
    %299 = arith.mulf %276, %298 : vector<32x64xf32>
    %300 = vector.broadcast %293 : vector<1x64xf32> to vector<32x64xf32>
    %301 = arith.mulf %169, %300 : vector<32x64xf32>
    %302 = tpu.concatenate %299, %301 in 0 : vector<32x64xf32>, vector<32x64xf32> -> vector<64x64xf32>
    %303 = arith.truncf %302 : vector<64x64xf32> to vector<64x64xbf16>
    %cst_145 = arith.constant dense<0.000000e+00> : vector<64x64xf32>
    %304 = tpu.matmul %303, %168, %cst_145 {dimension_numbers = #tpu.dot_dimension_numbers<[1], [0], [0], [1], [0, 0, 1, 1], [], []>} : vector<64x64xbf16>, vector<64x64xbf16>, vector<64x64xf32> -> vector<64x64xf32>
    %305 = vector.extract_strided_slice %304 {offsets = [0, 0], sizes = [32, 64], strides = [1, 1]} : vector<64x64xf32> to vector<32x64xf32>
    %306 = vector.extract_strided_slice %304 {offsets = [32, 0], sizes = [32, 64], strides = [1, 1]} : vector<64x64xf32> to vector<32x64xf32>
    %307 = vector.broadcast %289 : vector<1x64xf32> to vector<32x64xf32>
    %308 = arith.mulf %276, %307 : vector<32x64xf32>
    %309 = vector.broadcast %297 : vector<1x64xf32> to vector<32x64xf32>
    %310 = arith.mulf %305, %309 : vector<32x64xf32>
    %311 = arith.addf %308, %310 : vector<32x64xf32>
    %312 = vector.broadcast %291 : vector<1x64xf32> to vector<32x64xf32>
    %313 = arith.mulf %306, %312 : vector<32x64xf32>
    %314 = arith.addf %311, %313 : vector<32x64xf32>
    %315 = vector.broadcast %287 : vector<1x64xf32> to vector<32x64xf32>
    %316 = arith.mulf %314, %315 : vector<32x64xf32>
    %317 = arith.truncf %316 : vector<32x64xf32> to vector<32x64xbf16>
    %cst_146 = arith.constant dense<0.000000e+00> : vector<32x64xf32>
    %318 = tpu.matmul %317, %168, %cst_146 {dimension_numbers = #tpu.dot_dimension_numbers<[1], [0], [0], [1], [0, 0, 1, 1], [], []>} : vector<32x64xbf16>, vector<64x64xbf16>, vector<32x64xf32> -> vector<32x64xf32>
    %319 = arith.mulf %318, %169 : vector<32x64xf32>
    %cst_147 = arith.constant dense<0.000000e+00> : vector<64xf32>
    %320 = vector.multi_reduction <add>, %319, %cst_147 [0] : vector<32x64xf32> to vector<64xf32>
    %321 = vector.shape_cast %320 : vector<64xf32> to vector<1x64xf32>
    %322 = arith.index_cast %c3_i32 : i32 to index
    %c0_148 = arith.constant 0 : index
    %323 = vector.load %arg40[%322, %c0_148] : memref<8x64xf32, #tpu.memory_space<vmem>>, vector<1x64xf32>
    tpu.vector_store %arg40[%322, %c0_148], %321 {strides = array<i32>} : memref<8x64xf32, #tpu.memory_space<vmem>>, vector<1x64xf32>,
    %c4_i32 = arith.constant 4 : i32
    %324 = arith.index_cast %c4_i32 : i32 to index
    %c0_149 = arith.constant 0 : index
    %325 = vector.load %arg40[%324, %c0_149] : memref<8x64xf32, #tpu.memory_space<vmem>>, vector<1x64xf32>
    %326 = arith.index_cast %c4_i32 : i32 to index
    %c0_150 = arith.constant 0 : index
    %327 = vector.load %arg41[%326, %c0_150] : memref<8x64xf32, #tpu.memory_space<vmem>>, vector<1x64xf32>
    %328 = arith.index_cast %c4_i32 : i32 to index
    %c0_151 = arith.constant 0 : index
    %329 = vector.load %arg42[%328, %c0_151] : memref<8x64xf32, #tpu.memory_space<vmem>>, vector<1x64xf32>
    %330 = arith.index_cast %c4_i32 : i32 to index
    %c0_152 = arith.constant 0 : index
    %331 = vector.load %arg43[%330, %c0_152] : memref<8x64xf32, #tpu.memory_space<vmem>>, vector<1x64xf32>
    %332 = arith.index_cast %c4_i32 : i32 to index
    %c0_153 = arith.constant 0 : index
    %333 = vector.load %arg44[%332, %c0_153] : memref<8x64xf32, #tpu.memory_space<vmem>>, vector<1x64xf32>
    %334 = arith.index_cast %c4_i32 : i32 to index
    %c0_154 = arith.constant 0 : index
    %335 = vector.load %arg45[%334, %c0_154] : memref<8x64xf32, #tpu.memory_space<vmem>>, vector<1x64xf32>
    %336 = vector.broadcast %333 : vector<1x64xf32> to vector<32x64xf32>
    %337 = arith.mulf %314, %336 : vector<32x64xf32>
    %338 = vector.broadcast %331 : vector<1x64xf32> to vector<32x64xf32>
    %339 = arith.mulf %169, %338 : vector<32x64xf32>
    %340 = tpu.concatenate %337, %339 in 0 : vector<32x64xf32>, vector<32x64xf32> -> vector<64x64xf32>
    %341 = arith.truncf %340 : vector<64x64xf32> to vector<64x64xbf16>
    %cst_155 = arith.constant dense<0.000000e+00> : vector<64x64xf32>
    %342 = tpu.matmul %341, %168, %cst_155 {dimension_numbers = #tpu.dot_dimension_numbers<[1], [0], [0], [1], [0, 0, 1, 1], [], []>} : vector<64x64xbf16>, vector<64x64xbf16>, vector<64x64xf32> -> vector<64x64xf32>
    %343 = vector.extract_strided_slice %342 {offsets = [0, 0], sizes = [32, 64], strides = [1, 1]} : vector<64x64xf32> to vector<32x64xf32>
    %344 = vector.extract_strided_slice %342 {offsets = [32, 0], sizes = [32, 64], strides = [1, 1]} : vector<64x64xf32> to vector<32x64xf32>
    %345 = vector.broadcast %327 : vector<1x64xf32> to vector<32x64xf32>
    %346 = arith.mulf %314, %345 : vector<32x64xf32>
    %347 = vector.broadcast %335 : vector<1x64xf32> to vector<32x64xf32>
    %348 = arith.mulf %343, %347 : vector<32x64xf32>
    %349 = arith.addf %346, %348 : vector<32x64xf32>
    %350 = vector.broadcast %329 : vector<1x64xf32> to vector<32x64xf32>
    %351 = arith.mulf %344, %350 : vector<32x64xf32>
    %352 = arith.addf %349, %351 : vector<32x64xf32>
    %353 = vector.broadcast %325 : vector<1x64xf32> to vector<32x64xf32>
    %354 = arith.mulf %352, %353 : vector<32x64xf32>
    %355 = arith.truncf %354 : vector<32x64xf32> to vector<32x64xbf16>
    %cst_156 = arith.constant dense<0.000000e+00> : vector<32x64xf32>
    %356 = tpu.matmul %355, %168, %cst_156 {dimension_numbers = #tpu.dot_dimension_numbers<[1], [0], [0], [1], [0, 0, 1, 1], [], []>} : vector<32x64xbf16>, vector<64x64xbf16>, vector<32x64xf32> -> vector<32x64xf32>
    %357 = arith.mulf %356, %169 : vector<32x64xf32>
    %cst_157 = arith.constant dense<0.000000e+00> : vector<64xf32>
    %358 = vector.multi_reduction <add>, %357, %cst_157 [0] : vector<32x64xf32> to vector<64xf32>
    %359 = vector.shape_cast %358 : vector<64xf32> to vector<1x64xf32>
    %360 = arith.index_cast %c4_i32 : i32 to index
    %c0_158 = arith.constant 0 : index
    %361 = vector.load %arg40[%360, %c0_158] : memref<8x64xf32, #tpu.memory_space<vmem>>, vector<1x64xf32>
    tpu.vector_store %arg40[%360, %c0_158], %359 {strides = array<i32>} : memref<8x64xf32, #tpu.memory_space<vmem>>, vector<1x64xf32>,
    %c5_i32 = arith.constant 5 : i32
    %362 = arith.index_cast %c5_i32 : i32 to index
    %c0_159 = arith.constant 0 : index
    %363 = vector.load %arg40[%362, %c0_159] : memref<8x64xf32, #tpu.memory_space<vmem>>, vector<1x64xf32>
    %364 = arith.index_cast %c5_i32 : i32 to index
    %c0_160 = arith.constant 0 : index
    %365 = vector.load %arg41[%364, %c0_160] : memref<8x64xf32, #tpu.memory_space<vmem>>, vector<1x64xf32>
    %366 = arith.index_cast %c5_i32 : i32 to index
    %c0_161 = arith.constant 0 : index
    %367 = vector.load %arg42[%366, %c0_161] : memref<8x64xf32, #tpu.memory_space<vmem>>, vector<1x64xf32>
    %368 = arith.index_cast %c5_i32 : i32 to index
    %c0_162 = arith.constant 0 : index
    %369 = vector.load %arg43[%368, %c0_162] : memref<8x64xf32, #tpu.memory_space<vmem>>, vector<1x64xf32>
    %370 = arith.index_cast %c5_i32 : i32 to index
    %c0_163 = arith.constant 0 : index
    %371 = vector.load %arg44[%370, %c0_163] : memref<8x64xf32, #tpu.memory_space<vmem>>, vector<1x64xf32>
    %372 = arith.index_cast %c5_i32 : i32 to index
    %c0_164 = arith.constant 0 : index
    %373 = vector.load %arg45[%372, %c0_164] : memref<8x64xf32, #tpu.memory_space<vmem>>, vector<1x64xf32>
    %374 = vector.broadcast %371 : vector<1x64xf32> to vector<32x64xf32>
    %375 = arith.mulf %352, %374 : vector<32x64xf32>
    %376 = vector.broadcast %369 : vector<1x64xf32> to vector<32x64xf32>
    %377 = arith.mulf %169, %376 : vector<32x64xf32>
    %378 = tpu.concatenate %375, %377 in 0 : vector<32x64xf32>, vector<32x64xf32> -> vector<64x64xf32>
    %379 = arith.truncf %378 : vector<64x64xf32> to vector<64x64xbf16>
    %cst_165 = arith.constant dense<0.000000e+00> : vector<64x64xf32>
    %380 = tpu.matmul %379, %168, %cst_165 {dimension_numbers = #tpu.dot_dimension_numbers<[1], [0], [0], [1], [0, 0, 1, 1], [], []>} : vector<64x64xbf16>, vector<64x64xbf16>, vector<64x64xf32> -> vector<64x64xf32>
    %381 = vector.extract_strided_slice %380 {offsets = [0, 0], sizes = [32, 64], strides = [1, 1]} : vector<64x64xf32> to vector<32x64xf32>
    %382 = vector.extract_strided_slice %380 {offsets = [32, 0], sizes = [32, 64], strides = [1, 1]} : vector<64x64xf32> to vector<32x64xf32>
    %383 = vector.broadcast %365 : vector<1x64xf32> to vector<32x64xf32>
    %384 = arith.mulf %352, %383 : vector<32x64xf32>
    %385 = vector.broadcast %373 : vector<1x64xf32> to vector<32x64xf32>
    %386 = arith.mulf %381, %385 : vector<32x64xf32>
    %387 = arith.addf %384, %386 : vector<32x64xf32>
    %388 = vector.broadcast %367 : vector<1x64xf32> to vector<32x64xf32>
    %389 = arith.mulf %382, %388 : vector<32x64xf32>
    %390 = arith.addf %387, %389 : vector<32x64xf32>
    %391 = vector.broadcast %363 : vector<1x64xf32> to vector<32x64xf32>
    %392 = arith.mulf %390, %391 : vector<32x64xf32>
    %393 = arith.truncf %392 : vector<32x64xf32> to vector<32x64xbf16>
    %cst_166 = arith.constant dense<0.000000e+00> : vector<32x64xf32>
    %394 = tpu.matmul %393, %168, %cst_166 {dimension_numbers = #tpu.dot_dimension_numbers<[1], [0], [0], [1], [0, 0, 1, 1], [], []>} : vector<32x64xbf16>, vector<64x64xbf16>, vector<32x64xf32> -> vector<32x64xf32>
    %395 = arith.mulf %394, %169 : vector<32x64xf32>
    %cst_167 = arith.constant dense<0.000000e+00> : vector<64xf32>
    %396 = vector.multi_reduction <add>, %395, %cst_167 [0] : vector<32x64xf32> to vector<64xf32>
    %397 = vector.shape_cast %396 : vector<64xf32> to vector<1x64xf32>
    %398 = arith.index_cast %c5_i32 : i32 to index
    %c0_168 = arith.constant 0 : index
    %399 = vector.load %arg40[%398, %c0_168] : memref<8x64xf32, #tpu.memory_space<vmem>>, vector<1x64xf32>
    tpu.vector_store %arg40[%398, %c0_168], %397 {strides = array<i32>} : memref<8x64xf32, #tpu.memory_space<vmem>>, vector<1x64xf32>,
    %c6_i32 = arith.constant 6 : i32
    %400 = arith.index_cast %c6_i32 : i32 to index
    %c0_169 = arith.constant 0 : index
    %401 = vector.load %arg40[%400, %c0_169] : memref<8x64xf32, #tpu.memory_space<vmem>>, vector<1x64xf32>
    %402 = arith.index_cast %c6_i32 : i32 to index
    %c0_170 = arith.constant 0 : index
    %403 = vector.load %arg41[%402, %c0_170] : memref<8x64xf32, #tpu.memory_space<vmem>>, vector<1x64xf32>
    %404 = arith.index_cast %c6_i32 : i32 to index
    %c0_171 = arith.constant 0 : index
    %405 = vector.load %arg42[%404, %c0_171] : memref<8x64xf32, #tpu.memory_space<vmem>>, vector<1x64xf32>
    %406 = arith.index_cast %c6_i32 : i32 to index
    %c0_172 = arith.constant 0 : index
    %407 = vector.load %arg43[%406, %c0_172] : memref<8x64xf32, #tpu.memory_space<vmem>>, vector<1x64xf32>
    %408 = arith.index_cast %c6_i32 : i32 to index
    %c0_173 = arith.constant 0 : index
    %409 = vector.load %arg44[%408, %c0_173] : memref<8x64xf32, #tpu.memory_space<vmem>>, vector<1x64xf32>
    %410 = arith.index_cast %c6_i32 : i32 to index
    %c0_174 = arith.constant 0 : index
    %411 = vector.load %arg45[%410, %c0_174] : memref<8x64xf32, #tpu.memory_space<vmem>>, vector<1x64xf32>
    %412 = vector.broadcast %409 : vector<1x64xf32> to vector<32x64xf32>
    %413 = arith.mulf %390, %412 : vector<32x64xf32>
    %414 = vector.broadcast %407 : vector<1x64xf32> to vector<32x64xf32>
    %415 = arith.mulf %169, %414 : vector<32x64xf32>
    %416 = tpu.concatenate %413, %415 in 0 : vector<32x64xf32>, vector<32x64xf32> -> vector<64x64xf32>
    %417 = arith.truncf %416 : vector<64x64xf32> to vector<64x64xbf16>
    %cst_175 = arith.constant dense<0.000000e+00> : vector<64x64xf32>
    %418 = tpu.matmul %417, %168, %cst_175 {dimension_numbers = #tpu.dot_dimension_numbers<[1], [0], [0], [1], [0, 0, 1, 1], [], []>} : vector<64x64xbf16>, vector<64x64xbf16>, vector<64x64xf32> -> vector<64x64xf32>
    %419 = vector.extract_strided_slice %418 {offsets = [0, 0], sizes = [32, 64], strides = [1, 1]} : vector<64x64xf32> to vector<32x64xf32>
    %420 = vector.extract_strided_slice %418 {offsets = [32, 0], sizes = [32, 64], strides = [1, 1]} : vector<64x64xf32> to vector<32x64xf32>
    %421 = vector.broadcast %403 : vector<1x64xf32> to vector<32x64xf32>
    %422 = arith.mulf %390, %421 : vector<32x64xf32>
    %423 = vector.broadcast %411 : vector<1x64xf32> to vector<32x64xf32>
    %424 = arith.mulf %419, %423 : vector<32x64xf32>
    %425 = arith.addf %422, %424 : vector<32x64xf32>
    %426 = vector.broadcast %405 : vector<1x64xf32> to vector<32x64xf32>
    %427 = arith.mulf %420, %426 : vector<32x64xf32>
    %428 = arith.addf %425, %427 : vector<32x64xf32>
    %429 = vector.broadcast %401 : vector<1x64xf32> to vector<32x64xf32>
    %430 = arith.mulf %428, %429 : vector<32x64xf32>
    %431 = arith.truncf %430 : vector<32x64xf32> to vector<32x64xbf16>
    %cst_176 = arith.constant dense<0.000000e+00> : vector<32x64xf32>
    %432 = tpu.matmul %431, %168, %cst_176 {dimension_numbers = #tpu.dot_dimension_numbers<[1], [0], [0], [1], [0, 0, 1, 1], [], []>} : vector<32x64xbf16>, vector<64x64xbf16>, vector<32x64xf32> -> vector<32x64xf32>
    %433 = arith.mulf %432, %169 : vector<32x64xf32>
    %cst_177 = arith.constant dense<0.000000e+00> : vector<64xf32>
    %434 = vector.multi_reduction <add>, %433, %cst_177 [0] : vector<32x64xf32> to vector<64xf32>
    %435 = vector.shape_cast %434 : vector<64xf32> to vector<1x64xf32>
    %436 = arith.index_cast %c6_i32 : i32 to index
    %c0_178 = arith.constant 0 : index
    %437 = vector.load %arg40[%436, %c0_178] : memref<8x64xf32, #tpu.memory_space<vmem>>, vector<1x64xf32>
    tpu.vector_store %arg40[%436, %c0_178], %435 {strides = array<i32>} : memref<8x64xf32, #tpu.memory_space<vmem>>, vector<1x64xf32>,
    %c7_i32 = arith.constant 7 : i32
    %438 = arith.index_cast %c7_i32 : i32 to index
    %c0_179 = arith.constant 0 : index
    %439 = vector.load %arg40[%438, %c0_179] : memref<8x64xf32, #tpu.memory_space<vmem>>, vector<1x64xf32>
    %440 = arith.index_cast %c7_i32 : i32 to index
    %c0_180 = arith.constant 0 : index
    %441 = vector.load %arg41[%440, %c0_180] : memref<8x64xf32, #tpu.memory_space<vmem>>, vector<1x64xf32>
    %442 = arith.index_cast %c7_i32 : i32 to index
    %c0_181 = arith.constant 0 : index
    %443 = vector.load %arg42[%442, %c0_181] : memref<8x64xf32, #tpu.memory_space<vmem>>, vector<1x64xf32>
    %444 = arith.index_cast %c7_i32 : i32 to index
    %c0_182 = arith.constant 0 : index
    %445 = vector.load %arg43[%444, %c0_182] : memref<8x64xf32, #tpu.memory_space<vmem>>, vector<1x64xf32>
    %446 = arith.index_cast %c7_i32 : i32 to index
    %c0_183 = arith.constant 0 : index
    %447 = vector.load %arg44[%446, %c0_183] : memref<8x64xf32, #tpu.memory_space<vmem>>, vector<1x64xf32>
    %448 = arith.index_cast %c7_i32 : i32 to index
    %c0_184 = arith.constant 0 : index
    %449 = vector.load %arg45[%448, %c0_184] : memref<8x64xf32, #tpu.memory_space<vmem>>, vector<1x64xf32>
    %450 = vector.broadcast %447 : vector<1x64xf32> to vector<32x64xf32>
    %451 = arith.mulf %428, %450 : vector<32x64xf32>
    %452 = vector.broadcast %445 : vector<1x64xf32> to vector<32x64xf32>
    %453 = arith.mulf %169, %452 : vector<32x64xf32>
    %454 = tpu.concatenate %451, %453 in 0 : vector<32x64xf32>, vector<32x64xf32> -> vector<64x64xf32>
    %455 = arith.truncf %454 : vector<64x64xf32> to vector<64x64xbf16>
    %cst_185 = arith.constant dense<0.000000e+00> : vector<64x64xf32>
    %456 = tpu.matmul %455, %168, %cst_185 {dimension_numbers = #tpu.dot_dimension_numbers<[1], [0], [0], [1], [0, 0, 1, 1], [], []>} : vector<64x64xbf16>, vector<64x64xbf16>, vector<64x64xf32> -> vector<64x64xf32>
    %457 = vector.extract_strided_slice %456 {offsets = [0, 0], sizes = [32, 64], strides = [1, 1]} : vector<64x64xf32> to vector<32x64xf32>
    %458 = vector.extract_strided_slice %456 {offsets = [32, 0], sizes = [32, 64], strides = [1, 1]} : vector<64x64xf32> to vector<32x64xf32>
    %459 = vector.broadcast %441 : vector<1x64xf32> to vector<32x64xf32>
    %460 = arith.mulf %428, %459 : vector<32x64xf32>
    %461 = vector.broadcast %449 : vector<1x64xf32> to vector<32x64xf32>
    %462 = arith.mulf %457, %461 : vector<32x64xf32>
    %463 = arith.addf %460, %462 : vector<32x64xf32>
    %464 = vector.broadcast %443 : vector<1x64xf32> to vector<32x64xf32>
    %465 = arith.mulf %458, %464 : vector<32x64xf32>
    %466 = arith.addf %463, %465 : vector<32x64xf32>
    %467 = vector.broadcast %439 : vector<1x64xf32> to vector<32x64xf32>
    %468 = arith.mulf %466, %467 : vector<32x64xf32>
    %469 = arith.truncf %468 : vector<32x64xf32> to vector<32x64xbf16>
    %cst_186 = arith.constant dense<0.000000e+00> : vector<32x64xf32>
    %470 = tpu.matmul %469, %168, %cst_186 {dimension_numbers = #tpu.dot_dimension_numbers<[1], [0], [0], [1], [0, 0, 1, 1], [], []>} : vector<32x64xbf16>, vector<64x64xbf16>, vector<32x64xf32> -> vector<32x64xf32>
    %471 = arith.mulf %470, %169 : vector<32x64xf32>
    %cst_187 = arith.constant dense<0.000000e+00> : vector<64xf32>
    %472 = vector.multi_reduction <add>, %471, %cst_187 [0] : vector<32x64xf32> to vector<64xf32>
    %473 = vector.shape_cast %472 : vector<64xf32> to vector<1x64xf32>
    %474 = arith.index_cast %c7_i32 : i32 to index
    %c0_188 = arith.constant 0 : index
    %475 = vector.load %arg40[%474, %c0_188] : memref<8x64xf32, #tpu.memory_space<vmem>>, vector<1x64xf32>
    tpu.vector_store %arg40[%474, %c0_188], %473 {strides = array<i32>} : memref<8x64xf32, #tpu.memory_space<vmem>>, vector<1x64xf32>,
    %c8_i32 = arith.constant 8 : i32
    %c0_189 = arith.constant 0 : index
    %c0_190 = arith.constant 0 : index
    %c0_191 = arith.constant 0 : index
    %476 = vector.load %arg39[%c0_189, %c0_190, %c0_191] : memref<1x32x64xf32, #tpu.memory_space<vmem>>, vector<1x32x64xf32>
    %477 = vector.shape_cast %476 : vector<1x32x64xf32> to vector<32x64xf32>
    %478 = vector.shape_cast %466 : vector<32x64xf32> to vector<1x32x64xf32>
    tpu.vector_store %arg39[%c0_189, %c0_190, %c0_191], %478 {strides = array<i32>} : memref<1x32x64xf32, #tpu.memory_space<vmem>>, vector<1x32x64xf32>,
    %c0_192 = arith.constant 0 : index
    %c0_193 = arith.constant 0 : index
    %479 = vector.load %arg40[%c0_192, %c0_193] : memref<8x64xf32, #tpu.memory_space<vmem>>, vector<8x64xf32>
    %480 = arith.truncf %479 : vector<8x64xf32> to vector<8x64xbf16>
    %c0_194 = arith.constant 0 : index
    %c0_195 = arith.constant 0 : index
    %481 = vector.load %arg7[%c0_194, %c0_195] : memref<64x2xbf16, #tpu.memory_space<vmem>>, vector<64x2xbf16>
    %cst_196 = arith.constant dense<0.000000e+00> : vector<8x2xf32>
    %482 = tpu.matmul %480, %481, %cst_196 {dimension_numbers = #tpu.dot_dimension_numbers<[1], [0], [0], [1], [0, 0, 1, 1], [], []>} : vector<8x64xbf16>, vector<64x2xbf16>, vector<8x2xf32> -> vector<8x2xf32>
    %cst_197 = arith.constant 3.125000e-02 : f32
    %483 = vector.broadcast %cst_197 : f32 to vector<8x2xf32>
    %484 = arith.mulf %482, %483 : vector<8x2xf32>
    %c0_198 = arith.constant 0 : index
    %c0_199 = arith.constant 0 : index
    %485 = vector.load %arg8[%c0_198, %c0_199] : memref<2x64xf32, #tpu.memory_space<vmem>>, vector<2x64xf32>
    %cst_200 = arith.constant dense<0.000000e+00> : vector<8x64xf32>
    %486 = tpu.matmul %484, %485, %cst_200 {dimension_numbers = #tpu.dot_dimension_numbers<[1], [0], [0], [1], [0, 0, 1, 1], [], []>} : vector<8x2xf32>, vector<2x64xf32>, vector<8x64xf32> -> vector<8x64xf32>
    %487 = arith.subf %479, %486 : vector<8x64xf32>
    %488 = arith.mulf %487, %487 : vector<8x64xf32>
    %489 = arith.truncf %488 : vector<8x64xf32> to vector<8x64xbf16>
    %c0_201 = arith.constant 0 : index
    %c0_202 = arith.constant 0 : index
    %490 = vector.load %arg7[%c0_201, %c0_202] : memref<64x2xbf16, #tpu.memory_space<vmem>>, vector<64x2xbf16>
    %cst_203 = arith.constant dense<0.000000e+00> : vector<8x2xf32>
    %491 = tpu.matmul %489, %490, %cst_203 {dimension_numbers = #tpu.dot_dimension_numbers<[1], [0], [0], [1], [0, 0, 1, 1], [], []>} : vector<8x64xbf16>, vector<64x2xbf16>, vector<8x2xf32> -> vector<8x2xf32>
    %cst_204 = arith.constant 3.125000e-02 : f32
    %492 = vector.broadcast %cst_204 : f32 to vector<8x2xf32>
    %493 = arith.mulf %491, %492 : vector<8x2xf32>
    %cst_205 = arith.constant 6.400000e-04 : f32
    %494 = vector.broadcast %cst_205 : f32 to vector<8x2xf32>
    %495 = arith.addf %493, %494 : vector<8x2xf32>
    %496 = math.rsqrt %495 : vector<8x2xf32>
    %c0_206 = arith.constant 0 : index
    %c0_207 = arith.constant 0 : index
    %497 = vector.load %arg8[%c0_206, %c0_207] : memref<2x64xf32, #tpu.memory_space<vmem>>, vector<2x64xf32>
    %cst_208 = arith.constant dense<0.000000e+00> : vector<8x64xf32>
    %498 = tpu.matmul %496, %497, %cst_208 {dimension_numbers = #tpu.dot_dimension_numbers<[1], [0], [0], [1], [0, 0, 1, 1], [], []>} : vector<8x2xf32>, vector<2x64xf32>, vector<8x64xf32> -> vector<8x64xf32>
    %499 = arith.mulf %487, %498 : vector<8x64xf32>
    %c0_209 = arith.constant 0 : index
    %c0_210 = arith.constant 0 : index
    %500 = vector.load %arg35[%c0_209, %c0_210] : memref<1x64xf32, #tpu.memory_space<vmem>>, vector<1x64xf32>
    %501 = vector.broadcast %500 : vector<1x64xf32> to vector<8x64xf32>
    %502 = arith.mulf %499, %501 : vector<8x64xf32>
    %c0_211 = arith.constant 0 : index
    %c0_212 = arith.constant 0 : index
    %503 = vector.load %arg36[%c0_211, %c0_212] : memref<1x64xf32, #tpu.memory_space<vmem>>, vector<1x64xf32>
    %504 = vector.broadcast %503 : vector<1x64xf32> to vector<8x64xf32>
    %505 = arith.addf %502, %504 : vector<8x64xf32>
    %c0_213 = arith.constant 0 : index
    %c0_214 = arith.constant 0 : index
    %506 = vector.load %arg43[%c0_213, %c0_214] : memref<8x64xf32, #tpu.memory_space<vmem>>, vector<8x64xf32>
    %507 = arith.mulf %158, %506 : vector<8x64xf32>
    %508 = arith.addf %505, %507 : vector<8x64xf32>
    %509 = arith.mulf %508, %75 : vector<8x64xf32>
    %510 = arith.truncf %509 : vector<8x64xf32> to vector<8x64xbf16>
    %c0_215 = arith.constant 0 : index
    %c0_216 = arith.constant 0 : index
    %511 = vector.load %arg20[%c0_215, %c0_216] : memref<64x64xbf16, #tpu.memory_space<vmem>>, vector<64x64xbf16>
    %cst_217 = arith.constant dense<0.000000e+00> : vector<8x64xf32>
    %512 = tpu.matmul %510, %511, %cst_217 {dimension_numbers = #tpu.dot_dimension_numbers<[1], [0], [0], [1], [0, 0, 1, 1], [], []>} : vector<8x64xbf16>, vector<64x64xbf16>, vector<8x64xf32> -> vector<8x64xf32>
    %513 = arith.addf %3, %512 : vector<8x64xf32>
    %c0_218 = arith.constant 0 : index
    %c0_219 = arith.constant 0 : index
    %514 = vector.load %arg37[%c0_218, %c0_219] : memref<8x64xf32, #tpu.memory_space<vmem>>, vector<8x64xf32>
    tpu.vector_store %arg37[%c0_218, %c0_219], %513 {strides = array<i32>} : memref<8x64xf32, #tpu.memory_space<vmem>>, vector<8x64xf32>,
    return
  }
  func.func @transform_0(%arg0: i32) -> (i32, i32) {
    %c0_i32 = arith.constant 0 : i32
    %c0_i32_0 = arith.constant 0 : i32
    return %arg0, %c0_i32 : i32, i32
  }
  func.func @transform_1(%arg0: i32) -> (i32, i32) {
    %c0_i32 = arith.constant 0 : i32
    %c0_i32_0 = arith.constant 0 : i32
    %c0_i32_1 = arith.constant 0 : i32
    return %c0_i32, %c0_i32_0 : i32, i32
  }
  func.func @transform_2(%arg0: i32) -> (i32, i32, i32) {
    %c0_i32 = arith.constant 0 : i32
    %c0_i32_0 = arith.constant 0 : i32
    %c0_i32_1 = arith.constant 0 : i32
    %c0_i32_2 = arith.constant 0 : i32
    return %c0_i32, %c0_i32_0, %c0_i32_1 : i32, i32, i32
  }
  func.func @transform_3(%arg0: i32) -> (i32, i32) {
    %c0_i32 = arith.constant 0 : i32
    %c0_i32_0 = arith.constant 0 : i32
    return %arg0, %c0_i32 : i32, i32
  }
  func.func @transform_4(%arg0: i32) -> (i32, i32) {
    %c0_i32 = arith.constant 0 : i32
    %c0_i32_0 = arith.constant 0 : i32
    %c0_i32_1 = arith.constant 0 : i32
    return %c0_i32, %c0_i32_0 : i32, i32
  }
  func.func @transform_5(%arg0: i32) -> (i32, i32) {
    %c0_i32 = arith.constant 0 : i32
    %c0_i32_0 = arith.constant 0 : i32
    %c0_i32_1 = arith.constant 0 : i32
    return %c0_i32, %c0_i32_0 : i32, i32
  }
  func.func @transform_6(%arg0: i32) -> (i32, i32) {
    %c0_i32 = arith.constant 0 : i32
    %c0_i32_0 = arith.constant 0 : i32
    %c0_i32_1 = arith.constant 0 : i32
    return %c0_i32, %c0_i32_0 : i32, i32
  }
  func.func @transform_7(%arg0: i32) -> (i32, i32) {
    %c0_i32 = arith.constant 0 : i32
    %c0_i32_0 = arith.constant 0 : i32
    %c0_i32_1 = arith.constant 0 : i32
    return %c0_i32, %c0_i32_0 : i32, i32
  }
  func.func @transform_8(%arg0: i32) -> (i32, i32) {
    %c0_i32 = arith.constant 0 : i32
    %c0_i32_0 = arith.constant 0 : i32
    %c0_i32_1 = arith.constant 0 : i32
    return %c0_i32, %c0_i32_0 : i32, i32
  }
  func.func @transform_9(%arg0: i32) -> (i32, i32) {
    %c0_i32 = arith.constant 0 : i32
    %c0_i32_0 = arith.constant 0 : i32
    %c0_i32_1 = arith.constant 0 : i32
    return %c0_i32, %c0_i32_0 : i32, i32
  }
  func.func @transform_10(%arg0: i32) -> (i32, i32) {
    %c0_i32 = arith.constant 0 : i32
    %c0_i32_0 = arith.constant 0 : i32
    %c0_i32_1 = arith.constant 0 : i32
    return %c0_i32, %c0_i32_0 : i32, i32
  }
  func.func @transform_11(%arg0: i32) -> (i32, i32) {
    %c0_i32 = arith.constant 0 : i32
    %c0_i32_0 = arith.constant 0 : i32
    %c0_i32_1 = arith.constant 0 : i32
    return %c0_i32, %c0_i32_0 : i32, i32
  }
  func.func @transform_12(%arg0: i32) -> (i32, i32) {
    %c0_i32 = arith.constant 0 : i32
    %c0_i32_0 = arith.constant 0 : i32
    %c0_i32_1 = arith.constant 0 : i32
    return %c0_i32, %c0_i32_0 : i32, i32
  }
  func.func @transform_13(%arg0: i32) -> (i32, i32) {
    %c0_i32 = arith.constant 0 : i32
    %c0_i32_0 = arith.constant 0 : i32
    %c0_i32_1 = arith.constant 0 : i32
    return %c0_i32, %c0_i32_0 : i32, i32
  }
  func.func @transform_14(%arg0: i32) -> (i32, i32) {
    %c0_i32 = arith.constant 0 : i32
    %c0_i32_0 = arith.constant 0 : i32
    %c0_i32_1 = arith.constant 0 : i32
    return %c0_i32, %c0_i32_0 : i32, i32
  }
  func.func @transform_15(%arg0: i32) -> (i32, i32) {
    %c0_i32 = arith.constant 0 : i32
    %c0_i32_0 = arith.constant 0 : i32
    %c0_i32_1 = arith.constant 0 : i32
    return %c0_i32, %c0_i32_0 : i32, i32
  }
  func.func @transform_16(%arg0: i32) -> (i32, i32) {
    %c0_i32 = arith.constant 0 : i32
    %c0_i32_0 = arith.constant 0 : i32
    %c0_i32_1 = arith.constant 0 : i32
    return %c0_i32, %c0_i32_0 : i32, i32
  }
  func.func @transform_17(%arg0: i32) -> (i32, i32) {
    %c0_i32 = arith.constant 0 : i32
    %c0_i32_0 = arith.constant 0 : i32
    %c0_i32_1 = arith.constant 0 : i32
    return %c0_i32, %c0_i32_0 : i32, i32
  }
  func.func @transform_18(%arg0: i32) -> (i32, i32) {
    %c0_i32 = arith.constant 0 : i32
    %c0_i32_0 = arith.constant 0 : i32
    %c0_i32_1 = arith.constant 0 : i32
    return %c0_i32, %c0_i32_0 : i32, i32
  }
  func.func @transform_19(%arg0: i32) -> (i32, i32) {
    %c0_i32 = arith.constant 0 : i32
    %c0_i32_0 = arith.constant 0 : i32
    %c0_i32_1 = arith.constant 0 : i32
    return %c0_i32, %c0_i32_0 : i32, i32
  }
  func.func @transform_20(%arg0: i32) -> (i32, i32) {
    %c0_i32 = arith.constant 0 : i32
    %c0_i32_0 = arith.constant 0 : i32
    %c0_i32_1 = arith.constant 0 : i32
    return %c0_i32, %c0_i32_0 : i32, i32
  }
  func.func @transform_21(%arg0: i32) -> (i32, i32) {
    %c0_i32 = arith.constant 0 : i32
    %c0_i32_0 = arith.constant 0 : i32
    %c0_i32_1 = arith.constant 0 : i32
    return %c0_i32, %c0_i32_0 : i32, i32
  }
  func.func @transform_22(%arg0: i32) -> (i32, i32) {
    %c0_i32 = arith.constant 0 : i32
    %c0_i32_0 = arith.constant 0 : i32
    %c0_i32_1 = arith.constant 0 : i32
    return %c0_i32, %c0_i32_0 : i32, i32
  }
  func.func @transform_23(%arg0: i32) -> (i32, i32) {
    %c0_i32 = arith.constant 0 : i32
    %c0_i32_0 = arith.constant 0 : i32
    %c0_i32_1 = arith.constant 0 : i32
    return %c0_i32, %c0_i32_0 : i32, i32
  }
  func.func @transform_24(%arg0: i32) -> (i32, i32) {
    %c0_i32 = arith.constant 0 : i32
    %c0_i32_0 = arith.constant 0 : i32
    %c0_i32_1 = arith.constant 0 : i32
    return %c0_i32, %c0_i32_0 : i32, i32
  }
  func.func @transform_25(%arg0: i32) -> (i32, i32) {
    %c0_i32 = arith.constant 0 : i32
    %c0_i32_0 = arith.constant 0 : i32
    %c0_i32_1 = arith.constant 0 : i32
    return %c0_i32, %c0_i32_0 : i32, i32
  }
  func.func @transform_26(%arg0: i32) -> (i32, i32) {
    %c0_i32 = arith.constant 0 : i32
    %c0_i32_0 = arith.constant 0 : i32
    %c0_i32_1 = arith.constant 0 : i32
    return %c0_i32, %c0_i32_0 : i32, i32
  }
  func.func @transform_27(%arg0: i32) -> (i32, i32) {
    %c0_i32 = arith.constant 0 : i32
    %c0_i32_0 = arith.constant 0 : i32
    %c0_i32_1 = arith.constant 0 : i32
    return %c0_i32, %c0_i32_0 : i32, i32
  }
  func.func @transform_28(%arg0: i32) -> (i32, i32) {
    %c0_i32 = arith.constant 0 : i32
    %c0_i32_0 = arith.constant 0 : i32
    %c0_i32_1 = arith.constant 0 : i32
    return %c0_i32, %c0_i32_0 : i32, i32
  }
  func.func @transform_29(%arg0: i32) -> (i32, i32) {
    %c0_i32 = arith.constant 0 : i32
    %c0_i32_0 = arith.constant 0 : i32
    %c0_i32_1 = arith.constant 0 : i32
    return %c0_i32, %c0_i32_0 : i32, i32
  }
  func.func @transform_30(%arg0: i32) -> (i32, i32) {
    %c0_i32 = arith.constant 0 : i32
    %c0_i32_0 = arith.constant 0 : i32
    %c0_i32_1 = arith.constant 0 : i32
    return %c0_i32, %c0_i32_0 : i32, i32
  }
  func.func @transform_31(%arg0: i32) -> (i32, i32) {
    %c0_i32 = arith.constant 0 : i32
    %c0_i32_0 = arith.constant 0 : i32
    %c0_i32_1 = arith.constant 0 : i32
    return %c0_i32, %c0_i32_0 : i32, i32
  }
  func.func @transform_32(%arg0: i32) -> (i32, i32) {
    %c0_i32 = arith.constant 0 : i32
    %c0_i32_0 = arith.constant 0 : i32
    %c0_i32_1 = arith.constant 0 : i32
    return %c0_i32, %c0_i32_0 : i32, i32
  }
  func.func @transform_33(%arg0: i32) -> (i32, i32) {
    %c0_i32 = arith.constant 0 : i32
    %c0_i32_0 = arith.constant 0 : i32
    %c0_i32_1 = arith.constant 0 : i32
    return %c0_i32, %c0_i32_0 : i32, i32
  }
  func.func @transform_34(%arg0: i32) -> (i32, i32) {
    %c0_i32 = arith.constant 0 : i32
    %c0_i32_0 = arith.constant 0 : i32
    %c0_i32_1 = arith.constant 0 : i32
    return %c0_i32, %c0_i32_0 : i32, i32
  }
  func.func @transform_35(%arg0: i32) -> (i32, i32) {
    %c0_i32 = arith.constant 0 : i32
    %c0_i32_0 = arith.constant 0 : i32
    %c0_i32_1 = arith.constant 0 : i32
    return %c0_i32, %c0_i32_0 : i32, i32
  }
  func.func @transform_36(%arg0: i32) -> (i32, i32) {
    %c0_i32 = arith.constant 0 : i32
    %c0_i32_0 = arith.constant 0 : i32
    return %arg0, %c0_i32 : i32, i32
  }
  func.func @transform_37(%arg0: i32) -> (i32, i32) {
    %c0_i32 = arith.constant 0 : i32
    %c0_i32_0 = arith.constant 0 : i32
    %c0_i32_1 = arith.constant 0 : i32
    return %c0_i32, %c0_i32_0 : i32, i32
  }
  func.func @transform_38(%arg0: i32) -> (i32, i32, i32) {
    %c0_i32 = arith.constant 0 : i32
    %c0_i32_0 = arith.constant 0 : i32
    %c0_i32_1 = arith.constant 0 : i32
    %c0_i32_2 = arith.constant 0 : i32
    return %c0_i32, %c0_i32_0, %c0_i32_1 : i32, i32, i32
  }
}

</mosaic_0001>

<bundles_post_ra>
// kernel: tpu_custom_call.1
= control target key start
LH: loop header
LB: loop body
LE: loop exit
PB: predicated region body
PF: predicated region fallthrough
CT: control target
= control target key end

     0   :  { %s6768_s6 = smov 1   ;;  %s6769_s10 = smov 2   ;;  %s7982_s0 = inlined_call_operand.smem [shape: u32[39], index: -1, kind: input, shape index: {}] }
   0x1   :  { %s6842_s5 = sld [smem:[%s7982_s0]]   ;;  %s6770_s14 = smov 3  }
   0x2   :  { %s6847_s9 = sld [smem:[%s7982_s0 + %s6768_s6]]   ;;  %s6771_s18 = smov 4  }
   0x3   :  { %s6852_s13 = sld [smem:[%s7982_s0 + %s6769_s10]]   ;;  %s6772_s22 = smov 5  }
   0x4   :  { %s6857_s17 = sld [smem:[%s7982_s0 + %s6770_s14]]   ;;  %s6773_s26 = smov 6  }
   0x5   :  { %s6862_s21 = sld [smem:[%s7982_s0 + %s6771_s18]]   ;;  %s6774_s30 = smov 7  }
   0x6   :  { %s6867_s25 = sld [smem:[%s7982_s0 + %s6772_s22]]   ;;  %s6775_s4 = smov 8  }
   0x7   :  { %8018 = sst [smem:[#allocation50_spill]] %s6842_s5  ;;  %s6776_s10 = smov 9  }
   0x8   :  { %8019 = sst [smem:[#allocation51_spill]] %s6847_s9  ;;  %s6777_s15 = smov 10  }
   0x9   :  { %8020 = sst [smem:[#allocation52_spill]] %s6852_s13  ;;  %s6778_s20 = smov 11  }
   0xa   :  { %8021 = sst [smem:[#allocation53_spill]] %s6857_s17  ;;  %s6780_s1 = smov 13  }
   0xb   :  { %8022 = sst [smem:[#allocation54_spill]] %s6862_s21  ;;  %s6781_s7 = smov 14  }
   0xc   :  { %8023 = sst [smem:[#allocation55_spill]] %s6867_s25  ;;  %s6783_s22 = smov 16  }
   0xd   :  { %s6872_s29 = sld [smem:[%s7982_s0 + %s6773_s26]]   ;;  %s6779_s26 = smov 12  }
   0xe   :  { %s6877_s3 = sld [smem:[%s7982_s0 + %s6774_s30]]   ;;  %s6784_s28 = smov 17  }
   0xf   :  { %s6882_s8 = sld [smem:[%s7982_s0 + %s6775_s4]]  }
  0x10   :  { %s6887_s14 = sld [smem:[%s7982_s0 + %s6776_s10]]  }
  0x11   :  { %s6892_s19 = sld [smem:[%s7982_s0 + %s6777_s15]]   ;;  %s6782_s15 = smov 15  }
  0x12   :  { %s6897_s24 = sld [smem:[%s7982_s0 + %s6778_s20]]  }
  0x13   :  { %8024 = sst [smem:[#allocation56_spill]] %s6872_s29 }
  0x14   :  { %8025 = sst [smem:[#allocation57_spill]] %s6877_s3 }
  0x15   :  { %8026 = sst [smem:[#allocation58_spill]] %s6882_s8 }
  0x16   :  { %8027 = sst [smem:[#allocation59_spill]] %s6887_s14 }
  0x17   :  { %8028 = sst [smem:[#allocation60_spill]] %s6892_s19 }
  0x18   :  { %s6902_s30 = sld [smem:[%s7982_s0 + %s6779_s26]]  }
  0x19   :  { %s6907_s6 = sld [smem:[%s7982_s0 + %s6780_s1]]  }
  0x1a   :  { %s6912_s12 = sld [smem:[%s7982_s0 + %s6781_s7]]   ;;  %s6785_s7 = smov 18  }
  0x1b   :  { %s6917_s20 = sld [smem:[%s7982_s0 + %s6782_s15]]   ;;  %s6786_s15 = smov 19  }
  0x1c   :  { %s6922_s27 = sld [smem:[%s7982_s0 + %s6783_s22]]   ;;  %s6787_s22 = smov 20  }
  0x1d   :  { %s6927_s4 = sld [smem:[%s7982_s0 + %s6784_s28]]   ;;  %s6788_s28 = smov 21  }
  0x1e   :  { %s6932_s25 = sld [smem:[%s7982_s0 + %s6785_s7]]   ;;  %s6789_s7 = smov 22  }
  0x1f   :  { %8029 = sst [smem:[#allocation61_spill]] %s6907_s6 }
  0x20   :  { %s6937_s21 = sld [smem:[%s7982_s0 + %s6786_s15]]   ;;  %s6790_s15 = smov 23  }
  0x21   :  { %s6942_s3 = sld [smem:[%s7982_s0 + %s6787_s22]]   ;;  %s6791_s22 = smov 24  }
  0x22   :  { %8030 = sst [smem:[#allocation62_spill]] %s6922_s27 }
  0x23   :  { %8031 = sst [smem:[#allocation63_spill]] %s6927_s4 }
  0x24   :  { %8032 = sst [smem:[#allocation64_spill]] %s6932_s25 }
  0x25   :  { %s6947_s29 = sld [smem:[%s7982_s0 + %s6788_s28]]   ;;  %s6792_s28 = smov 25  }
  0x26   :  { %8033 = sst [smem:[#allocation65_spill]] %s6937_s21 }
  0x27   :  { %8034 = sst [smem:[#allocation66_spill]] %s6942_s3 }
  0x28   :  { %s6952_s25 = sld [smem:[%s7982_s0 + %s6789_s7]]   ;;  %s6793_s7 = smov 26  }
  0x29   :  { %s6957_s21 = sld [smem:[%s7982_s0 + %s6790_s15]]   ;;  %s6794_s15 = smov 27  }
  0x2a   :  { %s6962_s3 = sld [smem:[%s7982_s0 + %s6791_s22]]   ;;  %s6795_s22 = smov 28  }
  0x2b   :  { %8035 = sst [smem:[#allocation67_spill]] %s6947_s29 }
  0x2c   :  { %s6967_s29 = sld [smem:[%s7982_s0 + %s6792_s28]]   ;;  %s6796_s28 = smov 29  }
  0x2d   :  { %s6972_s19 = sld [smem:[%s7982_s0 + %s6793_s7]]   ;;  %s6797_s7 = smov 30  }
  0x2e   :  { %s6982_s14 = sld [smem:[%s7982_s0 + %s6795_s22]]   ;;  %s6799_s22 = smov 32  }
  0x2f   :  { %8036 = sst [smem:[#allocation68_spill]] %s6957_s21 }
  0x30   :  { %8037 = sst [smem:[#allocation69_spill]] %s6962_s3 }
  0x31   :  { %s6977_s21 = sld [smem:[%s7982_s0 + %s6794_s15]]   ;;  %s6798_s15 = smov 31  }
  0x32   :  { %s6987_s8 = sld [smem:[%s7982_s0 + %s6796_s28]]   ;;  %s6800_s28 = smov 33  }
  0x33   :  { %8038 = sst [smem:[#allocation70_spill]] %s6972_s19 }
  0x34   :  { %s6992_s19 = sld [smem:[%s7982_s0 + %s6797_s7]]   ;;  %s6801_s7 = smov 34  }
  0x35   :  { %s6997_s4 = sld [smem:[%s7982_s0 + %s6798_s15]]   ;;  %s6802_s15 = smov 35  }
  0x36   :  { %s7002_s27 = sld [smem:[%s7982_s0 + %s6799_s22]]   ;;  %s6803_s22 = smov 36  }
  0x37   :  { %s7017_s17 = sld [smem:[%s7982_s0 + %s6802_s15]]  }
  0x38   :  { %8039 = sst [smem:[#allocation71_spill]] %s6987_s8 }
  0x39   :  { %s7007_s8 = sld [smem:[%s7982_s0 + %s6800_s28]]   ;;  %s6804_s28 = smov 37  }
  0x3a   :  { %8040 = sst [smem:[#allocation72_spill]] %s6992_s19 }
  0x3b   :  { %8041 = sst [smem:[#allocation73_spill]] %s6997_s4 }
  0x3c   :  { %s7012_s19 = sld [smem:[%s7982_s0 + %s6801_s7]]   ;;  %s6805_s7 = smov 38  }
  0x3d   :  { %s7022_s5 = sld [smem:[%s7982_s0 + %s6803_s22]]  }
  0x3e   :  { %s7032_s4 = sld [smem:[%s7982_s0 + %s6805_s7]]  }
  0x3f   :  { %8042 = sst [smem:[#allocation74_spill]] %s7007_s8 }
  0x40   :  { %s7027_s8 = sld [smem:[%s7982_s0 + %s6804_s28]]  }
  0x46   :  { %8043 = sst [smem:[#allocation75_spill]] %s7027_s8 }
  0x47   :  { %83 = vsyncpa [#allocation9], 0 }
  0x48   :  { %84 = vsyncpa [#allocation12], 0 }
  0x49   :  { %85 = vsyncpa [#allocation15], 0 }
  0x4a   :  { %86 = vsyncpa [#allocation18], 0 }
  0x4b   :  { %87 = vsyncpa [#allocation21], 0 }
  0x4c   :  { %88 = vsyncpa [#allocation24], 0 }
  0x4d   :  { %89 = vsyncpa [#allocation27], 0 }
  0x4e   :  { %90 = vsyncpa [#allocation30], 0 }
  0x4f   :  { %91 = vsyncpa [#allocation33], 0 }
  0x50   :  { %92 = vsyncpa [#allocation10], 0 }
  0x51   :  { %94 = vsyncpa [#allocation10 + $0x1], 0 }
  0x52   :  { %95 = vsyncpa [#allocation37], 0  ;;  %s7034_s15 = smov 0   ;;  %s7036_s16 = smov 0  }
  0x53   :  { %s7038_s18 = smov 0   ;;  %s7040_s0 = smov 0  }
  0x54 LB: > { %8044 = sst [smem:[#allocation76_spill]] %s6754_s15  ;;  %s7055_s22 = sadd.s32 4294967295, %s6766_s0   ;;  %s6766_s0 = sphi %s7040_s0, %s8125_s0   ;;  %s6762_s18 = sphi %s7038_s18, %s8127_s18   ;;  %s6758_s16 = sphi %s7036_s16, %s8129_s16   ;;  %s6754_s15 = sphi %s7034_s15, %s8128_s15  }
  0x55   : > { %8045 = sst [smem:[#allocation77_spill]] %s6762_s18  ;;  %s5002_s23 = sadd.s32 4294967294, %s6766_s0  }
  0x56   : > { %8046 = sst [smem:[#allocation78_spill]] %s6766_s0  ;;  %s7059_s26 = sadd.s32 1, %s6766_s0  }
  0x57   : > { %8047 = sst [smem:[#allocation79_spill]] %s7059_s26  ;;  %s874_s28 = sadd.s32 1, %s6762_s18 }
  0x58   : > { %s871_s1 = ssub.s32 %s6766_s0, %s7059_s26  ;;  %p884_p0 = scmp.ne.s32.totalorder %s6762_s18, %s6758_s16 }
  0x59   : > { %p872_p1 = scmp.eq.s32.totalorder %s871_s1, 0  ;;  %p8001_p2 = scmp.eq.s32.totalorder %s7055_s22, 1 }
  0x5a   : > { %p890_p3 = scmp.ne.s32.totalorder %s6758_s16, %s6754_s15  ;;  %p891_p4 = scmp.eq.s32.totalorder %s5002_s23, 1 }
  0x5b   : > { %s7070_s2 = scalar_select %p872_p1, %s6762_s18, %s874_s28  }
  0x5c   : > { %p7074_p5 = por %p8001_p2, %p884_p0  ;;  %p7078_p6 = por %p891_p4, %p890_p3 }
  0x5d   : > { %8048 = sst [smem:[#allocation80_spill]] %s7070_s2  ;;  %p5003_p7 = scmp.ge.s32.totalorder %s6766_s0, 1 }
  0x5e   : > { %s8049_s7 = scalar_select %p7074_p5, 1, 0 }
  0x5f   : > { %s8051_s10 = scalar_select %p7078_p6, 1, 0 }
  0x60   : > { %8050 = sst [smem:[#allocation81_spill]] %s8049_s7  ;;  %p940_p8 = scmp.lt.s32.totalorder %s6766_s0, 3 }
  0x61   : > { %8052 = sst [smem:[#allocation82_spill]] %s8051_s10  ;;  %p8003_p10 = scmp.eq.s32.totalorder %s7055_s22, 0 }
  0x62   : > { %p7086_p11 = pnand %p5003_p7, %p940_p8  ;;  %s6806_s23 = smov [#allocation11]  }
  0x63   : > { %s963_s28 = sshll.u32 %s6806_s23, 4  ;;  %s6807_s2 = smov [#allocation14]   ;;  %s964_s28 = int_to_ptr.vmem [resolvable:$true] %s963_s28 }
  0x64   : > { %s8053_s11 = scalar_select %p7086_p11, 1, 0 }
  0x65   : > { %p5898_p12 = pneg %p7086_p11  ;;  %s1009_s18 = sshll.u32 %s6807_s2, 4  ;;  %s1010_s18 = int_to_ptr.vmem [resolvable:$true] %s1009_s18 }
  0x66   : > { %s6808_s26 = smov [#allocation17]   ;;  %s6187_s23 = scalar_lea.vmem %s964_s28, 512 }
  0x67   : > { %p7094_p13 = pnand %p8003_p10, %p5898_p12  ;;  %s1031_s10 = sshll.u32 %s6808_s26, 4  ;;  %s1032_s10 = int_to_ptr.vmem [resolvable:$true] %s1031_s10 }
  0x68   : > { %p6188_p1 = scmp.ne.s32.totalorder %s964_s28, %s6187_s23  ;;  %p6195_p7 = scmp.lt.s32.totalorder %s964_s28, %s964_s28 }
  0x69   : > { %p7100_p0 = pneg %p7094_p13  ;;  %p6196_p8 = scmp.lt.s32.totalorder %s6187_s23, %s6187_s23 }
  0x6b   : > { %p6190_p3 = pnand %p6188_p1, %p7100_p0  ;;  %p6197_p12 = por %p6196_p8, %p6195_p7 }
  0x6d   : > { %p6191_p4 = pneg %p6190_p3 }
  0x6f   : > { %p6198_p2 = pnand %p6197_p12, %p6191_p4 }
  0x71   : > { %6201 = shalt.err (!%p6198_p2)
}
  0x72   : > { %s6809_s2 = smov 128   ;;  %s8056_s13 = sld [smem:[#allocation52_spill]] }
  0x73   : > { %s6810_s26 = smov 8   ;;  %s6213_s0 = scalar_lea.vmem %s1010_s18, 16 }
  0x74   : > { %p6214_p9 = scmp.ne.s32.totalorder %s1010_s18, %s6213_s0  ;;  %s6220_s7 = scalar_lea.vmem %s1010_s18, 32 }
  0x75   : > { %p6221_p1 = scmp.lt.s32.totalorder %s1010_s18, %s1010_s18  ;;  %p6222_p3 = scmp.lt.s32.totalorder %s6220_s7, %s6213_s0 }
  0x76   : > { %p6216_p10 = pnand %p6214_p9, %p7100_p0 }
  0x77   : > { %p6223_p5 = por %p6222_p3, %p6221_p1 }
  0x78   : > { %5904 = dma.hbm_to_vmem [thread:$0]  (!%p7094_p13), %s8056_s13, 512, %s964_s28, [#allocation12], %s6809_s2, %s6809_s2, %s6810_s26  }
  0x79   : > { %p6217_p6 = pneg %p6216_p10 }
  0x7b   : > { %p6224_p11 = pnand %p6223_p5, %p6217_p6 }
  0x7d   : > { %6227 = shalt.err (!%p6224_p11)
}
  0x7e   : > { %5910 = dma.hbm_to_vmem [thread:$0]  (!%p7094_p13), %s6902_s30, 16, %s1010_s18, [#allocation15]  }
  0x7f   : > { %s6239_s23 = scalar_lea.vmem %s1032_s10, 16  ;;  %s6246_s28 = scalar_lea.vmem %s1032_s10, 32 }
  0x80   : > { %p6240_p2 = scmp.ne.s32.totalorder %s1032_s10, %s6239_s23  ;;  %p6247_p9 = scmp.lt.s32.totalorder %s1032_s10, %s1032_s10 }
  0x81   : > { %p6248_p10 = scmp.lt.s32.totalorder %s6246_s28, %s6239_s23 }
  0x82   : > { %p6242_p4 = pnand %p6240_p2, %p7100_p0 }
  0x83   : > { %p6249_p8 = por %p6248_p10, %p6247_p9 }
  0x84   : > { %p6243_p7 = pneg %p6242_p4 }
  0x86   : > { %p6250_p12 = pnand %p6249_p8, %p6243_p7 }
  0x88   : > { %6253 = shalt.err (!%p6250_p12)
}
  0x89   : > { %5916 = dma.hbm_to_vmem [thread:$0]  (!%p7094_p13), %s6912_s12, 16, %s1032_s10, [#allocation18]  }
  0x8a   : > { %s6811_s0 = smov [#allocation20]   ;;  %s6812_s18 = smov [#allocation23]  }
  0x8b   : > { %s1071_s7 = sshll.u32 %s6811_s0, 4  ;;  %s1098_s2 = sshll.u32 %s6812_s18, 4  ;;  %s1072_s7 = int_to_ptr.vmem [resolvable:$true] %s1071_s7  ;;  %s1099_s2 = int_to_ptr.vmem [resolvable:$true] %s1098_s2 }
  0x8c   : > { %s6265_s26 = scalar_lea.vmem %s1072_s7, 16  ;;  %s6272_s13 = scalar_lea.vmem %s1072_s7, 32 }
  0x8d   : > { %p6266_p5 = scmp.ne.s32.totalorder %s1072_s7, %s6265_s26  ;;  %p6273_p1 = scmp.lt.s32.totalorder %s1072_s7, %s1072_s7 }
  0x8e   : > { %p6274_p3 = scmp.lt.s32.totalorder %s6272_s13, %s6265_s26 }
  0x8f   : > { %p6268_p6 = pnand %p6266_p5, %p7100_p0 }
  0x90   : > { %p6275_p2 = por %p6274_p3, %p6273_p1 }
  0x91   : > { %p6269_p11 = pneg %p6268_p6 }
  0x93   : > { %p6276_p4 = pnand %p6275_p2, %p6269_p11 }
  0x95   : > { %6279 = shalt.err (!%p6276_p4)
}
  0x96   : > { %5922 = dma.hbm_to_vmem [thread:$0]  (!%p7094_p13), %s6952_s25, 16, %s1072_s7, [#allocation21]  }
  0x97   : > { %s6291_s10 = scalar_lea.vmem %s1099_s2, 16  ;;  %s6298_s23 = scalar_lea.vmem %s1099_s2, 32 }
  0x98   : > { %p6292_p7 = scmp.ne.s32.totalorder %s1099_s2, %s6291_s10  ;;  %p6299_p8 = scmp.lt.s32.totalorder %s1099_s2, %s1099_s2 }
  0x99   : > { %p6300_p12 = scmp.lt.s32.totalorder %s6298_s23, %s6291_s10 }
  0x9a   : > { %p6294_p9 = pnand %p6292_p7, %p7100_p0 }
  0x9b   : > { %p6301_p5 = por %p6300_p12, %p6299_p8 }
  0x9c   : > { %p6295_p10 = pneg %p6294_p9 }
  0x9e   : > { %p6302_p6 = pnand %p6301_p5, %p6295_p10 }
  0xa0   : > { %6305 = shalt.err (!%p6302_p6)
}
  0xa1   : > { %5928 = dma.hbm_to_vmem [thread:$0]  (!%p7094_p13), %s6967_s29, 16, %s1099_s2, [#allocation24]  }
  0xa2   : > { %s6813_s13 = smov [#allocation26]   ;;  %s6814_s0 = smov [#allocation29]  }
  0xa3   : > { %s1125_s28 = sshll.u32 %s6813_s13, 4  ;;  %s1153_s7 = sshll.u32 %s6814_s0, 4  ;;  %s1126_s28 = int_to_ptr.vmem [resolvable:$true] %s1125_s28  ;;  %s1154_s7 = int_to_ptr.vmem [resolvable:$true] %s1153_s7 }
  0xa4   : > { %s6317_s18 = scalar_lea.vmem %s1126_s28, 16  ;;  %s6324_s26 = scalar_lea.vmem %s1126_s28, 32 }
  0xa5   : > { %p6318_p11 = scmp.ne.s32.totalorder %s1126_s28, %s6317_s18  ;;  %p6325_p2 = scmp.lt.s32.totalorder %s1126_s28, %s1126_s28 }
  0xa6   : > { %p6326_p4 = scmp.lt.s32.totalorder %s6324_s26, %s6317_s18 }
  0xa7   : > { %p6320_p1 = pnand %p6318_p11, %p7100_p0 }
  0xa8   : > { %p6327_p7 = por %p6326_p4, %p6325_p2 }
  0xa9   : > { %p6321_p3 = pneg %p6320_p1 }
  0xab   : > { %p6328_p9 = pnand %p6327_p7, %p6321_p3 }
  0xad   : > { %6331 = shalt.err (!%p6328_p9)
}
  0xae   : > { %5934 = dma.hbm_to_vmem [thread:$0]  (!%p7094_p13), %s6982_s14, 16, %s1126_s28, [#allocation27]  }
  0xaf   : > { %s6343_s2 = scalar_lea.vmem %s1154_s7, 16  ;;  %s6350_s10 = scalar_lea.vmem %s1154_s7, 32 }
  0xb0   : > { %p6344_p10 = scmp.ne.s32.totalorder %s1154_s7, %s6343_s2  ;;  %p6351_p5 = scmp.lt.s32.totalorder %s1154_s7, %s1154_s7 }
  0xb1   : > { %p6352_p6 = scmp.lt.s32.totalorder %s6350_s10, %s6343_s2 }
  0xb2   : > { %p6346_p8 = pnand %p6344_p10, %p7100_p0 }
  0xb3   : > { %p6353_p11 = por %p6352_p6, %p6351_p5 }
  0xb4   : > { %p6347_p12 = pneg %p6346_p8 }
  0xb6   : > { %p6354_p1 = pnand %p6353_p11, %p6347_p12 }
  0xb8   : > { %6357 = shalt.err (!%p6354_p1)
}
  0xb9   : > { %5940 = dma.hbm_to_vmem [thread:$0]  (!%p7094_p13), %s7002_s27, 16, %s1154_s7, [#allocation30]  }
  0xba   : > { %s6815_s23 = smov [#allocation32]   ;;  %s6816_s28 = smov [#allocation8]  }
  0xbb   : > { %s1175_s13 = sshll.u32 %s6815_s23, 4  ;;  %s953_s0 = sshll.u32 %s6816_s28, 4  ;;  %s1176_s13 = int_to_ptr.vmem [resolvable:$true] %s1175_s13  ;;  %s954_s0 = int_to_ptr.vmem [resolvable:$true] %s953_s0 }
  0xbc   : > { %s6369_s18 = scalar_lea.vmem %s1176_s13, 16  ;;  %s6376_s26 = scalar_lea.vmem %s1176_s13, 32 }
  0xbd   : > { %p6370_p3 = scmp.ne.s32.totalorder %s1176_s13, %s6369_s18  ;;  %p6377_p7 = scmp.lt.s32.totalorder %s1176_s13, %s1176_s13 }
  0xbe   : > { %p6378_p9 = scmp.lt.s32.totalorder %s6376_s26, %s6369_s18 }
  0xbf   : > { %p6372_p2 = pnand %p6370_p3, %p7100_p0 }
  0xc0   : > { %p6379_p10 = por %p6378_p9, %p6377_p7 }
  0xc1   : > { %p6373_p4 = pneg %p6372_p2 }
  0xc3   : > { %p6380_p8 = pnand %p6379_p10, %p6373_p4 }
  0xc5   : > { %6383 = shalt.err (!%p6380_p8)
}
  0xc6   : > { %5946 = dma.hbm_to_vmem [thread:$0]  (!%p7094_p13), %s7012_s19, 16, %s1176_s13, [#allocation33]  }
  0xc7   : > { %s6395_s7 = scalar_lea.vmem %s954_s0, 16  ;;  %s6402_s2 = scalar_lea.vmem %s954_s0, 32 }
  0xc8   : > { %p6396_p12 = scmp.ne.s32.totalorder %s954_s0, %s6395_s7  ;;  %p6403_p11 = scmp.lt.s32.totalorder %s954_s0, %s954_s0 }
  0xc9   : > { %p6404_p1 = scmp.lt.s32.totalorder %s6402_s2, %s6395_s7 }
  0xca   : > { %p6398_p5 = pnand %p6396_p12, %p7100_p0 }
  0xcb   : > { %p6405_p3 = por %p6404_p1, %p6403_p11 }
  0xcc   : > { %p6399_p6 = pneg %p6398_p5 }
  0xce   : > { %p6406_p2 = pnand %p6405_p3, %p6399_p6 }
  0xd0   : > { %6409 = shalt.err (!%p6406_p2)
}
  0xd1   : > { %s8057_s9 = sld [smem:[#allocation51_spill]]  ;;  %s6817_s10 = smov [#allocation13]  }
  0xd2   : > { %s998_s23 = sshll.u32 %s6817_s10, 4  ;;  %s6818_s13 = smov [#allocation16]   ;;  %s999_s23 = int_to_ptr.vmem [resolvable:$true] %s998_s23 }
  0xd3   : > { %s1020_s28 = sshll.u32 %s6818_s13, 4  ;;  %s6421_s18 = scalar_lea.vmem %s999_s23, 16  ;;  %s1021_s28 = int_to_ptr.vmem [resolvable:$true] %s1020_s28 }
  0xd4   : > { %p6422_p4 = scmp.ne.s32.totalorder %s999_s23, %s6421_s18  ;;  %s6428_s26 = scalar_lea.vmem %s999_s23, 32 }
  0xd5   : > { %p6429_p10 = scmp.lt.s32.totalorder %s999_s23, %s999_s23  ;;  %p6430_p8 = scmp.lt.s32.totalorder %s6428_s26, %s6421_s18 }
  0xd6   : > { %p6424_p7 = pnand %p6422_p4, %p7100_p0 }
  0xd7   : > { %5901 = dma.hbm_to_vmem [thread:$0]  (!%p7094_p13), %s8057_s9, 16, %s954_s0, [#allocation9]  }
  0xd8   : > { %p6425_p9 = pneg %p6424_p7  ;;  %p6431_p12 = por %p6430_p8, %p6429_p10 }
  0xda   : > { %p6432_p5 = pnand %p6431_p12, %p6425_p9 }
  0xdc   : > { %6435 = shalt.err (!%p6432_p5)
}
  0xdd   : > { %5907 = dma.hbm_to_vmem [thread:$0]  (!%p7094_p13), %s6897_s24, 16, %s999_s23, [#allocation12]  }
  0xde   : > { %s6447_s0 = scalar_lea.vmem %s1021_s28, 16  ;;  %s6454_s7 = scalar_lea.vmem %s1021_s28, 32 }
  0xdf   : > { %p6448_p6 = scmp.ne.s32.totalorder %s1021_s28, %s6447_s0  ;;  %p6455_p3 = scmp.lt.s32.totalorder %s1021_s28, %s1021_s28 }
  0xe0   : > { %p6456_p2 = scmp.lt.s32.totalorder %s6454_s7, %s6447_s0 }
  0xe1   : > { %p6450_p11 = pnand %p6448_p6, %p7100_p0 }
  0xe2   : > { %p6457_p4 = por %p6456_p2, %p6455_p3 }
  0xe3   : > { %p6451_p1 = pneg %p6450_p11 }
  0xe5   : > { %p6458_p7 = pnand %p6457_p4, %p6451_p1 }
  0xe7   : > { %6461 = shalt.err (!%p6458_p7)
}
  0xe8   : > { %s8058_s6 = sld [smem:[#allocation61_spill]]  ;;  %s6819_s2 = smov [#allocation19]  }
  0xe9   : > { %s1042_s10 = sshll.u32 %s6819_s2, 4  ;;  %s6820_s23 = smov [#allocation22]   ;;  %s1043_s10 = int_to_ptr.vmem [resolvable:$true] %s1042_s10 }
  0xea   : > { %s1084_s13 = sshll.u32 %s6820_s23, 4  ;;  %s6473_s18 = scalar_lea.vmem %s1043_s10, 16  ;;  %s1085_s13 = int_to_ptr.vmem [resolvable:$true] %s1084_s13 }
  0xeb   : > { %p6474_p9 = scmp.ne.s32.totalorder %s1043_s10, %s6473_s18  ;;  %s6480_s26 = scalar_lea.vmem %s1043_s10, 32 }
  0xec   : > { %p6481_p12 = scmp.lt.s32.totalorder %s1043_s10, %s1043_s10  ;;  %p6482_p5 = scmp.lt.s32.totalorder %s6480_s26, %s6473_s18 }
  0xed   : > { %p6476_p10 = pnand %p6474_p9, %p7100_p0 }
  0xee   : > { %5913 = dma.hbm_to_vmem [thread:$0]  (!%p7094_p13), %s8058_s6, 16, %s1021_s28, [#allocation15]  }
  0xef   : > { %p6477_p8 = pneg %p6476_p10  ;;  %p6483_p6 = por %p6482_p5, %p6481_p12 }
  0xf1   : > { %p6484_p11 = pnand %p6483_p6, %p6477_p8 }
  0xf3   : > { %6487 = shalt.err (!%p6484_p11)
}
  0xf4   : > { %5919 = dma.hbm_to_vmem [thread:$0]  (!%p7094_p13), %s6917_s20, 16, %s1043_s10, [#allocation18]  }
  0xf5   : > { %s6499_s28 = scalar_lea.vmem %s1085_s13, 128  ;;  %p6507_p4 = scmp.lt.s32.totalorder %s1085_s13, %s1085_s13 }
  0xf6   : > { %p6500_p1 = scmp.ne.s32.totalorder %s1085_s13, %s6499_s28  ;;  %p6508_p7 = scmp.lt.s32.totalorder %s6499_s28, %s6499_s28 }
  0xf8   : > { %p6502_p3 = pnand %p6500_p1, %p7100_p0  ;;  %p6509_p9 = por %p6508_p7, %p6507_p4 }
  0xfa   : > { %p6503_p2 = pneg %p6502_p3 }
  0xfc   : > { %p6510_p10 = pnand %p6509_p9, %p6503_p2 }
  0xfe   : > { %6513 = shalt.err (!%p6510_p10)
}
  0xff   : > { %s6821_s0 = smov 64   ;;  %s8059_s3 = sld [smem:[#allocation69_spill]] }
 0x100   : > { %s6822_s7 = smov 4   ;;  %s6823_s2 = smov [#allocation25]  }
 0x101   : > { %s1111_s10 = sshll.u32 %s6823_s2, 4  ;;  %s6824_s23 = smov [#allocation28]   ;;  %s1112_s10 = int_to_ptr.vmem [resolvable:$true] %s1111_s10 }
 0x102   : > { %s1142_s18 = sshll.u32 %s6824_s23, 4  ;;  %s6525_s26 = scalar_lea.vmem %s1112_s10, 128  ;;  %s1143_s18 = int_to_ptr.vmem [resolvable:$true] %s1142_s18 }
 0x103   : > { %p6526_p8 = scmp.ne.s32.totalorder %s1112_s10, %s6525_s26  ;;  %p6533_p6 = scmp.lt.s32.totalorder %s1112_s10, %s1112_s10 }
 0x104   : > { %p6534_p11 = scmp.lt.s32.totalorder %s6525_s26, %s6525_s26 }
 0x105   : > { %5925 = dma.hbm_to_vmem [thread:$0]  (!%p7094_p13), %s8059_s3, 128, %s1085_s13, [#allocation21], %s6821_s0, %s6821_s0, %s6822_s7  }
 0x106   : > { %p6528_p12 = pnand %p6526_p8, %p7100_p0  ;;  %p6535_p1 = por %p6534_p11, %p6533_p6 }
 0x108   : > { %p6529_p5 = pneg %p6528_p12 }
 0x10a   : > { %p6536_p3 = pnand %p6535_p1, %p6529_p5 }
 0x10c   : > { %6539 = shalt.err (!%p6536_p3)
}
 0x10d   : > { %5931 = dma.hbm_to_vmem [thread:$0]  (!%p7094_p13), %s6977_s21, 128, %s1112_s10, [#allocation24], %s6821_s0, %s6821_s0, %s6822_s7  }
 0x10e   : > { %s6551_s13 = scalar_lea.vmem %s1143_s18, 16  ;;  %s6558_s28 = scalar_lea.vmem %s1143_s18, 32 }
 0x10f   : > { %p6552_p2 = scmp.ne.s32.totalorder %s1143_s18, %s6551_s13  ;;  %p6559_p9 = scmp.lt.s32.totalorder %s1143_s18, %s1143_s18 }
 0x110   : > { %p6560_p10 = scmp.lt.s32.totalorder %s6558_s28, %s6551_s13 }
 0x111   : > { %p6554_p4 = pnand %p6552_p2, %p7100_p0 }
 0x112   : > { %p6561_p8 = por %p6560_p10, %p6559_p9 }
 0x113   : > { %p6555_p7 = pneg %p6554_p4 }
 0x115   : > { %p6562_p12 = pnand %p6561_p8, %p6555_p7 }
 0x117   : > { %6565 = shalt.err (!%p6562_p12)
}
 0x118   : > { %s8060_s2 = sld [smem:[#allocation73_spill]]  ;;  %s6825_s23 = smov [#allocation31]  }
 0x119   : > { %s1164_s26 = sshll.u32 %s6825_s23, 4  ;;  %s6826_s0 = smov [#allocation34]   ;;  %s1165_s26 = int_to_ptr.vmem [resolvable:$true] %s1164_s26 }
 0x11a   : > { %s1186_s7 = sshll.u32 %s6826_s0, 4  ;;  %s6577_s10 = scalar_lea.vmem %s1165_s26, 16  ;;  %s1187_s7 = int_to_ptr.vmem [resolvable:$true] %s1186_s7 }
 0x11b   : > { %p6578_p5 = scmp.ne.s32.totalorder %s1165_s26, %s6577_s10  ;;  %s6584_s3 = scalar_lea.vmem %s1165_s26, 32 }
 0x11c   : > { %p6585_p1 = scmp.lt.s32.totalorder %s1165_s26, %s1165_s26  ;;  %p6586_p3 = scmp.lt.s32.totalorder %s6584_s3, %s6577_s10 }
 0x11d   : > { %p6580_p6 = pnand %p6578_p5, %p7100_p0 }
 0x11e   : > { %5937 = dma.hbm_to_vmem [thread:$0]  (!%p7094_p13), %s8060_s2, 16, %s1143_s18, [#allocation27]  }
 0x11f   : > { %p6581_p11 = pneg %p6580_p6  ;;  %p6587_p2 = por %p6586_p3, %p6585_p1 }
 0x121   : > { %p6588_p4 = pnand %p6587_p2, %p6581_p11 }
 0x123   : > { %6591 = shalt.err (!%p6588_p4)
}
 0x124   : > { %s8061_s13 = sld [smem:[#allocation74_spill]]  ;;  %s6603_s18 = scalar_lea.vmem %s1187_s7, 16 }
 0x125   : > { %p6604_p7 = scmp.ne.s32.totalorder %s1187_s7, %s6603_s18  ;;  %s6610_s28 = scalar_lea.vmem %s1187_s7, 32 }
 0x126   : > { %p6611_p8 = scmp.lt.s32.totalorder %s1187_s7, %s1187_s7  ;;  %p6612_p12 = scmp.lt.s32.totalorder %s6610_s28, %s6603_s18 }
 0x127   : > { %p6606_p9 = pnand %p6604_p7, %p7100_p0 }
 0x128   : > { %p6613_p5 = por %p6612_p12, %p6611_p8 }
 0x129   : > { %p6607_p10 = pneg %p6606_p9 }
 0x12a   : > { %5943 = dma.hbm_to_vmem [thread:$0]  (!%p7094_p13), %s8061_s13, 16, %s1165_s26, [#allocation30]  }
 0x12b   : > { %p6614_p6 = pnand %p6613_p5, %p6607_p10 }
 0x12d   : > { %6617 = shalt.err (!%p6614_p6)
}
 0x12e   : > { %5949 = dma.hbm_to_vmem [thread:$0]  (!%p7094_p13), %s7017_s17, 16, %s1187_s7, [#allocation33]  }
 0x12f   : > { %p8062_p11 = scmp.ne.s32.totalorder %s8053_s11, 0 }
 0x130   : > { %p8063_p1 = scmp.eq.s32.totalorder (!%p8062_p11), %s7055_s22, 0 }
 0x131   : > { %1213 = sbr.rel (%p8062_p11) target bundleno = 4793 (0x12b9), region = 164 }
 0x136   : > { %6709 = dma.done.wait (%p8063_p1), [#allocation9], 16   ;;  %p8064_p3 = pmov %p8063_p1 }
 0x137   : > { %p8065_p0 = pmov %p8063_p1 }
 0x138   : > { %6711 = vsyncadd (%p8064_p3), [#allocation9], 4294967280 }
 0x139   : > { %6713 = dma.done.wait (%p8065_p0), [#allocation12], 528   ;;  %p8066_p2 = pmov %p8065_p0 }
 0x13a   : > { %p8067_p4 = pmov %p8065_p0 }
 0x13b   : > { %6715 = vsyncadd (%p8066_p2), [#allocation12], 4294966768 }
 0x13c   : > { %6717 = dma.done.wait (%p8067_p4), [#allocation15], 32   ;;  %p8068_p13 = pmov %p8065_p0 }
 0x13d   : > { %p8069_p7 = pmov %p8065_p0 }
 0x13e   : > { %6719 = vsyncadd (%p8068_p13), [#allocation15], 4294967264 }
 0x13f   : > { %6721 = dma.done.wait (%p8069_p7), [#allocation18], 32   ;;  %p8070_p9 = pmov %p8065_p0 }
 0x140   : > { %p8071_p10 = pmov %p8065_p0 }
 0x141   : > { %6723 = vsyncadd (%p8070_p9), [#allocation18], 4294967264 }
 0x142   : > { %6725 = dma.done.wait (%p8071_p10), [#allocation21], 144   ;;  %p8072_p8 = pmov %p8065_p0 }
 0x143   : > { %p8073_p12 = pmov %p8065_p0 }
 0x144   : > { %6727 = vsyncadd (%p8072_p8), [#allocation21], 4294967152 }
 0x145   : > { %6729 = dma.done.wait (%p8073_p12), [#allocation24], 144   ;;  %p8074_p5 = pmov %p8065_p0 }
 0x146   : > { %p8075_p6 = pmov %p8065_p0 }
 0x147   : > { %6731 = vsyncadd (%p8074_p5), [#allocation24], 4294967152 }
 0x148   : > { %6733 = dma.done.wait (%p8075_p6), [#allocation27], 32   ;;  %p8076_p11 = pmov %p8065_p0 }
 0x149   : > { %p8077_p1 = pmov %p8065_p0 }
 0x14a   : > { %6735 = vsyncadd (%p8076_p11), [#allocation27], 4294967264 }
 0x14b   : > { %6737 = dma.done.wait (%p8077_p1), [#allocation30], 32   ;;  %p8078_p3 = pmov %p8065_p0 }
 0x14d   : > { %6739 = vsyncadd (%p8078_p3), [#allocation30], 4294967264 }
 0x14e   : > { %6741 = dma.done.wait (%p8065_p0), [#allocation33], 32   ;;  %p8079_p2 = pmov %p8065_p0 }
 0x14f   : > { %s8080_s3 = sld [smem:[#allocation50_spill]]  ;;  %s8008_s11 = sand.u32 1, %s6758_s16  }
 0x150   : > { %6743 = vsyncadd (%p8079_p2), [#allocation33], 4294967264  ;;  %s8081_s15 = sld [smem:[#allocation53_spill]]  ;;  %p1374_p4 = scmp.lt.s32.totalorder %s7055_s22, 1 }
 0x151   : > { %s7231_s1 = sshll.u32 %s8008_s11, 3  ;;  %p8082_p13 = scmp.ne.s32.totalorder %s7055_s22, 0 }
 0x152   : > { %s1375_s2 = scalar_select %p1374_p4, %s7055_s22, 1 }
 0x153   : > { %1386 = sbr.rel (%p8082_p13) target bundleno = 348 (0x15c), region = 236 }
 0x154   : > { %s5041_s23 = sshll.u32 %s1375_s2, 3 }
 0x155   : > { %s7235_s26 = scalar_lea.vmem %s8080_s3, %s5041_s23 }
 0x156   : > { %s7238_s0 = scalar_lea.vmem %s8081_s15, %s5041_s23 }
 0x158   : > { %v1387_v0 = vld [vmem:[#allocation8] sm:$0x1]  ;;  %vm1388_vm0 = vcmask 516096   ;;  %v1390_v1 = vld [vmem:[#allocation11] sm:$0xff]  ;;  %vm1394_vm1 = vcmask 523264   ;;  %v1391_v2 = vld [vmem:[#allocation11 + $0x8] sm:$0xff] }
 0x159   : > { %1389 = vst.msk [vmem:[#allocation36] sm:$0x1] %vm1388_vm0, %v1387_v0  ;;  %v1392_v3 = vld [vmem:[#allocation11 + $0x10] sm:$0xff]  ;;  %v1393_v4 = vld [vmem:[#allocation11 + $0x18] sm:$0xff] }
 0x15a   : > { %1395 = vst.msk [vmem:[#allocation38] sm:$0xff] %vm1394_vm1, %v1390_v1  ;;  %1396 = vst.msk [vmem:[#allocation38 + $0x8] sm:$0xff] %vm1394_vm1, %v1391_v2 }
 0x15b   : > { %1397 = vst.msk [vmem:[#allocation38 + $0x10] sm:$0xff] %vm1394_vm1, %v1392_v3  ;;  %1398 = vst.msk [vmem:[#allocation38 + $0x18] sm:$0xff] %vm1394_vm1, %v1393_v4 }
 0x15c PF: > { %s8083_s10 = sld [smem:[#allocation62_spill]]  ;;  %v1399_v5 = vld [vmem:[%s7235_s26] sm:$0xff]  ;;  %vm1400_vm2 = vcmask 523264   ;;  %v6827_v14 = vmov 0.0   ;;  %vm6828_vm3 = vmmov 0   ;;  %vm1437_vm4 = vcmask 523271  }
 0x15d   : > { %s8084_s13 = sld [smem:[#allocation63_spill]]  ;;  %v1401_v6 = vsel %vm1400_vm2, %v1399_v5, 0.0  ;;  %5423 = vmatprep.subr.bf16.mxu0 %v6827_v14  ;;  %5435 = vmatprep.subr.bf16.mxu1 %v6827_v14  ;;  %vm1435_vm5 = vcmask 1040384   ;;  %v5048_v34 = vld [vmem:[#allocation14] ss:$0 sm:$0xff]  ;;  %vm1821_vm6 = vcmask 261120  }
 0x15e   : > { %1402 = vadd.xlane.f32.xlu0 %v1401_v6  ;;  %5431 = vmatprep.mubr.msk.bf16.mxu0 %vm6828_vm3, %v6827_v14  ;;  %s8085_s18 = sld [smem:[#allocation58_spill]]  ;;  %v5047_v36 = vld [vmem:[#allocation13] ss:$0 sm:$0xff]  ;;  %v5049_v49 = vld [vmem:[#allocation16] ss:$0 sm:$0xff]  ;;  %vm1957_vm7 = vcmask 130048  }
 0x15f   : > { %5443 = vmatprep.mubr.msk.bf16.mxu1 %vm6828_vm3, %v6827_v14  ;;  %s8086_s28 = sld [smem:[#allocation59_spill]]  ;;  %v5051_v50 = vld [vmem:[#allocation19] ss:$0 sm:$0xff]  ;;  %v5050_v63 = vld [vmem:[#allocation17] ss:$0 sm:$0xff]  ;;  %vm2417_vm8 = vcmask 1041408  }
 0x160   : > { %s8087_s3 = sld [smem:[#allocation60_spill]]  ;;  %v1431_v29 = vld [vmem:[#allocation36] sm:$0x1]  ;;  %vm2410_vm11 = vcmask 15360   ;;  %vm2762_vm12 = vcmask 516096   ;;  %p8109_p9 = scmp.eq.s32.totalorder %s7055_s22, 1 }
 0x161   : > { %s8088_s15 = sld [smem:[#allocation64_spill]] }
 0x162   : > { %v6090_v12 = vld [vmem:[%s8083_s10 + $0x18] sm:$0xff]   ;;  %v6092_v15 = vld [vmem:[%s8083_s10 + $0x10] sm:$0xff]   ;;  %v6094_v17 = vld [vmem:[%s8083_s10 + $0x8] sm:$0xff]   ;;  %s8090_s23 = sld [smem:[#allocation71_spill]] }
 0x163   : > { %v6091_v13 = vld [vmem:[%s8084_s13 + $0x18] sm:$0xff]   ;;  %5424 = vmatpush3.bf16.msra.mxu0 %v6090_v12  ;;  %v6093_v16 = vld [vmem:[%s8084_s13 + $0x10] sm:$0xff]   ;;  %v6095_v18 = vld [vmem:[%s8084_s13 + $0x8] sm:$0xff]  }
 0x164   : > { %5436 = vmatpush3.bf16.msra.mxu1 %v6091_v13  ;;  %5425 = vmatprep.subr.bf16.mxu0 %v6827_v14  ;;  %v6096_v19 = vld [vmem:[%s8083_s10] sm:$0xff]  }
 0x165   : > { %5437 = vmatprep.subr.bf16.mxu1 %v6827_v14  ;;  %v6097_v20 = vld [vmem:[%s8084_s13] sm:$0xff]  }
 0x166   : > { %v5044_v25 = vld [vmem:[%s8085_s18] ss:$0 sm:$0xff]  ;;  %s8091_s18 = sld [smem:[#allocation68_spill]] }
 0x167   : > { %5426 = vmatpush3.bf16.msra.mxu0 %v6092_v15  ;;  %v5045_v27 = vld [vmem:[%s8086_s28] ss:$0 sm:$0xff]  ;;  %s8089_s2 = smov %s8088_s15  ;;  %v6098_v42 = vld [vmem:[%s8088_s15 + $0x18] sm:$0xff]   ;;  %s8094_s15 = sld [smem:[#allocation66_spill]] }
 0x168   : > { %5438 = vmatpush3.bf16.msra.mxu1 %v6093_v16  ;;  %5427 = vmatprep.subr.bf16.mxu0 %v6827_v14  ;;  %v5046_v33 = vld [vmem:[%s8087_s3] ss:$0 sm:$0xff]  ;;  %v6099_v43 = vld [vmem:[%s8090_s23 + $0x18] sm:$0xff]   ;;  %v6100_v47 = vld [vmem:[%s8089_s2 + $0x10] sm:$0xff]   ;;  %s8093_s3 = sld [smem:[#allocation72_spill]] }
 0x169   : > { %5439 = vmatprep.subr.bf16.mxu1 %v6827_v14  ;;  %v6101_v48 = vld [vmem:[%s8090_s23 + $0x10] sm:$0xff]   ;;  %v6102_v51 = vld [vmem:[%s8089_s2 + $0x8] sm:$0xff]   ;;  %v6104_v55 = vld [vmem:[%s8089_s2] sm:$0xff]  }
 0x16a   : > { %v6103_v52 = vld [vmem:[%s8090_s23 + $0x8] sm:$0xff]   ;;  %v6105_v56 = vld [vmem:[%s8090_s23] sm:$0xff]  }
 0x16b   : > { %5428 = vmatpush3.bf16.msra.mxu0 %v6094_v17 }
 0x16c   : > { %5440 = vmatpush3.bf16.msra.mxu1 %v6095_v18  ;;  %5429 = vmatprep.subr.bf16.mxu0 %v6827_v14  ;;  %s8092_s28 = smov %s8091_s18  ;;  %v6106_v59 = vld [vmem:[%s8091_s18 + $0x18] sm:$0xff]   ;;  %s8096_s18 = sld [smem:[#allocation67_spill]] }
 0x16d   : > { %5441 = vmatprep.subr.bf16.mxu1 %v6827_v14  ;;  %v6107_v62 = vld [vmem:[%s8092_s28 + $0x10] sm:$0xff]   ;;  %v6108_v0 = vld [vmem:[%s8092_s28 + $0x8] sm:$0xff]   ;;  %v6109_v2 = vld [vmem:[%s8092_s28] sm:$0xff]   ;;  %s8095_s11 = smov %s8094_s15 }
 0x16e   : > { %v6111_v6 = vld [vmem:[%s8093_s3] sm:$0xff]  }
 0x16f   : > { %5430 = vmatpush3.bf16.msra.mxu0 %v6096_v19 }
 0x170   : > { %5442 = vmatpush3.bf16.msra.mxu1 %v6097_v20  ;;  %5447 = vmatprep.subr.bf16.mxu0 %v6827_v14 }
 0x171   : > { %5459 = vmatprep.subr.bf16.mxu1 %v6827_v14 }
 0x1e7   : > { %v1403_v7 = vpop.xlane.xlu0 %1402 }
 0x1e8   : > { %v1405_v8 = vmul.f32 0.015625, %v1403_v7 }
 0x1ea   : > { %v1406_v9 = vsub.f32 %v1399_v5, %v1405_v8  ;;  %v6110_v5 = vld [vmem:[%s8093_s3 + $0x8] sm:$0xff]  }
 0x1ec   : > { %v1407_v10 = vmul.f32 %v1406_v9, %v1406_v9 }
 0x1ee   : > { %v1408_v11 = vsel %vm1400_vm2, %v1407_v10, 0.0 }
 0x1ef   : > { %1409 = vadd.xlane.f32.xlu0 %v1408_v11 }
 0x278   : > { %v1410_v21 = vpop.xlane.xlu0 %1409 }
 0x279   : > { %v1411_v22 = vmul.f32 0.015625, %v1410_v21 }
 0x27b   : > { %v1412_v23 = vadd.f32 1e-05, %v1411_v22 }
 0x27d   : > { %6139 = vrsqrt.f32 %v1412_v23 }
 0x28a   : > { %v6140_v24 = vpop.eup %6139 }
 0x28b   : > { %v1414_v26 = vmul.f32 %v6140_v24, %v1406_v9 }
 0x28d   : > { %v1422_v28 = vmul.f32 %v5044_v25, %v1414_v26 }
 0x28f   : > { %v7270_v30 = vadd.f32 %v5045_v27, %v1422_v28 }
 0x291   : > { %v1433_v31 = vrot.slane %v7270_v30, 7  ;;  %1438 = vst.msk [vmem:[#allocation36 - $0x7] sm:$0x80] %vm1437_vm4, %v7270_v30 }
 0x293   : > { %v1436_v32 = vsel %vm1435_vm5, %v1431_v29, %v1433_v31 }
 0x294   : > { %v1439_v35 = vsub.f32 %v1436_v32, %v7270_v30  ;;  %v6112_v32 = vld [vmem:[#allocation22] sm:$0xff]  }
 0x296   : > { %v1447_v37 = vmul.f32 %v5046_v33, %v1439_v35  ;;  %v1465_v38 = vmul.f32 %v5048_v34, %v1439_v35  ;;  %v1456_v39 = vmul.f32 %v5047_v36, %v1439_v35  ;;  %v1474_v53 = vmul.f32 %v5049_v49, %v1439_v35  ;;  %v6113_v34 = vld [vmem:[%s8094_s15 + $0x18] sm:$0xff]   ;;  %v6114_v36 = vld [vmem:[%s8095_s11 + $0x10] sm:$0xff]   ;;  %s8097_s15 = sld [smem:[#allocation70_spill]] }
 0x297   : > { %v1492_v54 = vmul.f32 %v5051_v50, %v1439_v35  ;;  %v1483_v1 = vmul.f32 %v5050_v63, %v1439_v35 }
 0x298   : > { %v1448_v40 = vadd.f32 %v1447_v37, %v7270_v30  ;;  %v1466_v41 = vadd.f32 %v1465_v38, %v7270_v30  ;;  %v7281_v44 = vadd.f32 %v1456_v39, %v7270_v30  ;;  %v1475_v57 = vadd.f32 %v1474_v53, %v7270_v30  ;;  %v6115_v37 = vld [vmem:[%s8095_s11 + $0x8] sm:$0xff]   ;;  %v6116_v38 = vld [vmem:[%s8095_s11] sm:$0xff]  }
 0x299   : > { %v1493_v58 = vadd.f32 %v1492_v54, %v7270_v30  ;;  %v1484_v3 = vadd.f32 %v1483_v1, %v7270_v30 }
 0x29a   : > { %v1494_v45 = vpack.c.bf16 %v1448_v40, %v1448_v40  ;;  %v1570_v46 = vpack.c.bf16 %v1466_v41, %v1466_v41  ;;  %v7304_v60 = vpack.c.bf16 %v1475_v57, %v1475_v57  ;;  %v2007_v39 = vpack.c.bf16 %v7281_v44, %v7281_v44  ;;  %v6117_v40 = vld [vmem:[%s8096_s18] sm:$0xff]   ;;  %s8099_s18 = sld [smem:[#allocation56_spill]] }
 0x29b   : > { %v1722_v61 = vpack.c.bf16 %v1493_v58, %v1493_v58  ;;  %v1865_v4 = vpack.c.bf16 %v1484_v3, %v1484_v3 }
 0x29c   : > { %5432 = vmatmul.mubr.msk.bf16.vlgmr.msra.gmra.mxu0 %vm1400_vm2, %v1494_v45  ;;  %5444 = vmatmul.mubr.msk.bf16.vlgmr.msra.gmra.mxu1 %vm1400_vm2, %v1570_v46  ;;  %v5081_v46 = vld [vmem:[#allocation23] ss:$0 sm:$0xff]  ;;  %s8098_s7 = smov %s8097_s15 }
 0x29d   : > { %5448 = vmatpush3.bf16.msra.mxu0 %v6098_v42  ;;  %5460 = vmatpush3.bf16.msra.mxu1 %v6099_v43  ;;  %v6119_v63 = vld [vmem:[%s8098_s7 + $0x10] sm:$0xff]   ;;  %v6120_v3 = vld [vmem:[%s8098_s7 + $0x8] sm:$0xff]  }
 0x29e   : > { %5449 = vmatprep.subr.bf16.mxu0 %v6827_v14  ;;  %5461 = vmatprep.subr.bf16.mxu1 %v6827_v14 }
 0x29f   : > { %5455 = vmatprep.mubr.msk.bf16.mxu0 %vm6828_vm3, %v6827_v14  ;;  %5467 = vmatprep.mubr.msk.bf16.mxu1 %vm6828_vm3, %v6827_v14 }
 0x2a0   : > { %s8100_s2 = smov %s8099_s18 }
 0x2a1   : > { %5450 = vmatpush3.bf16.msra.mxu0 %v6100_v47  ;;  %5462 = vmatpush3.bf16.msra.mxu1 %v6101_v48 }
 0x2a2   : > { %5451 = vmatprep.subr.bf16.mxu0 %v6827_v14  ;;  %5463 = vmatprep.subr.bf16.mxu1 %v6827_v14 }
 0x2a5   : > { %5452 = vmatpush3.bf16.msra.mxu0 %v6102_v51  ;;  %5464 = vmatpush3.bf16.msra.mxu1 %v6103_v52 }
 0x2a6   : > { %5453 = vmatprep.subr.bf16.mxu0 %v6827_v14  ;;  %5465 = vmatprep.subr.bf16.mxu1 %v6827_v14 }
 0x2a9   : > { %5454 = vmatpush3.bf16.msra.mxu0 %v6104_v55  ;;  %5466 = vmatpush3.bf16.msra.mxu1 %v6105_v56 }
 0x2aa   : > { %5479 = vmatprep.subr.bf16.mxu1 %v6827_v14  ;;  %5471 = vmatprep.subr.bf16.mxu0 %v6827_v14 }
 0x2ac   : > { %5456 = vmatmul.mubr.msk.bf16.vlgmr.msra.gmra.mxu0 %vm1400_vm2, %v7304_v60  ;;  %5468 = vmatmul.mubr.msk.bf16.vlgmr.msra.gmra.mxu1 %vm1400_vm2, %v1722_v61 }
 0x2ad   : > { %5480 = vmatpush3.bf16.msra.mxu1 %v6106_v59  ;;  %5487 = vmatprep.mubr.msk.bf16.mxu1 %vm6828_vm3, %v6827_v14  ;;  %v6118_v59 = vld [vmem:[%s8097_s15 + $0x18] sm:$0xff]   ;;  %s8101_s15 = sld [smem:[#allocation57_spill]] }
 0x2ae   : > { %5481 = vmatprep.subr.bf16.mxu1 %v6827_v14  ;;  %5475 = vmatprep.mubr.msk.bf16.mxu0 %vm6828_vm3, %v6827_v14 }
 0x2af   : > { %5472 = vmatpush3.bf16.msra.mxu0 %v6110_v5 }
 0x2b0   : > { %5473 = vmatprep.subr.bf16.mxu0 %v6827_v14 }
 0x2b1   : > { %5482 = vmatpush3.bf16.msra.mxu1 %v6107_v62 }
 0x2b2   : > { %5483 = vmatprep.subr.bf16.mxu1 %v6827_v14 }
 0x2b3   : > { %5474 = vmatpush3.bf16.msra.mxu0 %v6111_v6  ;;  %v6121_v6 = vld [vmem:[%s8098_s7] sm:$0xff]   ;;  %s8102_s3 = smov %s8101_s15 }
 0x2b4   : > { %5491 = vmatprep.subr.bf16.mxu0 %v6827_v14 }
 0x2b5   : > { %5484 = vmatpush3.bf16.msra.mxu1 %v6108_v0  ;;  %v5105_v0 = vld [vmem:[#allocation29] ss:$0 sm:$0xff] }
 0x2b6   : > { %5485 = vmatprep.subr.bf16.mxu1 %v6827_v14 }
 0x2b9   : > { %5486 = vmatpush3.bf16.msra.mxu1 %v6109_v2 }
 0x2ba   : > { %5509 = vmatprep.subr.bf16.mxu1 %v6827_v14 }
 0x2bc   : > { %5488 = vmatmul.mubr.msk.bf16.vlgmr.msra.gmra.mxu1 %vm1400_vm2, %v1865_v4 }
 0x2bd   : > { %5511 = vmatprep.mubr.msk.bf16.mxu1 %vm6828_vm3, %v6827_v14  ;;  %5510 = vmatpush3.bf16.msra.mxu1 %v6117_v40 }
 0x2be   : > { %5515 = vmatprep.subr.bf16.mxu1 %v6827_v14 }
 0x35c   : > { %v7330_v7 = vpop.f32.mrf.mxu0  ;;  %v7332_v8 = vpop.f32.mrf.mxu1 }
 0x35d   : > { %2499 = vst.msk [vmem:[#allocation2] sm:$0xff] %vm1400_vm2, %v7330_v7 }
 0x35e   : > { %v5433_v9 = vpop.f32.mrf.mxu0  ;;  %v5445_v10 = vpop.f32.mrf.mxu1 }
 0x35f   : > { %v6122_v9 = vld [vmem:[#allocation25] sm:$0xff]   ;;  %v5090_v10 = vld [vmem:[#allocation20] ss:$0 sm:$0xff] }
 0x360   : > { %v1567_v11 = vpop.f32.mrf.mxu0  ;;  %v1643_v12 = vpop.f32.mrf.mxu1 }
 0x362   : > { %v5434_v13 = vpop.f32.mrf.mxu0  ;;  %v5446_v15 = vpop.f32.mrf.mxu1 }
 0x36c   : > { %v7336_v16 = vpop.f32.mrf.mxu0  ;;  %v1792_v17 = vpop.f32.mrf.mxu1 }
 0x36d   : > { %v5072_v18 = vmul.f32 -1.442695, %v1792_v17 }
 0x36e   : > { %v5457_v19 = vpop.f32.mrf.mxu0  ;;  %v5469_v20 = vpop.f32.mrf.mxu1 }
 0x36f   : > { %6141 = vpow2.f32 %v5072_v18  ;;  %v6123_v20 = vld [vmem:[%s8099_s18 + $0x18] sm:$0xff]   ;;  %s8103_s18 = sld [smem:[#allocation54_spill]] }
 0x370   : > { %v1719_v21 = vpop.f32.mrf.mxu0  ;;  %v1795_v22 = vpop.f32.mrf.mxu1 }
 0x372   : > { %v5458_v23 = vpop.f32.mrf.mxu0  ;;  %v5470_v24 = vpop.f32.mrf.mxu1 }
 0x375   : > { %s8104_s6 = smov %s8103_s18 }
 0x37c   : > { %v6142_v25 = vpop.eup %6141  ;;  %v1935_v26 = vpop.f32.mrf.mxu1 }
 0x37d   : > { %v1801_v27 = vadd.f32 1.0, %v6142_v25  ;;  %v1941_v35 = vpack.c.bf16 %v1935_v26, %v1935_v26  ;;  %v6124_v25 = vld [vmem:[%s8100_s2 + $0x10] sm:$0xff]  }
 0x37e   : > { %v5489_v28 = vpop.f32.mrf.mxu1 }
 0x37f   : > { %6143 = vrcp.f32 %v1801_v27  ;;  %v5103_v27 = vld [vmem:[#allocation28] ss:$0 sm:$0xff]  ;;  %v6125_v28 = vld [vmem:[%s8100_s2 + $0x8] sm:$0xff]  }
 0x380   : > { %v1938_v29 = vpop.f32.mrf.mxu1 }
 0x382   : > { %v5490_v30 = vpop.f32.mrf.mxu1 }
 0x383   : > { %v5106_v30 = vld [vmem:[#allocation31] ss:$0 sm:$0xff] }
 0x38c   : > { %v6144_v31 = vpop.eup %6143 }
 0x38d   : > { %v1804_v33 = vpack.c.bf16 %v6144_v31, %v6144_v31  ;;  %v7389_v31 = vmul.f32 %v5103_v27, %v7332_v8 }
 0x38f   : > { %5476 = vmatmul.mubr.msk.bf16.vlgmr.msra.gmra.mxu0 %vm1821_vm6, %v1804_v33 }
 0x390   : > { %5492 = vmatpush3.bf16.msra.mxu0 %v6112_v32  ;;  %5493 = vmatprep.mubr.msk.bf16.mxu0 %vm6828_vm3, %v6827_v14  ;;  %v6126_v32 = vld [vmem:[%s8100_s2] sm:$0xff]  }
 0x391   : > { %5497 = vmatprep.subr.bf16.mxu0 %v6827_v14 }
 0x397   : > { %5494 = vmatmul.mubr.msk.bf16.vlgmr.msra.gmra.mxu0 %vm1957_vm7, %v1941_v35 }
 0x398   : > { %5498 = vmatpush3.bf16.msra.mxu0 %v6113_v34  ;;  %5505 = vmatprep.mubr.msk.bf16.mxu0 %vm6828_vm3, %v6827_v14  ;;  %v2312_v34 = vmul.f32 %v7389_v31, %v7389_v31 }
 0x399   : > { %5499 = vmatprep.subr.bf16.mxu0 %v6827_v14 }
 0x39c   : > { %5500 = vmatpush3.bf16.msra.mxu0 %v6114_v36 }
 0x39d   : > { %5501 = vmatprep.subr.bf16.mxu0 %v6827_v14 }
 0x3a0   : > { %5502 = vmatpush3.bf16.msra.mxu0 %v6115_v37 }
 0x3a1   : > { %5503 = vmatprep.subr.bf16.mxu0 %v6827_v14 }
 0x3a4   : > { %5504 = vmatpush3.bf16.msra.mxu0 %v6116_v38 }
 0x3a5   : > { %5527 = vmatprep.subr.bf16.mxu0 %v6827_v14 }
 0x3a7   : > { %5506 = vmatmul.mubr.msk.bf16.vlgmr.msra.gmra.mxu0 %vm1400_vm2, %v2007_v39  ;;  %v5099_v39 = vld [vmem:[#allocation26] ss:$0 sm:$0xff] }
 0x3a8   : > { %5529 = vmatprep.mubr.msk.bf16.mxu0 %vm6828_vm3, %v6827_v14  ;;  %5528 = vmatpush3.bf16.msra.mxu0 %v6122_v9 }
 0x3a9   : > { %5533 = vmatprep.subr.bf16.mxu0 %v6827_v14 }
 0x44f   : > { %v7359_v41 = vpop.f32.mrf.mxu0 }
 0x451   : > { %v5477_v42 = vpop.f32.mrf.mxu0 }
 0x453   : > { %v1862_v43 = vpop.f32.mrf.mxu0 }
 0x455   : > { %v5478_v45 = vpop.f32.mrf.mxu0 }
 0x457   : > { %v1995_v47 = vpop.f32.mrf.mxu0 }
 0x458   : > { %v1996_v44 = vadd.f32 %v5081_v46, %v1995_v47 }
 0x459   : > { %v5495_v48 = vpop.f32.mrf.mxu0 }
 0x45a   : > { %v5084_v49 = vmul.f32 -1.442695, %v1996_v44 }
 0x45b   : > { %v1998_v50 = vpop.f32.mrf.mxu0 }
 0x45c   : > { %6145 = vpow2.f32 %v5084_v49 }
 0x45d   : > { %v5496_v51 = vpop.f32.mrf.mxu0 }
 0x467   : > { %v2077_v52 = vpop.f32.mrf.mxu0 }
 0x468   : > { %6147 = vtanh.f32 %v2077_v52 }
 0x469   : > { %v6146_v53 = vpop.eup %6145  ;;  %v5507_v54 = vpop.f32.mrf.mxu0 }
 0x46a   : > { %v2004_v55 = vadd.f32 1.0, %v6146_v53  ;;  %v2308_v54 = vld [vmem:[%s7238_s0] sm:$0xff]  ;;  %s8105_s0 = sld [smem:[#allocation55_spill]] }
 0x46b   : > { %v2080_v56 = vpop.f32.mrf.mxu0 }
 0x46c   : > { %6149 = vrcp.f32 %v2004_v55 }
 0x46d   : > { %v5508_v57 = vpop.f32.mrf.mxu0 }
 0x46e   : > { %v2309_v57 = vsub.f32 %v2308_v54, %v7336_v16 }
 0x470   : > { %s8106_s7 = smov %s8105_s0 }
 0x475   : > { %v6148_v58 = vpop.eup %6147 }
 0x476   : > { %v2084_v61 = vpack.c.bf16 %v6148_v58, %v6148_v58 }
 0x478   : > { %5512 = vmatmul.mubr.msk.bf16.vlgmr.msra.gmra.mxu1 %vm1957_vm7, %v2084_v61 }
 0x479   : > { %v7363_v62 = vpop.eup %6149  ;;  %5516 = vmatpush3.bf16.msra.mxu1 %v6118_v59  ;;  %5523 = vmatprep.mubr.msk.bf16.mxu1 %vm6828_vm3, %v6827_v14 }
 0x47a   : > { %v5104_v1 = vadd.f32 -1.0, %v7363_v62  ;;  %5517 = vmatprep.subr.bf16.mxu1 %v6827_v14 }
 0x47c   : > { %v2305_v2 = vmul.f32 %v5105_v0, %v5104_v1 }
 0x47d   : > { %5518 = vmatpush3.bf16.msra.mxu1 %v6119_v63 }
 0x47e   : > { %5519 = vmatprep.subr.bf16.mxu1 %v6827_v14  ;;  %v2306_v4 = vadd.f32 1.0, %v2305_v2 }
 0x480   : > { %v2307_v5 = vmul.f32 %v2306_v4, %v7332_v8  ;;  %v2409_v8 = vld [vmem:[%s8101_s15] sm:$0x3]  ;;  %v7417_v4 = vld [vmem:[%s8104_s6 + $0x8] sm:$0xff]   ;;  %s8107_s15 = sld [smem:[#allocation65_spill]] }
 0x481   : > { %5520 = vmatpush3.bf16.msra.mxu1 %v6120_v3  ;;  %v7407_v3 = vld [vmem:[%s8103_s18 + $0x18] sm:$0xff]   ;;  %s6829_s18 = smov [#allocation36]  }
 0x482   : > { %5521 = vmatprep.subr.bf16.mxu1 %v6827_v14  ;;  %2501 = vst.msk [vmem:[#allocation4] sm:$0xff] %vm1400_vm2, %v2307_v5  ;;  %v2313_v29 = vmul.f32 %v2307_v5, %v7330_v7  ;;  %v7425_v5 = vld [vmem:[%s8104_s6] sm:$0xff]  }
 0x484   : > { %v2321_v33 = vmul.f32 %v5106_v30, %v2313_v29  ;;  %v7452_v30 = vld [vmem:[%s8106_s7 + $0x10] sm:$0xff] }
 0x485   : > { %5522 = vmatpush3.bf16.msra.mxu1 %v6121_v6 }
 0x486   : > { %v2322_v35 = vpack.c.bf16 %v2321_v33, %v2312_v34  ;;  %5545 = vmatprep.subr.msk.mxu1 %vm2417_vm8, %v2409_v8 }
 0x488   : > { %5524 = vmatmul.mubr.msk.bf16.vlgmr.msra.gmra.mxu1 %vm1400_vm2, %v7304_v60 }
 0x489   : > { %5546 = vmatpush3.msk.msra.mxu1 %vm2417_vm8, %v2409_v8 }
 0x48a   : > { %5550 = vmatprep.subr.bf16.mxu1 %v7407_v3 }
 0x538   : > { %v2137_v11 = vpop.f32.mrf.mxu1 }
 0x539   : > { %v2138_v12 = vadd.f32 %v5090_v10, %v2137_v11 }
 0x53a   : > { %v5513_v13 = vpop.f32.mrf.mxu1 }
 0x53b   : > { %v5093_v15 = vmul.f32 -1.442695, %v2138_v12  ;;  %v7443_v13 = vld [vmem:[%s8105_s0] sm:$0xff]  ;;  %s4695_s0 = sshll.u32 %s6829_s18, 4  ;;  %s4696_s0 = int_to_ptr.vmem [resolvable:$true] %s4695_s0 }
 0x53c   : > { %v2140_v17 = vpop.f32.mrf.mxu1  ;;  %p6625_p12 = scmp.lt.s32.totalorder %s4696_s0, %s4696_s0 }
 0x53d   : > { %6151 = vpow2.f32 %v5093_v15  ;;  %v7446_v15 = vld [vmem:[%s8106_s7 + $0x8] sm:$0xff] }
 0x53e   : > { %v5514_v18 = vpop.f32.mrf.mxu1 }
 0x53f   : > { %v2517_v18 = vld [vmem:[#allocation38] sm:$0xff] }
 0x548   : > { %v2218_v19 = vpop.f32.mrf.mxu1 }
 0x549   : > { %v2224_v21 = vpack.c.bf16 %v2218_v19, %v2218_v19  ;;  %v2518_v19 = vld [vmem:[#allocation38 + $0x8] sm:$0xff] }
 0x54a   : > { %v6152_v22 = vpop.eup %6151  ;;  %v5525_v23 = vpop.f32.mrf.mxu1 }
 0x54b   : > { %v2146_v60 = vadd.f32 1.0, %v6152_v22  ;;  %5530 = vmatmul.mubr.msk.bf16.vlgmr.msra.gmra.mxu0 %vm1957_vm7, %v2224_v21  ;;  %v2519_v21 = vld [vmem:[#allocation38 + $0x10] sm:$0xff]  ;;  %v2520_v22 = vld [vmem:[#allocation38 + $0x18] sm:$0xff] }
 0x54c   : > { %5534 = vmatpush3.bf16.msra.mxu0 %v6123_v20  ;;  %v2221_v24 = vpop.f32.mrf.mxu1  ;;  %5541 = vmatprep.mubr.msk.bf16.mxu0 %vm6828_vm3, %v6827_v14 }
 0x54d   : > { %6153 = vrcp.f32 %v2146_v60  ;;  %5535 = vmatprep.subr.bf16.mxu0 %v6827_v14 }
 0x54e   : > { %v5526_v26 = vpop.f32.mrf.mxu1 }
 0x550   : > { %5536 = vmatpush3.bf16.msra.mxu0 %v6124_v25 }
 0x551   : > { %5537 = vmatprep.subr.bf16.mxu0 %v6827_v14 }
 0x554   : > { %5538 = vmatpush3.bf16.msra.mxu0 %v6125_v28 }
 0x555   : > { %5539 = vmatprep.subr.bf16.mxu0 %v6827_v14 }
 0x558   : > { %5540 = vmatpush3.bf16.msra.mxu0 %v6126_v32 }
 0x559   : > { %5566 = vmatprep.subr.bf16.mxu0 %v7407_v3 }
 0x55a   : > { %v6154_v36 = vpop.eup %6153 }
 0x55b   : > { %v2149_v37 = vmul.f32 -0.606531, %v6154_v36  ;;  %5542 = vmatmul.mubr.msk.bf16.vlgmr.msra.gmra.mxu0 %vm1400_vm2, %v2322_v35 }
 0x55c   : > { %5567 = vmatpush3.bf16.msra.mxu0 %v7407_v3 }
 0x55d   : > { %v2150_v7 = vmul.f32 1.442695, %v2149_v37 }
 0x55f   : > { %6155 = vpow2.f32 %v2150_v7 }
 0x56c   : > { %v6156_v38 = vpop.eup %6155 }
 0x56d   : > { %2500 = vst.msk [vmem:[#allocation3] sm:$0xff] %vm1400_vm2, %v6156_v38 }
 0x574   : > { %v5125_v38 = vld [vmem:[#allocation3] ss:$0 sm:$0xff] }
 0x60b   : > { %v2277_v40 = vpop.f32.mrf.mxu0 }
 0x60c   : > { %v2278_v42 = vadd.f32 %v5099_v39, %v2277_v40 }
 0x60d   : > { %v5531_v43 = vpop.f32.mrf.mxu0 }
 0x60e   : > { %v5102_v45 = vmul.f32 -1.442695, %v2278_v42 }
 0x60f   : > { %v2280_v46 = vpop.f32.mrf.mxu0 }
 0x610   : > { %6157 = vpow2.f32 %v5102_v45  ;;  %v5127_v45 = vld [vmem:[#allocation4] ss:$0 sm:$0xff] }
 0x611   : > { %v5532_v47 = vpop.f32.mrf.mxu0 }
 0x612   : > { %v2652_v47 = vmul.f32 %v5125_v38, %v2517_v18 }
 0x61b   : > { %v2392_v44 = vpop.f32.mrf.mxu0 }
 0x61c   : > { %6159 = vrsqrt.f32 %v2392_v44  ;;  %vm2401_vm9 = vcmp.eq.f32.partialorder %v2392_v44, inf  ;;  %v2404_v56 = vand.u32 2147483648, %v2392_v44  ;;  %vm2403_vm10 = vcmp.eq.f32.partialorder %v2392_v44, 0.0 }
 0x61d   : > { %v6158_v48 = vpop.eup %6157  ;;  %v5543_v49 = vpop.f32.mrf.mxu0 }
 0x61e   : > { %v2286_v50 = vadd.f32 1.0, %v6158_v48 }
 0x61f   : > { %v2395_v51 = vpop.f32.mrf.mxu0 }
 0x620   : > { %6161 = vrcp.f32 %v2286_v50  ;;  %v2654_v50 = vmul.f32 %v5125_v38, %v2519_v21 }
 0x621   : > { %v5544_v52 = vpop.f32.mrf.mxu0 }
 0x629   : > { %v6160_v53 = vpop.eup %6159 }
 0x62a   : > { %v2400_v55 = vmul.f32 %v6160_v53, %v2392_v44 }
 0x62c   : > { %v2402_v58 = vsel %vm2401_vm9, %v2392_v44, %v2400_v55  ;;  %v2655_v44 = vmul.f32 %v5125_v38, %v2520_v22  ;;  %v2653_v55 = vmul.f32 %v5125_v38, %v2518_v19 }
 0x62d   : > { %v6162_v59 = vpop.eup %6161  ;;  %v2405_v61 = vsel %vm2403_vm10, %v2404_v56, %v2402_v58 }
 0x62e   : > { %v2310_v63 = vmul.f32 %v6162_v59, %v2309_v57  ;;  %v2406_v0 = vadd.f32 1e-12, %v2405_v61 }
 0x630   : > { %v2311_v1 = vadd.f32 %v2310_v63, %v7336_v16  ;;  %6163 = vrcp.f32 %v2406_v0  ;;  %v7414_v16 = vld [vmem:[%s8104_s6 + $0x10] sm:$0xff]  }
 0x631   : > { %5568 = vmatprep.subr.bf16.mxu0 %v7414_v16 }
 0x632   : > { %2502 = vst.msk [vmem:[#allocation5] sm:$0xff] %vm1400_vm2, %v2311_v1  ;;  %5569 = vmatpush3.bf16.msra.mxu0 %v7414_v16 }
 0x633   : > { %5570 = vmatprep.subr.bf16.mxu0 %v7417_v4 }
 0x636   : > { %5571 = vmatpush3.bf16.msra.mxu0 %v7417_v4 }
 0x637   : > { %5572 = vmatprep.subr.bf16.mxu0 %v7425_v5 }
 0x639   : > { %v5116_v17 = vld [vmem:[#allocation5] ss:$0 sm:$0xff]  ;;  %v5132_v1 = vld [vmem:[#allocation5 + $0x1] ss:$0 sm:$0xff] }
 0x63a   : > { %5573 = vmatpush3.bf16.msra.mxu0 %v7425_v5  ;;  %v2539_v23 = vmul.f32 %v5116_v17, %v7443_v13  ;;  %v2541_v32 = vmul.f32 %v5116_v17, %v7452_v30 }
 0x63b   : > { %5594 = vmatprep.subr.bf16.mxu0 %v7407_v3 }
 0x63d   : > { %v6164_v2 = vpop.eup %6163 }
 0x63e   : > { %5547 = vmatprep.mubr.msk.f32.mxu1 %vm2410_vm11, %v6164_v2 }
 0x63f   : > { %5548 = vmatmul.mubr.msk.f32.vlgmr.msra.gmra.mxu1 %vm2410_vm11, %v2395_v51 }
 0x640   : > { %5551 = vmatpush3.bf16.msra.mxu1 %v7407_v3 }
 0x641   : > { %5552 = vmatprep.subr.bf16.mxu1 %v7414_v16 }
 0x644   : > { %5553 = vmatpush3.bf16.msra.mxu1 %v7414_v16 }
 0x645   : > { %5554 = vmatprep.subr.bf16.mxu1 %v7417_v4 }
 0x648   : > { %5555 = vmatpush3.bf16.msra.mxu1 %v7417_v4 }
 0x649   : > { %5556 = vmatprep.subr.bf16.mxu1 %v7425_v5 }
 0x64c   : > { %5557 = vmatpush3.bf16.msra.mxu1 %v7425_v5 }
 0x64d   : > { %5578 = vmatprep.subr.bf16.mxu1 %v7407_v3 }
 0x6ff   : > { %v7436_v6 = vpop.f32.mrf.mxu1 }
 0x701   : > { %v2487_v9 = vpop.f32.mrf.mxu1 }
 0x702   : > { %v2496_v10 = vmul.f32 %v2487_v9, %v7389_v31  ;;  %v7455_v31 = vld [vmem:[%s8106_s7 + $0x18] sm:$0xff]  ;;  %v5128_v9 = vld [vmem:[#allocation2] ss:$0 sm:$0xff] }
 0x703   : > { %v2542_v33 = vmul.f32 %v5116_v17, %v7455_v31 }
 0x704   : > { %v2497_v11 = vmul.f32 %v7363_v62, %v2496_v10  ;;  %v2498_v12 = vsub.f32 0.0, %v2496_v10  ;;  %v2540_v62 = vmul.f32 %v5116_v17, %v7446_v15 }
 0x705   : > { %v2546_v34 = vpack.c.bf16 %v2542_v33, %v2541_v32  ;;  %v2785_v32 = vmul.f32 %v5132_v1, %v7455_v31 }
 0x706   : > { %2503 = vst.msk [vmem:[#allocation6] sm:$0xff] %vm1400_vm2, %v2498_v12  ;;  %2504 = vst.msk [vmem:[#allocation7] sm:$0xff] %vm1400_vm2, %v2497_v11  ;;  %v2545_v29 = vpack.c.bf16 %v2540_v62, %v2539_v23 }
 0x70d   : > { %v5115_v20 = vld [vmem:[#allocation6] ss:$0 sm:$0xff]  ;;  %v5126_v8 = vld [vmem:[#allocation7] ss:$0 sm:$0xff]  ;;  %v5131_v10 = vld [vmem:[#allocation6 + $0x1] ss:$0 sm:$0xff] }
 0x70e   : > { %v2531_v60 = vmul.f32 %v5115_v20, %v2517_v18  ;;  %v2532_v24 = vmul.f32 %v5115_v20, %v2518_v19  ;;  %v2533_v25 = vmul.f32 %v5115_v20, %v2519_v21  ;;  %v2534_v26 = vmul.f32 %v5115_v20, %v2520_v22 }
 0x70f   : > { %v2782_v18 = vmul.f32 %v5132_v1, %v7443_v13  ;;  %v2783_v19 = vmul.f32 %v5132_v1, %v7446_v15 }
 0x710   : > { %v2543_v27 = vpack.c.bf16 %v2532_v24, %v2531_v60  ;;  %v2544_v28 = vpack.c.bf16 %v2534_v26, %v2533_v25 }
 0x712   : > { %5558 = vmatprep.mubr.msk.bf16.mxu1 %vm1400_vm2, %v2543_v27 }
 0x713   : > { %5559 = vmatmul.mubr.msk.bf16.vlgmr.msra.gmra.mxu1 %vm1400_vm2, %v2544_v28  ;;  %v2788_v28 = vpack.c.bf16 %v2783_v19, %v2782_v18 }
 0x714   : > { %5562 = vmatprep.mubr.msk.bf16.mxu1 %vm1400_vm2, %v2545_v29  ;;  %5579 = vmatpush3.bf16.msra.mxu1 %v7407_v3  ;;  %v2784_v29 = vmul.f32 %v5132_v1, %v7452_v30 }
 0x715   : > { %5580 = vmatprep.subr.bf16.mxu1 %v7414_v16 }
 0x716   : > { %v2789_v33 = vpack.c.bf16 %v2785_v32, %v2784_v29  ;;  %v5143_v29 = vld [vmem:[#allocation6 + $0x2] ss:$0 sm:$0xff] }
 0x718   : > { %5581 = vmatpush3.bf16.msra.mxu1 %v7414_v16 }
 0x719   : > { %5582 = vmatprep.subr.bf16.mxu1 %v7417_v4 }
 0x71b   : > { %5563 = vmatmul.mubr.msk.bf16.gmra.mxu1 %vm1400_vm2, %v2546_v34 }
 0x71c   : > { %5583 = vmatpush3.bf16.msra.mxu1 %v7417_v4 }
 0x71d   : > { %5584 = vmatprep.subr.bf16.mxu1 %v7425_v5 }
 0x720   : > { %5585 = vmatpush3.bf16.msra.mxu1 %v7425_v5 }
 0x721   : > { %5606 = vmatprep.subr.bf16.mxu1 %v7407_v3 }
 0x7d3   : > { %v5560_v35 = vpop.f32.mrf.mxu1 }
 0x7d4   : > { %v2662_v43 = vmul.f32 %v5560_v35, %v5126_v8 }
 0x7d5   : > { %v2617_v36 = vpop.f32.mrf.mxu1 }
 0x7d6   : > { %v2660_v40 = vmul.f32 %v5126_v8, %v2617_v36  ;;  %v2666_v57 = vadd.f32 %v2662_v43, %v2654_v50  ;;  %v5139_v50 = vld [vmem:[#allocation4 + $0x1] ss:$0 sm:$0xff] }
 0x7d7   : > { %v5561_v37 = vpop.f32.mrf.mxu1 }
 0x7d8   : > { %v2663_v42 = vmul.f32 %v5561_v37, %v5126_v8  ;;  %v2664_v53 = vadd.f32 %v2660_v40, %v2652_v47 }
 0x7d9   : > { %v2620_v7 = vpop.f32.mrf.mxu1 }
 0x7da   : > { %v2661_v48 = vmul.f32 %v5126_v8, %v2620_v7  ;;  %v2667_v54 = vadd.f32 %v2663_v42, %v2655_v44 }
 0x7db   : > { %v5564_v39 = vpop.f32.mrf.mxu1 }
 0x7dc   : > { %v2674_v51 = vmul.f32 %v5564_v39, %v5127_v45  ;;  %v2665_v59 = vadd.f32 %v2661_v48, %v2653_v55  ;;  %v5138_v39 = vld [vmem:[#allocation7 + $0x1] ss:$0 sm:$0xff] }
 0x7dd   : > { %v2633_v46 = vpop.f32.mrf.mxu1 }
 0x7de   : > { %v2672_v49 = vmul.f32 %v5127_v45, %v2633_v46  ;;  %v2678_v2 = vadd.f32 %v2674_v51, %v2666_v57  ;;  %v5137_v46 = vld [vmem:[#allocation3 + $0x1] ss:$0 sm:$0xff] }
 0x7df   : > { %v5565_v52 = vpop.f32.mrf.mxu1 }
 0x7e0   : > { %v2675_v56 = vmul.f32 %v5565_v52, %v5127_v45  ;;  %v7470_v61 = vadd.f32 %v2672_v49, %v2664_v53  ;;  %v2686_v62 = vmul.f32 %v5128_v9, %v2678_v2  ;;  %v2776_v60 = vmul.f32 %v5131_v10, %v2678_v2 }
 0x7e1   : > { %v2636_v58 = vpop.f32.mrf.mxu1  ;;  %v2873_v44 = vmul.f32 %v5137_v46, %v2678_v2 }
 0x7e2   : > { %v7472_v63 = vadd.f32 %v2675_v56, %v2667_v54  ;;  %v2673_v0 = vmul.f32 %v5127_v45, %v2636_v58  ;;  %v2684_v20 = vmul.f32 %v5128_v9, %v7470_v61  ;;  %v2774_v21 = vmul.f32 %v5131_v10, %v7470_v61 }
 0x7e3   : > { %v2871_v57 = vmul.f32 %v5137_v46, %v7470_v61  ;;  %v5144_v61 = vld [vmem:[#allocation5 + $0x2] ss:$0 sm:$0xff] }
 0x7e4   : > { %v7474_v11 = vadd.f32 %v2673_v0, %v2665_v59  ;;  %v2687_v12 = vmul.f32 %v5128_v9, %v7472_v63  ;;  %v2777_v17 = vmul.f32 %v5131_v10, %v7472_v63  ;;  %v2874_v1 = vmul.f32 %v5137_v46, %v7472_v63  ;;  %v5140_v63 = vld [vmem:[#allocation2 + $0x1] ss:$0 sm:$0xff] }
 0x7e5   : > { %v3000_v32 = vmul.f32 %v5144_v61, %v7443_v13 }
 0x7e6   : > { %v2685_v22 = vmul.f32 %v5128_v9, %v7474_v11  ;;  %v2775_v23 = vmul.f32 %v5131_v10, %v7474_v11  ;;  %v2689_v26 = vpack.c.bf16 %v2687_v12, %v2686_v62  ;;  %v2787_v27 = vpack.c.bf16 %v2777_v17, %v2776_v60 }
 0x7e8   : > { %v2688_v24 = vpack.c.bf16 %v2685_v22, %v2684_v20  ;;  %v2786_v25 = vpack.c.bf16 %v2775_v23, %v2774_v21  ;;  %v2872_v21 = vmul.f32 %v5137_v46, %v7474_v11 }
 0x7ea   : > { %5574 = vmatprep.mubr.msk.bf16.mxu0 %vm1400_vm2, %v2688_v24  ;;  %5586 = vmatprep.mubr.msk.bf16.mxu1 %vm1400_vm2, %v2786_v25 }
 0x7eb   : > { %5575 = vmatmul.mubr.msk.bf16.vlgmr.msra.gmra.mxu0 %vm1400_vm2, %v2689_v26  ;;  %5587 = vmatmul.mubr.msk.bf16.vlgmr.msra.gmra.mxu1 %vm1400_vm2, %v2787_v27 }
 0x7ec   : > { %5590 = vmatprep.mubr.msk.bf16.mxu1 %vm1400_vm2, %v2788_v28  ;;  %5607 = vmatpush3.bf16.msra.mxu1 %v7407_v3 }
 0x7ed   : > { %5595 = vmatpush3.bf16.msra.mxu0 %v7407_v3  ;;  %5608 = vmatprep.subr.bf16.mxu1 %v7414_v16 }
 0x7ee   : > { %5596 = vmatprep.subr.bf16.mxu0 %v7414_v16 }
 0x7f0   : > { %5609 = vmatpush3.bf16.msra.mxu1 %v7414_v16 }
 0x7f1   : > { %5597 = vmatpush3.bf16.msra.mxu0 %v7414_v16  ;;  %5610 = vmatprep.subr.bf16.mxu1 %v7417_v4 }
 0x7f2   : > { %5598 = vmatprep.subr.bf16.mxu0 %v7417_v4 }
 0x7f3   : > { %5591 = vmatmul.mubr.msk.bf16.gmra.mxu1 %vm1400_vm2, %v2789_v33 }
 0x7f4   : > { %5611 = vmatpush3.bf16.msra.mxu1 %v7417_v4 }
 0x7f5   : > { %5599 = vmatpush3.bf16.msra.mxu0 %v7417_v4  ;;  %5612 = vmatprep.subr.bf16.mxu1 %v7425_v5 }
 0x7f6   : > { %5600 = vmatprep.subr.bf16.mxu0 %v7425_v5 }
 0x7f8   : > { %5613 = vmatpush3.bf16.msra.mxu1 %v7425_v5 }
 0x7f9   : > { %5601 = vmatpush3.bf16.msra.mxu0 %v7425_v5  ;;  %5634 = vmatprep.subr.bf16.mxu1 %v7407_v3 }
 0x7fa   : > { %5622 = vmatprep.subr.bf16.mxu0 %v7407_v3 }
 0x8ab   : > { %v5576_v34 = vpop.f32.mrf.mxu0  ;;  %v5588_v35 = vpop.f32.mrf.mxu1 }
 0x8ac   : > { %v2881_v40 = vmul.f32 %v5588_v35, %v5138_v39  ;;  %v2747_v45 = vmul.f32 %v5576_v34, %v7452_v30 }
 0x8ad   : > { %v2730_v36 = vpop.f32.mrf.mxu0  ;;  %v2836_v37 = vpop.f32.mrf.mxu1 }
 0x8ae   : > { %v2745_v7 = vmul.f32 %v2730_v36, %v7443_v13  ;;  %v2879_v49 = vmul.f32 %v5138_v39, %v2836_v37  ;;  %v2885_v56 = vadd.f32 %v2881_v40, %v2873_v44  ;;  %v2752_v0 = vsel %vm1400_vm2, %v2747_v45, 0.0 }
 0x8af   : > { %v5577_v38 = vpop.f32.mrf.mxu0  ;;  %v5589_v8 = vpop.f32.mrf.mxu1 }
 0x8b0   : > { %v2749_v48 = vsel %vm1400_vm2, %v2745_v7, 0.0  ;;  %v2748_v52 = vmul.f32 %v5577_v38, %v7455_v31  ;;  %v2882_v53 = vmul.f32 %v5589_v8, %v5138_v39  ;;  %v2883_v10 = vadd.f32 %v2879_v49, %v2871_v57 }
 0x8b1   : > { %v2733_v42 = vpop.f32.mrf.mxu0  ;;  %v2839_v43 = vpop.f32.mrf.mxu1  ;;  %v3001_v38 = vmul.f32 %v5144_v61, %v7446_v15 }
 0x8b2   : > { %v2746_v47 = vmul.f32 %v2733_v42, %v7446_v15  ;;  %v2880_v2 = vmul.f32 %v5138_v39, %v2839_v43  ;;  %v2754_v19 = vsel %vm1400_vm2, %v2748_v52, 0.0  ;;  %v2886_v20 = vadd.f32 %v2882_v53, %v2874_v1 }
 0x8b3   : > { %v5592_v51 = vpop.f32.mrf.mxu1  ;;  %v3006_v44 = vpack.c.bf16 %v3001_v38, %v3000_v32 }
 0x8b4   : > { %v2750_v54 = vsel %vm1400_vm2, %v2746_v47, 0.0  ;;  %v2893_v55 = vmul.f32 %v5592_v51, %v5139_v50  ;;  %v2884_v24 = vadd.f32 %v2880_v2, %v2872_v21  ;;  %v3003_v51 = vmul.f32 %v5144_v61, %v7455_v31 }
 0x8b5   : > { %v2751_v58 = vadd.f32 %v2750_v54, %v2749_v48  ;;  %v2852_v59 = vpop.f32.mrf.mxu1 }
 0x8b6   : > { %v2891_v9 = vmul.f32 %v5139_v50, %v2852_v59  ;;  %v7517_v17 = vadd.f32 %v2893_v55, %v2885_v56 }
 0x8b7   : > { %v2753_v12 = vadd.f32 %v2752_v0, %v2751_v58  ;;  %v5593_v18 = vpop.f32.mrf.mxu1  ;;  %v5150_v0 = vld [vmem:[#allocation7 + $0x2] ss:$0 sm:$0xff] }
 0x8b8   : > { %v2894_v22 = vmul.f32 %v5593_v18, %v5139_v50  ;;  %v7521_v62 = vadd.f32 %v2891_v9, %v2883_v10  ;;  %v2905_v28 = vmul.f32 %v5140_v63, %v7517_v17  ;;  %v2994_v33 = vmul.f32 %v5143_v29, %v7517_v17 }
 0x8b9   : > { %v2755_v23 = vadd.f32 %v2754_v19, %v2753_v12  ;;  %v2855_v60 = vpop.f32.mrf.mxu1  ;;  %v5149_v12 = vld [vmem:[#allocation3 + $0x2] ss:$0 sm:$0xff] }
 0x8ba   : > { %v7523_v25 = vadd.f32 %v2894_v22, %v2886_v20  ;;  %v2892_v26 = vmul.f32 %v5139_v50, %v2855_v60  ;;  %v2903_v37 = vmul.f32 %v5140_v63, %v7521_v62  ;;  %v2992_v7 = vmul.f32 %v5143_v29, %v7521_v62  ;;  %v5151_v22 = vld [vmem:[#allocation4 + $0x2] ss:$0 sm:$0xff] }
 0x8bb   : > { %v2756_v27 = vrot.slane %v2755_v23, 4  ;;  %v3002_v50 = vmul.f32 %v5144_v61, %v7452_v30  ;;  %v3091_v19 = vmul.f32 %v5149_v12, %v7517_v17 }
 0x8bc   : > { %v2906_v11 = vmul.f32 %v5140_v63, %v7523_v25  ;;  %v2995_v34 = vmul.f32 %v5143_v29, %v7523_v25  ;;  %v7530_v35 = vadd.f32 %v2892_v26, %v2884_v24  ;;  %v3092_v17 = vmul.f32 %v5149_v12, %v7523_v25  ;;  %v5152_v25 = vld [vmem:[#allocation2 + $0x2] ss:$0 sm:$0xff] }
 0x8bd   : > { %v2757_v36 = vadd.f32 %v2756_v27, %v2755_v23  ;;  %v3007_v52 = vpack.c.bf16 %v3003_v51, %v3002_v50  ;;  %v3089_v27 = vmul.f32 %v5149_v12, %v7521_v62  ;;  %v5156_v62 = vld [vmem:[#allocation5 + $0x3] ss:$0 sm:$0xff]  ;;  %v5155_v50 = vld [vmem:[#allocation6 + $0x3] ss:$0 sm:$0xff] }
 0x8be   : > { %v2908_v8 = vpack.c.bf16 %v2906_v11, %v2905_v28  ;;  %v3005_v39 = vpack.c.bf16 %v2995_v34, %v2994_v33  ;;  %v2904_v40 = vmul.f32 %v5140_v63, %v7530_v35  ;;  %v2993_v42 = vmul.f32 %v5143_v29, %v7530_v35 }
 0x8bf   : > { %v2758_v43 = vrot.slane %v2757_v36, 2  ;;  %v3218_v51 = vmul.f32 %v5156_v62, %v7443_v13 }
 0x8c0   : > { %v2907_v45 = vpack.c.bf16 %v2904_v40, %v2903_v37  ;;  %v3004_v46 = vpack.c.bf16 %v2993_v42, %v2992_v7 }
 0x8c1   : > { %v2759_v47 = vadd.f32 %v2758_v43, %v2757_v36 }
 0x8c2   : > { %5602 = vmatprep.mubr.msk.bf16.mxu0 %vm1400_vm2, %v2907_v45  ;;  %5614 = vmatprep.mubr.msk.bf16.mxu1 %vm1400_vm2, %v3004_v46 }
 0x8c3   : > { %v2760_v48 = vrot.slane %v2759_v47, 1  ;;  %5603 = vmatmul.mubr.msk.bf16.vlgmr.msra.gmra.mxu0 %vm1400_vm2, %v2908_v8  ;;  %5615 = vmatmul.mubr.msk.bf16.vlgmr.msra.gmra.mxu1 %vm1400_vm2, %v3005_v39  ;;  %v3090_v39 = vmul.f32 %v5149_v12, %v7530_v35 }
 0x8c4   : > { %5618 = vmatprep.mubr.msk.bf16.mxu1 %vm1400_vm2, %v3006_v44  ;;  %5635 = vmatpush3.bf16.msra.mxu1 %v7407_v3 }
 0x8c5   : > { %v2761_v49 = vadd.f32 %v2760_v48, %v2759_v47  ;;  %5623 = vmatpush3.bf16.msra.mxu0 %v7407_v3  ;;  %5636 = vmatprep.subr.bf16.mxu1 %v7414_v16 }
 0x8c6   : > { %5624 = vmatprep.subr.bf16.mxu0 %v7414_v16 }
 0x8c7   : > { %2763 = vst.msk [vmem:[#allocation2] sm:$0x1] %vm2762_vm12, %v2761_v49 }
 0x8c8   : > { %5637 = vmatpush3.bf16.msra.mxu1 %v7414_v16 }
 0x8c9   : > { %5625 = vmatpush3.bf16.msra.mxu0 %v7414_v16  ;;  %5638 = vmatprep.subr.bf16.mxu1 %v7417_v4 }
 0x8ca   : > { %5626 = vmatprep.subr.bf16.mxu0 %v7417_v4 }
 0x8cb   : > { %5619 = vmatmul.mubr.msk.bf16.gmra.mxu1 %vm1400_vm2, %v3007_v52 }
 0x8cc   : > { %5639 = vmatpush3.bf16.msra.mxu1 %v7417_v4 }
 0x8cd   : > { %5627 = vmatpush3.bf16.msra.mxu0 %v7417_v4  ;;  %5640 = vmatprep.subr.bf16.mxu1 %v7425_v5 }
 0x8ce   : > { %5628 = vmatprep.subr.bf16.mxu0 %v7425_v5 }
 0x8d0   : > { %5641 = vmatpush3.bf16.msra.mxu1 %v7425_v5 }
 0x8d1   : > { %5629 = vmatpush3.bf16.msra.mxu0 %v7425_v5  ;;  %5662 = vmatprep.subr.bf16.mxu1 %v7407_v3 }
 0x8d2   : > { %5650 = vmatprep.subr.bf16.mxu0 %v7407_v3 }
 0x983   : > { %v5604_v53 = vpop.f32.mrf.mxu0  ;;  %v5616_v54 = vpop.f32.mrf.mxu1 }
 0x984   : > { %v3099_v1 = vmul.f32 %v5616_v54, %v5150_v0  ;;  %v2966_v10 = vmul.f32 %v5604_v53, %v7452_v30 }
 0x985   : > { %v2949_v55 = vpop.f32.mrf.mxu0  ;;  %v3054_v56 = vpop.f32.mrf.mxu1 }
 0x986   : > { %v2964_v57 = vmul.f32 %v2949_v55, %v7443_v13  ;;  %v3097_v21 = vmul.f32 %v5150_v0, %v3054_v56  ;;  %v3103_v26 = vadd.f32 %v3099_v1, %v3091_v19  ;;  %v2971_v32 = vsel %vm1400_vm2, %v2966_v10, 0.0 }
 0x987   : > { %v5605_v58 = vpop.f32.mrf.mxu0  ;;  %v5617_v59 = vpop.f32.mrf.mxu1 }
 0x988   : > { %v2968_v20 = vsel %vm1400_vm2, %v2964_v57, 0.0  ;;  %v2967_v23 = vmul.f32 %v5605_v58, %v7455_v31  ;;  %v3100_v60 = vmul.f32 %v5617_v59, %v5150_v0  ;;  %v3101_v34 = vadd.f32 %v3097_v21, %v3089_v27 }
 0x989   : > { %v2952_v2 = vpop.f32.mrf.mxu0  ;;  %v3057_v9 = vpop.f32.mrf.mxu1  ;;  %v3219_v58 = vmul.f32 %v5156_v62, %v7446_v15 }
 0x98a   : > { %v2965_v18 = vmul.f32 %v2952_v2, %v7446_v15  ;;  %v3098_v33 = vmul.f32 %v5150_v0, %v3057_v9  ;;  %v2973_v38 = vsel %vm1400_vm2, %v2967_v23, 0.0  ;;  %v3104_v8 = vadd.f32 %v3100_v60, %v3092_v17 }
 0x98b   : > { %v5620_v61 = vpop.f32.mrf.mxu1  ;;  %v3224_v19 = vpack.c.bf16 %v3219_v58, %v3218_v51 }
 0x98c   : > { %v2969_v24 = vsel %vm1400_vm2, %v2965_v18, 0.0  ;;  %v3111_v63 = vmul.f32 %v5620_v61, %v5151_v22  ;;  %v3102_v46 = vadd.f32 %v3098_v33, %v3090_v39  ;;  %v3221_v61 = vmul.f32 %v5156_v62, %v7455_v31 }
 0x98d   : > { %v2970_v28 = vadd.f32 %v2969_v24, %v2968_v20  ;;  %v3070_v29 = vpop.f32.mrf.mxu1 }
 0x98e   : > { %v3109_v11 = vmul.f32 %v5151_v22, %v3070_v29  ;;  %v7572_v37 = vadd.f32 %v3111_v63, %v3103_v26 }
 0x98f   : > { %v2972_v36 = vadd.f32 %v2971_v32, %v2970_v28  ;;  %v5621_v7 = vpop.f32.mrf.mxu1  ;;  %v5162_v32 = vld [vmem:[#allocation7 + $0x3] ss:$0 sm:$0xff] }
 0x990   : > { %v3112_v40 = vmul.f32 %v5621_v7, %v5151_v22  ;;  %v7576_v43 = vadd.f32 %v3109_v11, %v3101_v34  ;;  %v3123_v49 = vmul.f32 %v5152_v25, %v7572_v37  ;;  %v3212_v52 = vmul.f32 %v5155_v50, %v7572_v37 }
 0x991   : > { %v2974_v42 = vadd.f32 %v2973_v38, %v2972_v36  ;;  %v3073_v45 = vpop.f32.mrf.mxu1  ;;  %v5161_v36 = vld [vmem:[#allocation3 + $0x3] ss:$0 sm:$0xff] }
 0x992   : > { %v7578_v47 = vadd.f32 %v3112_v40, %v3104_v8  ;;  %v3110_v44 = vmul.f32 %v5151_v22, %v3073_v45  ;;  %v3121_v56 = vmul.f32 %v5152_v25, %v7576_v43  ;;  %v3210_v57 = vmul.f32 %v5155_v50, %v7576_v43  ;;  %v5163_v40 = vld [vmem:[#allocation4 + $0x3] ss:$0 sm:$0xff] }
 0x993   : > { %v2975_v48 = vrot.slane %v2974_v42, 4  ;;  %v3220_v22 = vmul.f32 %v5156_v62, %v7452_v30  ;;  %v3309_v38 = vmul.f32 %v5161_v36, %v7572_v37 }
 0x994   : > { %v3124_v35 = vmul.f32 %v5152_v25, %v7578_v47  ;;  %v3213_v53 = vmul.f32 %v5155_v50, %v7578_v47  ;;  %v7585_v54 = vadd.f32 %v3110_v44, %v3102_v46  ;;  %v3310_v37 = vmul.f32 %v5161_v36, %v7578_v47  ;;  %v5164_v47 = vld [vmem:[#allocation2 + $0x3] ss:$0 sm:$0xff] }
 0x995   : > { %v2976_v55 = vadd.f32 %v2975_v48, %v2974_v42  ;;  %v3225_v23 = vpack.c.bf16 %v3221_v61, %v3220_v22  ;;  %v3307_v48 = vmul.f32 %v5161_v36, %v7576_v43  ;;  %v5168_v43 = vld [vmem:[#allocation5 + $0x4] ss:$0 sm:$0xff]  ;;  %v5167_v22 = vld [vmem:[#allocation6 + $0x4] ss:$0 sm:$0xff] }
 0x996   : > { %v3126_v59 = vpack.c.bf16 %v3124_v35, %v3123_v49  ;;  %v3223_v0 = vpack.c.bf16 %v3213_v53, %v3212_v52  ;;  %v3122_v1 = vmul.f32 %v5152_v25, %v7585_v54  ;;  %v3211_v2 = vmul.f32 %v5155_v50, %v7585_v54 }
 0x997   : > { %v2977_v9 = vrot.slane %v2976_v55, 2  ;;  %v3436_v61 = vmul.f32 %v5168_v43, %v7443_v13 }
 0x998   : > { %v3125_v10 = vpack.c.bf16 %v3122_v1, %v3121_v56  ;;  %v3222_v12 = vpack.c.bf16 %v3211_v2, %v3210_v57 }
 0x999   : > { %v2978_v18 = vadd.f32 %v2977_v9, %v2976_v55 }
 0x99a   : > { %5630 = vmatprep.mubr.msk.bf16.mxu0 %vm1400_vm2, %v3125_v10  ;;  %5642 = vmatprep.mubr.msk.bf16.mxu1 %vm1400_vm2, %v3222_v12 }
 0x99b   : > { %v2979_v20 = vrot.slane %v2978_v18, 1  ;;  %5631 = vmatmul.mubr.msk.bf16.vlgmr.msra.gmra.mxu0 %vm1400_vm2, %v3126_v59  ;;  %5643 = vmatmul.mubr.msk.bf16.vlgmr.msra.gmra.mxu1 %vm1400_vm2, %v3223_v0  ;;  %v3308_v0 = vmul.f32 %v5161_v36, %v7585_v54 }
 0x99c   : > { %5646 = vmatprep.mubr.msk.bf16.mxu1 %vm1400_vm2, %v3224_v19  ;;  %5663 = vmatpush3.bf16.msra.mxu1 %v7407_v3 }
 0x99d   : > { %v2980_v21 = vadd.f32 %v2979_v20, %v2978_v18  ;;  %5651 = vmatpush3.bf16.msra.mxu0 %v7407_v3  ;;  %5664 = vmatprep.subr.bf16.mxu1 %v7414_v16 }
 0x99e   : > { %5652 = vmatprep.subr.bf16.mxu0 %v7414_v16 }
 0x99f   : > { %2981 = vst.msk [vmem:[#allocation2 + $0x1] sm:$0x1] %vm2762_vm12, %v2980_v21 }
 0x9a0   : > { %5665 = vmatpush3.bf16.msra.mxu1 %v7414_v16 }
 0x9a1   : > { %5653 = vmatpush3.bf16.msra.mxu0 %v7414_v16  ;;  %5666 = vmatprep.subr.bf16.mxu1 %v7417_v4 }
 0x9a2   : > { %5654 = vmatprep.subr.bf16.mxu0 %v7417_v4 }
 0x9a3   : > { %5647 = vmatmul.mubr.msk.bf16.gmra.mxu1 %vm1400_vm2, %v3225_v23 }
 0x9a4   : > { %5667 = vmatpush3.bf16.msra.mxu1 %v7417_v4 }
 0x9a5   : > { %5655 = vmatpush3.bf16.msra.mxu0 %v7417_v4  ;;  %5668 = vmatprep.subr.bf16.mxu1 %v7425_v5 }
 0x9a6   : > { %5656 = vmatprep.subr.bf16.mxu0 %v7425_v5 }
 0x9a8   : > { %5669 = vmatpush3.bf16.msra.mxu1 %v7425_v5 }
 0x9a9   : > { %5657 = vmatpush3.bf16.msra.mxu0 %v7425_v5  ;;  %5690 = vmatprep.subr.bf16.mxu1 %v7407_v3 }
 0x9aa   : > { %5678 = vmatprep.subr.bf16.mxu0 %v7407_v3 }
 0xa5b   : > { %v5632_v60 = vpop.f32.mrf.mxu0  ;;  %v5644_v24 = vpop.f32.mrf.mxu1 }
 0xa5c   : > { %v3317_v17 = vmul.f32 %v5644_v24, %v5162_v32  ;;  %v3184_v34 = vmul.f32 %v5632_v60, %v7452_v30 }
 0xa5d   : > { %v3167_v63 = vpop.f32.mrf.mxu0  ;;  %v3272_v26 = vpop.f32.mrf.mxu1 }
 0xa5e   : > { %v3182_v27 = vmul.f32 %v3167_v63, %v7443_v13  ;;  %v3315_v39 = vmul.f32 %v5162_v32, %v3272_v26  ;;  %v3321_v44 = vadd.f32 %v3317_v17, %v3309_v38  ;;  %v3189_v51 = vsel %vm1400_vm2, %v3184_v34, 0.0 }
 0xa5f   : > { %v5633_v28 = vpop.f32.mrf.mxu0  ;;  %v5645_v29 = vpop.f32.mrf.mxu1 }
 0xa60   : > { %v3186_v8 = vsel %vm1400_vm2, %v3182_v27, 0.0  ;;  %v3185_v42 = vmul.f32 %v5633_v28, %v7455_v31  ;;  %v3318_v45 = vmul.f32 %v5645_v29, %v5162_v32  ;;  %v3319_v53 = vadd.f32 %v3315_v39, %v3307_v48 }
 0xa61   : > { %v3170_v33 = vpop.f32.mrf.mxu0  ;;  %v3275_v11 = vpop.f32.mrf.mxu1  ;;  %v3437_v28 = vmul.f32 %v5168_v43, %v7446_v15 }
 0xa62   : > { %v3183_v7 = vmul.f32 %v3170_v33, %v7446_v15  ;;  %v3316_v52 = vmul.f32 %v5162_v32, %v3275_v11  ;;  %v3191_v58 = vsel %vm1400_vm2, %v3185_v42, 0.0  ;;  %v3322_v59 = vadd.f32 %v3318_v45, %v3310_v37 }
 0xa63   : > { %v5648_v62 = vpop.f32.mrf.mxu1  ;;  %v3442_v38 = vpack.c.bf16 %v3437_v28, %v3436_v61 }
 0xa64   : > { %v3187_v46 = vsel %vm1400_vm2, %v3183_v7, 0.0  ;;  %v3329_v25 = vmul.f32 %v5648_v62, %v5163_v40  ;;  %v3320_v12 = vadd.f32 %v3316_v52, %v3308_v0  ;;  %v3439_v62 = vmul.f32 %v5168_v43, %v7455_v31 }
 0xa65   : > { %v3188_v49 = vadd.f32 %v3187_v46, %v3186_v8  ;;  %v3288_v50 = vpop.f32.mrf.mxu1 }
 0xa66   : > { %v3327_v35 = vmul.f32 %v5163_v40, %v3288_v50  ;;  %v7627_v56 = vadd.f32 %v3329_v25, %v3321_v44 }
 0xa67   : > { %v3190_v55 = vadd.f32 %v3189_v51, %v3188_v49  ;;  %v5649_v57 = vpop.f32.mrf.mxu1  ;;  %v5174_v51 = vld [vmem:[#allocation7 + $0x4] ss:$0 sm:$0xff] }
 0xa68   : > { %v3330_v1 = vmul.f32 %v5649_v57, %v5163_v40  ;;  %v7631_v9 = vadd.f32 %v3327_v35, %v3319_v53  ;;  %v3341_v21 = vmul.f32 %v5164_v47, %v7627_v56  ;;  %v3430_v23 = vmul.f32 %v5167_v22, %v7627_v56 }
 0xa69   : > { %v3192_v2 = vadd.f32 %v3191_v58, %v3190_v55  ;;  %v3291_v10 = vpop.f32.mrf.mxu1  ;;  %v5173_v55 = vld [vmem:[#allocation3 + $0x4] ss:$0 sm:$0xff] }
 0xa6a   : > { %v7633_v18 = vadd.f32 %v3330_v1, %v3322_v59  ;;  %v3328_v19 = vmul.f32 %v5163_v40, %v3291_v10  ;;  %v3339_v26 = vmul.f32 %v5164_v47, %v7631_v9  ;;  %v3428_v27 = vmul.f32 %v5167_v22, %v7631_v9  ;;  %v5175_v1 = vld [vmem:[#allocation4 + $0x4] ss:$0 sm:$0xff] }
 0xa6b   : > { %v3193_v20 = vrot.slane %v3192_v2, 4  ;;  %v3438_v40 = vmul.f32 %v5168_v43, %v7452_v30  ;;  %v3527_v58 = vmul.f32 %v5173_v55, %v7627_v56 }
 0xa6c   : > { %v3342_v54 = vmul.f32 %v5164_v47, %v7633_v18  ;;  %v3431_v60 = vmul.f32 %v5167_v22, %v7633_v18  ;;  %v7640_v24 = vadd.f32 %v3328_v19, %v3320_v12  ;;  %v3528_v56 = vmul.f32 %v5173_v55, %v7633_v18  ;;  %v5176_v18 = vld [vmem:[#allocation2 + $0x4] ss:$0 sm:$0xff] }
 0xa6d   : > { %v3194_v63 = vadd.f32 %v3193_v20, %v3192_v2  ;;  %v3443_v42 = vpack.c.bf16 %v3439_v62, %v3438_v40  ;;  %v3525_v20 = vmul.f32 %v5173_v55, %v7631_v9  ;;  %v5180_v9 = vld [vmem:[#allocation5 + $0x5] ss:$0 sm:$0xff]  ;;  %v5179_v40 = vld [vmem:[#allocation6 + $0x5] ss:$0 sm:$0xff] }
 0xa6e   : > { %v3344_v29 = vpack.c.bf16 %v3342_v54, %v3341_v21  ;;  %v3441_v32 = vpack.c.bf16 %v3431_v60, %v3430_v23  ;;  %v3340_v17 = vmul.f32 %v5164_v47, %v7640_v24  ;;  %v3429_v33 = vmul.f32 %v5167_v22, %v7640_v24 }
 0xa6f   : > { %v3195_v11 = vrot.slane %v3194_v63, 2  ;;  %v3654_v62 = vmul.f32 %v5180_v9, %v7443_v13 }
 0xa70   : > { %v3343_v34 = vpack.c.bf16 %v3340_v17, %v3339_v26  ;;  %v3440_v36 = vpack.c.bf16 %v3429_v33, %v3428_v27 }
 0xa71   : > { %v3196_v7 = vadd.f32 %v3195_v11, %v3194_v63 }
 0xa72   : > { %5658 = vmatprep.mubr.msk.bf16.mxu0 %vm1400_vm2, %v3343_v34  ;;  %5670 = vmatprep.mubr.msk.bf16.mxu1 %vm1400_vm2, %v3440_v36 }
 0xa73   : > { %v3197_v8 = vrot.slane %v3196_v7, 1  ;;  %5659 = vmatmul.mubr.msk.bf16.vlgmr.msra.gmra.mxu0 %vm1400_vm2, %v3344_v29  ;;  %5671 = vmatmul.mubr.msk.bf16.vlgmr.msra.gmra.mxu1 %vm1400_vm2, %v3441_v32  ;;  %v3526_v32 = vmul.f32 %v5173_v55, %v7640_v24 }
 0xa74   : > { %5674 = vmatprep.mubr.msk.bf16.mxu1 %vm1400_vm2, %v3442_v38  ;;  %5691 = vmatpush3.bf16.msra.mxu1 %v7407_v3 }
 0xa75   : > { %v3198_v39 = vadd.f32 %v3197_v8, %v3196_v7  ;;  %5679 = vmatpush3.bf16.msra.mxu0 %v7407_v3  ;;  %5692 = vmatprep.subr.bf16.mxu1 %v7414_v16 }
 0xa76   : > { %5680 = vmatprep.subr.bf16.mxu0 %v7414_v16 }
 0xa77   : > { %3199 = vst.msk [vmem:[#allocation2 + $0x2] sm:$0x1] %vm2762_vm12, %v3198_v39 }
 0xa78   : > { %5693 = vmatpush3.bf16.msra.mxu1 %v7414_v16 }
 0xa79   : > { %5681 = vmatpush3.bf16.msra.mxu0 %v7414_v16  ;;  %5694 = vmatprep.subr.bf16.mxu1 %v7417_v4 }
 0xa7a   : > { %5682 = vmatprep.subr.bf16.mxu0 %v7417_v4 }
 0xa7b   : > { %5675 = vmatmul.mubr.msk.bf16.gmra.mxu1 %vm1400_vm2, %v3443_v42 }
 0xa7c   : > { %5695 = vmatpush3.bf16.msra.mxu1 %v7417_v4 }
 0xa7d   : > { %5683 = vmatpush3.bf16.msra.mxu0 %v7417_v4  ;;  %5696 = vmatprep.subr.bf16.mxu1 %v7425_v5 }
 0xa7e   : > { %5684 = vmatprep.subr.bf16.mxu0 %v7425_v5 }
 0xa80   : > { %5697 = vmatpush3.bf16.msra.mxu1 %v7425_v5 }
 0xa81   : > { %5685 = vmatpush3.bf16.msra.mxu0 %v7425_v5  ;;  %5718 = vmatprep.subr.bf16.mxu1 %v7407_v3 }
 0xa82   : > { %5706 = vmatprep.subr.bf16.mxu0 %v7407_v3 }
 0xb33   : > { %v5660_v45 = vpop.f32.mrf.mxu0  ;;  %v5672_v46 = vpop.f32.mrf.mxu1 }
 0xb34   : > { %v3535_v37 = vmul.f32 %v5672_v46, %v5174_v51  ;;  %v3402_v53 = vmul.f32 %v5660_v45, %v7452_v30 }
 0xb35   : > { %v3385_v25 = vpop.f32.mrf.mxu0  ;;  %v3490_v44 = vpop.f32.mrf.mxu1 }
 0xb36   : > { %v3400_v48 = vmul.f32 %v3385_v25, %v7443_v13  ;;  %v3533_v0 = vmul.f32 %v5174_v51, %v3490_v44  ;;  %v3539_v19 = vadd.f32 %v3535_v37, %v3527_v58  ;;  %v3407_v61 = vsel %vm1400_vm2, %v3402_v53, 0.0 }
 0xb37   : > { %v5661_v49 = vpop.f32.mrf.mxu0  ;;  %v5673_v50 = vpop.f32.mrf.mxu1 }
 0xb38   : > { %v3404_v59 = vsel %vm1400_vm2, %v3400_v48, 0.0  ;;  %v3403_v2 = vmul.f32 %v5661_v49, %v7455_v31  ;;  %v3536_v10 = vmul.f32 %v5673_v50, %v5174_v51  ;;  %v3537_v60 = vadd.f32 %v3533_v0, %v3525_v20 }
 0xb39   : > { %v3388_v52 = vpop.f32.mrf.mxu0  ;;  %v3493_v35 = vpop.f32.mrf.mxu1  ;;  %v3655_v49 = vmul.f32 %v5180_v9, %v7446_v15 }
 0xb3a   : > { %v3401_v57 = vmul.f32 %v3388_v52, %v7446_v15  ;;  %v3534_v23 = vmul.f32 %v5174_v51, %v3493_v35  ;;  %v3409_v28 = vsel %vm1400_vm2, %v3403_v2, 0.0  ;;  %v3540_v29 = vadd.f32 %v3536_v10, %v3528_v56 }
 0xb3b   : > { %v5676_v43 = vpop.f32.mrf.mxu1  ;;  %v3660_v58 = vpack.c.bf16 %v3655_v49, %v3654_v62  ;;  %v5188_v49 = vld [vmem:[#allocation2 + $0x5] ss:$0 sm:$0xff] }
 0xb3c   : > { %v3405_v12 = vsel %vm1400_vm2, %v3401_v57, 0.0  ;;  %v3547_v47 = vmul.f32 %v5676_v43, %v5175_v1  ;;  %v3538_v36 = vadd.f32 %v3534_v23, %v3526_v32  ;;  %v3657_v43 = vmul.f32 %v5180_v9, %v7455_v31  ;;  %v5185_v23 = vld [vmem:[#allocation3 + $0x5] ss:$0 sm:$0xff] }
 0xb3d   : > { %v3406_v21 = vadd.f32 %v3405_v12, %v3404_v59  ;;  %v3506_v22 = vpop.f32.mrf.mxu1 }
 0xb3e   : > { %v3545_v54 = vmul.f32 %v5175_v1, %v3506_v22  ;;  %v7682_v26 = vadd.f32 %v3547_v47, %v3539_v19 }
 0xb3f   : > { %v3408_v63 = vadd.f32 %v3407_v61, %v3406_v21  ;;  %v5677_v27 = vpop.f32.mrf.mxu1  ;;  %v5186_v21 = vld [vmem:[#allocation7 + $0x5] ss:$0 sm:$0xff] }
 0xb40   : > { %v3548_v17 = vmul.f32 %v5677_v27, %v5175_v1  ;;  %v7686_v11 = vadd.f32 %v3545_v54, %v3537_v60  ;;  %v3559_v39 = vmul.f32 %v5176_v18, %v7682_v26  ;;  %v3648_v42 = vmul.f32 %v5179_v40, %v7682_v26 }
 0xb41   : > { %v3410_v33 = vadd.f32 %v3409_v28, %v3408_v63  ;;  %v3509_v34 = vpop.f32.mrf.mxu1  ;;  %v3745_v60 = vmul.f32 %v5185_v23, %v7682_v26  ;;  %v5187_v28 = vld [vmem:[#allocation4 + $0x5] ss:$0 sm:$0xff] }
 0xb42   : > { %v7688_v7 = vadd.f32 %v3548_v17, %v3540_v29  ;;  %v3546_v38 = vmul.f32 %v5175_v1, %v3509_v34  ;;  %v3557_v44 = vmul.f32 %v5176_v18, %v7686_v11  ;;  %v3646_v48 = vmul.f32 %v5179_v40, %v7686_v11 }
 0xb43   : > { %v3411_v8 = vrot.slane %v3410_v33, 4  ;;  %v3656_v1 = vmul.f32 %v5180_v9, %v7452_v30  ;;  %v3743_v34 = vmul.f32 %v5185_v23, %v7686_v11 }
 0xb44   : > { %v3560_v24 = vmul.f32 %v5176_v18, %v7688_v7  ;;  %v3649_v45 = vmul.f32 %v5179_v40, %v7688_v7  ;;  %v7695_v46 = vadd.f32 %v3546_v38, %v3538_v36  ;;  %v3746_v26 = vmul.f32 %v5185_v23, %v7688_v7 }
 0xb45   : > { %v3412_v25 = vadd.f32 %v3411_v8, %v3410_v33  ;;  %v3661_v2 = vpack.c.bf16 %v3657_v43, %v3656_v1 }
 0xb46   : > { %v3562_v50 = vpack.c.bf16 %v3560_v24, %v3559_v39  ;;  %v3659_v51 = vpack.c.bf16 %v3649_v45, %v3648_v42  ;;  %v3558_v37 = vmul.f32 %v5176_v18, %v7695_v46  ;;  %v3647_v52 = vmul.f32 %v5179_v40, %v7695_v46  ;;  %v5192_v45 = vld [vmem:[#allocation5 + $0x6] ss:$0 sm:$0xff] }
 0xb47   : > { %v3413_v35 = vrot.slane %v3412_v25, 2  ;;  %v3744_v24 = vmul.f32 %v5185_v23, %v7695_v46  ;;  %v7773_v23 = vld [vmem:[%s8106_s7 + $0x10] sm:$0xff] }
 0xb48   : > { %v3561_v53 = vpack.c.bf16 %v3558_v37, %v3557_v44  ;;  %v3658_v55 = vpack.c.bf16 %v3647_v52, %v3646_v48 }
 0xb49   : > { %v3414_v57 = vadd.f32 %v3413_v35, %v3412_v25  ;;  %v5191_v35 = vld [vmem:[#allocation6 + $0x6] ss:$0 sm:$0xff] }
 0xb4a   : > { %5686 = vmatprep.mubr.msk.bf16.mxu0 %vm1400_vm2, %v3561_v53  ;;  %5698 = vmatprep.mubr.msk.bf16.mxu1 %vm1400_vm2, %v3658_v55  ;;  %v7750_v53 = vld [vmem:[%s8106_s7] sm:$0xff] }
 0xb4b   : > { %v3415_v59 = vrot.slane %v3414_v57, 1  ;;  %5687 = vmatmul.mubr.msk.bf16.vlgmr.msra.gmra.mxu0 %vm1400_vm2, %v3562_v50  ;;  %5699 = vmatmul.mubr.msk.bf16.vlgmr.msra.gmra.mxu1 %vm1400_vm2, %v3659_v51  ;;  %v3872_v46 = vmul.f32 %v7750_v53, %v5192_v45 }
 0xb4c   : > { %5702 = vmatprep.mubr.msk.bf16.mxu1 %vm1400_vm2, %v3660_v58  ;;  %5719 = vmatpush3.bf16.msra.mxu1 %v7407_v3 }
 0xb4d   : > { %v3416_v0 = vadd.f32 %v3415_v59, %v3414_v57  ;;  %5707 = vmatpush3.bf16.msra.mxu0 %v7407_v3  ;;  %5720 = vmatprep.subr.bf16.mxu1 %v7414_v16  ;;  %v7726_v3 = vld [vmem:[%s8104_s6 + $0x18] sm:$0xff]  }
 0xb4e   : > { %5708 = vmatprep.subr.bf16.mxu0 %v7414_v16 }
 0xb4f   : > { %3417 = vst.msk [vmem:[#allocation2 + $0x3] sm:$0x1] %vm2762_vm12, %v3416_v0 }
 0xb50   : > { %5721 = vmatpush3.bf16.msra.mxu1 %v7414_v16 }
 0xb51   : > { %5709 = vmatpush3.bf16.msra.mxu0 %v7414_v16  ;;  %5722 = vmatprep.subr.bf16.mxu1 %v7417_v4 }
 0xb52   : > { %5710 = vmatprep.subr.bf16.mxu0 %v7417_v4 }
 0xb53   : > { %5703 = vmatmul.mubr.msk.bf16.gmra.mxu1 %vm1400_vm2, %v3661_v2  ;;  %v7761_v2 = vld [vmem:[%s8106_s7 + $0x8] sm:$0xff] }
 0xb54   : > { %5723 = vmatpush3.bf16.msra.mxu1 %v7417_v4 }
 0xb55   : > { %5711 = vmatpush3.bf16.msra.mxu0 %v7417_v4  ;;  %5724 = vmatprep.subr.bf16.mxu1 %v7425_v5 }
 0xb56   : > { %5712 = vmatprep.subr.bf16.mxu0 %v7425_v5 }
 0xb58   : > { %5725 = vmatpush3.bf16.msra.mxu1 %v7425_v5 }
 0xb59   : > { %5713 = vmatpush3.bf16.msra.mxu0 %v7425_v5  ;;  %5746 = vmatprep.subr.bf16.mxu1 %v7726_v3 }
 0xb5a   : > { %5734 = vmatprep.subr.bf16.mxu0 %v7726_v3 }
 0xc0b   : > { %v5688_v16 = vpop.f32.mrf.mxu0  ;;  %v5700_v10 = vpop.f32.mrf.mxu1 }
 0xc0c   : > { %v3753_v22 = vmul.f32 %v5700_v10, %v5186_v21  ;;  %v3620_v5 = vmul.f32 %v5688_v16, %v7452_v30  ;;  %v3873_v16 = vmul.f32 %v7761_v2, %v5192_v45 }
 0xc0d   : > { %v3603_v12 = vpop.f32.mrf.mxu0  ;;  %v3708_v47 = vpop.f32.mrf.mxu1 }
 0xc0e   : > { %v3618_v4 = vmul.f32 %v3603_v12, %v7443_v13  ;;  %v3751_v27 = vmul.f32 %v5186_v21, %v3708_v47  ;;  %v3757_v33 = vadd.f32 %v3753_v22, %v3745_v60  ;;  %v7777_v60 = vld [vmem:[%s8106_s7 + $0x18] sm:$0xff] }
 0xc0f   : > { %v5689_v19 = vpop.f32.mrf.mxu0  ;;  %v5701_v20 = vpop.f32.mrf.mxu1 }
 0xc10   : > { %v3622_v63 = vsel %vm1400_vm2, %v3618_v4, 0.0  ;;  %v3621_v13 = vmul.f32 %v5689_v19, %v7455_v31  ;;  %v3754_v32 = vmul.f32 %v5701_v20, %v5186_v21  ;;  %v3755_v8 = vadd.f32 %v3751_v27, %v3743_v34  ;;  %v7782_v27 = vld [vmem:[%s8104_s6 + $0x10] sm:$0xff]  }
 0xc11   : > { %v3606_v61 = vpop.f32.mrf.mxu0  ;;  %v3711_v56 = vpop.f32.mrf.mxu1 }
 0xc12   : > { %v3619_v54 = vmul.f32 %v3606_v61, %v7446_v15  ;;  %v3625_v15 = vsel %vm1400_vm2, %v3620_v5, 0.0  ;;  %v3752_v18 = vmul.f32 %v5186_v21, %v3711_v56  ;;  %v3627_v62 = vsel %vm1400_vm2, %v3621_v13, 0.0  ;;  %v7798_v13 = vld [vmem:[%s8104_s6] sm:$0xff]  }
 0xc13   : > { %v5704_v29 = vpop.f32.mrf.mxu1  ;;  %v3758_v42 = vadd.f32 %v3754_v32, %v3746_v26  ;;  %v3878_v61 = vpack.c.bf16 %v3873_v16, %v3872_v46 }
 0xc14   : > { %v3623_v17 = vsel %vm1400_vm2, %v3619_v54, 0.0  ;;  %v3765_v9 = vmul.f32 %v5704_v29, %v5187_v28  ;;  %v3756_v7 = vadd.f32 %v3752_v18, %v3744_v24  ;;  %v3874_v54 = vmul.f32 %v7773_v23, %v5192_v45  ;;  %v7790_v29 = vld [vmem:[%s8104_s6 + $0x8] sm:$0xff]  }
 0xc15   : > { %v3624_v30 = vadd.f32 %v3623_v17, %v3622_v63  ;;  %v3724_v36 = vpop.f32.mrf.mxu1  ;;  %v3875_v63 = vmul.f32 %v7777_v60, %v5192_v45 }
 0xc16   : > { %v3763_v38 = vmul.f32 %v5187_v28, %v3724_v36  ;;  %v7740_v40 = vadd.f32 %v3765_v9, %v3757_v33 }
 0xc17   : > { %v3626_v39 = vadd.f32 %v3625_v15, %v3624_v30  ;;  %v5705_v31 = vpop.f32.mrf.mxu1  ;;  %v5198_v15 = vld [vmem:[#allocation7 + $0x6] ss:$0 sm:$0xff] }
 0xc18   : > { %v3766_v11 = vmul.f32 %v5705_v31, %v5187_v28  ;;  %v7744_v44 = vadd.f32 %v3763_v38, %v3755_v8  ;;  %v3777_v52 = vmul.f32 %v5188_v49, %v7740_v40  ;;  %v3866_v55 = vmul.f32 %v5191_v35, %v7740_v40 }
 0xc19   : > { %v3628_v25 = vadd.f32 %v3627_v62, %v3626_v39  ;;  %v3727_v48 = vpop.f32.mrf.mxu1  ;;  %v5197_v39 = vld [vmem:[#allocation3 + $0x6] ss:$0 sm:$0xff] }
 0xc1a   : > { %v7746_v50 = vadd.f32 %v3766_v11, %v3758_v42  ;;  %v3764_v51 = vmul.f32 %v5187_v28, %v3727_v48  ;;  %v3775_v1 = vmul.f32 %v5188_v49, %v7744_v44  ;;  %v3864_v43 = vmul.f32 %v5191_v35, %v7744_v44  ;;  %v5199_v11 = vld [vmem:[#allocation4 + $0x6] ss:$0 sm:$0xff] }
 0xc1b   : > { %v3629_v37 = vrot.slane %v3628_v25, 4  ;;  %v3879_v28 = vpack.c.bf16 %v3875_v63, %v3874_v54  ;;  %v3963_v62 = vmul.f32 %v5197_v39, %v7740_v40  ;;  %v5203_v54 = vld [vmem:[#allocation6 + $0x7] ss:$0 sm:$0xff] }
 0xc1c   : > { %v3778_v57 = vmul.f32 %v5188_v49, %v7746_v50  ;;  %v3867_v58 = vmul.f32 %v5191_v35, %v7746_v50  ;;  %v7756_v59 = vadd.f32 %v3764_v51, %v3756_v7  ;;  %v3964_v40 = vmul.f32 %v5197_v39, %v7746_v50  ;;  %v5200_v50 = vld [vmem:[#allocation2 + $0x6] ss:$0 sm:$0xff] }
 0xc1d   : > { %v3630_v0 = vadd.f32 %v3629_v37, %v3628_v25  ;;  %v3961_v37 = vmul.f32 %v5197_v39, %v7744_v44  ;;  %v5204_v44 = vld [vmem:[#allocation5 + $0x7] ss:$0 sm:$0xff] }
 0xc1e   : > { %v3780_v10 = vpack.c.bf16 %v3778_v57, %v3777_v52  ;;  %v3877_v12 = vpack.c.bf16 %v3867_v58, %v3866_v55  ;;  %v3776_v47 = vmul.f32 %v5188_v49, %v7756_v59  ;;  %v3865_v4 = vmul.f32 %v5191_v35, %v7756_v59 }
 0xc1f   : > { %v3631_v19 = vrot.slane %v3630_v0, 2  ;;  %v4090_v63 = vmul.f32 %v7750_v53, %v5204_v44 }
 0xc20   : > { %v3779_v20 = vpack.c.bf16 %v3776_v47, %v3775_v1  ;;  %v3876_v21 = vpack.c.bf16 %v3865_v4, %v3864_v43 }
 0xc21   : > { %v3632_v22 = vadd.f32 %v3631_v19, %v3630_v0 }
 0xc22   : > { %5714 = vmatprep.mubr.msk.bf16.mxu0 %vm1400_vm2, %v3779_v20  ;;  %5726 = vmatprep.mubr.msk.bf16.mxu1 %vm1400_vm2, %v3876_v21 }
 0xc23   : > { %v3633_v56 = vrot.slane %v3632_v22, 1  ;;  %5715 = vmatmul.mubr.msk.bf16.vlgmr.msra.gmra.mxu0 %vm1400_vm2, %v3780_v10  ;;  %5727 = vmatmul.mubr.msk.bf16.vlgmr.msra.gmra.mxu1 %vm1400_vm2, %v3877_v12  ;;  %v3962_v12 = vmul.f32 %v5197_v39, %v7756_v59 }
 0xc24   : > { %5730 = vmatprep.mubr.msk.bf16.mxu1 %vm1400_vm2, %v3878_v61  ;;  %5747 = vmatpush3.bf16.msra.mxu1 %v7726_v3 }
 0xc25   : > { %v3634_v5 = vadd.f32 %v3633_v56, %v3632_v22  ;;  %5735 = vmatpush3.bf16.msra.mxu0 %v7726_v3  ;;  %5748 = vmatprep.subr.bf16.mxu1 %v7782_v27 }
 0xc26   : > { %5736 = vmatprep.subr.bf16.mxu0 %v7782_v27 }
 0xc27   : > { %3635 = vst.msk [vmem:[#allocation2 + $0x4] sm:$0x1] %vm2762_vm12, %v3634_v5 }
 0xc28   : > { %5749 = vmatpush3.bf16.msra.mxu1 %v7782_v27 }
 0xc29   : > { %5737 = vmatpush3.bf16.msra.mxu0 %v7782_v27  ;;  %5750 = vmatprep.subr.bf16.mxu1 %v7790_v29 }
 0xc2a   : > { %5738 = vmatprep.subr.bf16.mxu0 %v7790_v29 }
 0xc2b   : > { %5731 = vmatmul.mubr.msk.bf16.gmra.mxu1 %vm1400_vm2, %v3879_v28 }
 0xc2c   : > { %5751 = vmatpush3.bf16.msra.mxu1 %v7790_v29 }
 0xc2d   : > { %5739 = vmatpush3.bf16.msra.mxu0 %v7790_v29  ;;  %5752 = vmatprep.subr.bf16.mxu1 %v7798_v13 }
 0xc2e   : > { %5740 = vmatprep.subr.bf16.mxu0 %v7798_v13 }
 0xc30   : > { %5753 = vmatpush3.bf16.msra.mxu1 %v7798_v13 }
 0xc31   : > { %5741 = vmatpush3.bf16.msra.mxu0 %v7798_v13  ;;  %5774 = vmatprep.subr.bf16.mxu1 %v6827_v14 }
 0xc32   : > { %5762 = vmatprep.subr.bf16.mxu0 %v7726_v3 }
 0xce3   : > { %v5716_v32 = vpop.f32.mrf.mxu0  ;;  %v5728_v17 = vpop.f32.mrf.mxu1 }
 0xce4   : > { %v3971_v26 = vmul.f32 %v5728_v17, %v5198_v15  ;;  %v3838_v8 = vmul.f32 %v7773_v23, %v5716_v32 }
 0xce5   : > { %v3821_v9 = vpop.f32.mrf.mxu0  ;;  %v3926_v33 = vpop.f32.mrf.mxu1 }
 0xce6   : > { %v3836_v34 = vmul.f32 %v7750_v53, %v3821_v9  ;;  %v3969_v24 = vmul.f32 %v5198_v15, %v3926_v33  ;;  %v3975_v51 = vadd.f32 %v3971_v26, %v3963_v62  ;;  %v3843_v46 = vsel %vm1400_vm2, %v3838_v8, 0.0 }
 0xce7   : > { %v5717_v30 = vpop.f32.mrf.mxu0  ;;  %v5729_v36 = vpop.f32.mrf.mxu1 }
 0xce8   : > { %v3840_v42 = vsel %vm1400_vm2, %v3836_v34, 0.0  ;;  %v3839_v25 = vmul.f32 %v7777_v60, %v5717_v30  ;;  %v3972_v48 = vmul.f32 %v5729_v36, %v5198_v15  ;;  %v3973_v58 = vadd.f32 %v3969_v24, %v3961_v37 }
 0xce9   : > { %v3824_v18 = vpop.f32.mrf.mxu0  ;;  %v3929_v38 = vpop.f32.mrf.mxu1  ;;  %v4091_v30 = vmul.f32 %v7761_v2, %v5204_v44 }
 0xcea   : > { %v3837_v31 = vmul.f32 %v7761_v2, %v3824_v18  ;;  %v3970_v55 = vmul.f32 %v5198_v15, %v3929_v38  ;;  %v3845_v16 = vsel %vm1400_vm2, %v3839_v25, 0.0  ;;  %v3976_v10 = vadd.f32 %v3972_v48, %v3964_v40 }
 0xceb   : > { %v5732_v45 = vpop.f32.mrf.mxu1  ;;  %v4096_v62 = vpack.c.bf16 %v4091_v30, %v4090_v63 }
 0xcec   : > { %v3841_v7 = vsel %vm1400_vm2, %v3837_v31, 0.0  ;;  %v3983_v49 = vmul.f32 %v5732_v45, %v5199_v11  ;;  %v3974_v21 = vadd.f32 %v3970_v55, %v3962_v12  ;;  %v4093_v45 = vmul.f32 %v7777_v60, %v5204_v44 }
 0xced   : > { %v3842_v52 = vadd.f32 %v3841_v7, %v3840_v42  ;;  %v3942_v35 = vpop.f32.mrf.mxu1 }
 0xcee   : > { %v3981_v57 = vmul.f32 %v5199_v11, %v3942_v35  ;;  %v7816_v1 = vadd.f32 %v3983_v49, %v3975_v51  ;;  %v5210_v49 = vld [vmem:[#allocation7 + $0x7] ss:$0 sm:$0xff] }
 0xcef   : > { %v3844_v0 = vadd.f32 %v3843_v46, %v3842_v52  ;;  %v5733_v43 = vpop.f32.mrf.mxu1 }
 0xcf0   : > { %v3984_v47 = vmul.f32 %v5733_v43, %v5199_v11  ;;  %v7820_v19 = vadd.f32 %v3981_v57, %v3973_v58  ;;  %v3995_v5 = vmul.f32 %v5200_v50, %v7816_v1  ;;  %v4084_v28 = vmul.f32 %v5203_v54, %v7816_v1 }
 0xcf1   : > { %v3846_v4 = vadd.f32 %v3845_v16, %v3844_v0  ;;  %v3945_v20 = vpop.f32.mrf.mxu1 }
 0xcf2   : > { %v7822_v22 = vadd.f32 %v3984_v47, %v3976_v10  ;;  %v3982_v61 = vmul.f32 %v5199_v11, %v3945_v20  ;;  %v3993_v33 = vmul.f32 %v5200_v50, %v7820_v19  ;;  %v4082_v34 = vmul.f32 %v5203_v54, %v7820_v19  ;;  %v5211_v10 = vld [vmem:[#allocation4 + $0x7] ss:$0 sm:$0xff] }
 0xcf3   : > { %v3847_v56 = vrot.slane %v3846_v4, 4  ;;  %v4092_v11 = vmul.f32 %v7773_v23, %v5204_v44 }
 0xcf4   : > { %v3996_v59 = vmul.f32 %v5200_v50, %v7822_v22  ;;  %v4085_v32 = vmul.f32 %v5203_v54, %v7822_v22  ;;  %v7829_v17 = vadd.f32 %v3982_v61, %v3974_v21 }
 0xcf5   : > { %v3848_v9 = vadd.f32 %v3847_v56, %v3846_v4  ;;  %v4097_v25 = vpack.c.bf16 %v4093_v45, %v4092_v11 }
 0xcf6   : > { %v3998_v36 = vpack.c.bf16 %v3996_v59, %v3995_v5  ;;  %v4095_v15 = vpack.c.bf16 %v4085_v32, %v4084_v28  ;;  %v3994_v26 = vmul.f32 %v5200_v50, %v7829_v17  ;;  %v4083_v18 = vmul.f32 %v5203_v54, %v7829_v17 }
 0xcf7   : > { %v3849_v38 = vrot.slane %v3848_v9, 2 }
 0xcf8   : > { %v3997_v8 = vpack.c.bf16 %v3994_v26, %v3993_v33  ;;  %v4094_v39 = vpack.c.bf16 %v4083_v18, %v4082_v34 }
 0xcf9   : > { %v3850_v31 = vadd.f32 %v3849_v38, %v3848_v9  ;;  %v5212_v38 = vld [vmem:[#allocation2 + $0x7] ss:$0 sm:$0xff] }
 0xcfa   : > { %5742 = vmatprep.mubr.msk.bf16.mxu0 %vm1400_vm2, %v3997_v8  ;;  %5754 = vmatprep.mubr.msk.bf16.mxu1 %vm1400_vm2, %v4094_v39 }
 0xcfb   : > { %v3851_v42 = vrot.slane %v3850_v31, 1  ;;  %5743 = vmatmul.mubr.msk.bf16.vlgmr.msra.gmra.mxu0 %vm1400_vm2, %v3998_v36  ;;  %5755 = vmatmul.mubr.msk.bf16.vlgmr.msra.gmra.mxu1 %vm1400_vm2, %v4095_v15 }
 0xcfc   : > { %5758 = vmatprep.mubr.msk.bf16.mxu1 %vm1400_vm2, %v4096_v62  ;;  %5763 = vmatpush3.bf16.msra.mxu0 %v7726_v3 }
 0xcfd   : > { %v3852_v24 = vadd.f32 %v3851_v42, %v3850_v31  ;;  %5764 = vmatprep.subr.bf16.mxu0 %v7782_v27 }
 0xcff   : > { %3853 = vst.msk [vmem:[#allocation2 + $0x5] sm:$0x1] %vm2762_vm12, %v3852_v24 }
 0xd00   : > { %5765 = vmatpush3.bf16.msra.mxu0 %v7782_v27 }
 0xd01   : > { %5766 = vmatprep.subr.bf16.mxu0 %v7790_v29 }
 0xd03   : > { %5759 = vmatmul.mubr.msk.bf16.gmra.mxu1 %vm1400_vm2, %v4097_v25 }
 0xd04   : > { %5767 = vmatpush3.bf16.msra.mxu0 %v7790_v29  ;;  %5782 = vmatprep.mubr.msk.bf16.mxu1 %vm6828_vm3, %v6827_v14  ;;  %v5209_v29 = vld [vmem:[#allocation3 + $0x7] ss:$0 sm:$0xff] }
 0xd05   : > { %5768 = vmatprep.subr.bf16.mxu0 %v7798_v13  ;;  %v4181_v40 = vmul.f32 %v5209_v29, %v7816_v1  ;;  %v4179_v16 = vmul.f32 %v5209_v29, %v7820_v19  ;;  %v4182_v21 = vmul.f32 %v5209_v29, %v7822_v22  ;;  %v4180_v19 = vmul.f32 %v5209_v29, %v7829_v17 }
 0xd08   : > { %5769 = vmatpush3.bf16.msra.mxu0 %v7798_v13 }
 0xd09   : > { %5786 = vmatprep.subr.mxu0 %v6827_v14 }
 0xdbb   : > { %v5744_v3 = vpop.f32.mrf.mxu0  ;;  %v5756_v48 = vpop.f32.mrf.mxu1 }
 0xdbc   : > { %v4189_v51 = vmul.f32 %v5756_v48, %v5210_v49  ;;  %v4056_v46 = vmul.f32 %v7773_v23, %v5744_v3 }
 0xdbd   : > { %v4039_v7 = vpop.f32.mrf.mxu0  ;;  %v4144_v27 = vpop.f32.mrf.mxu1 }
 0xdbe   : > { %v4054_v37 = vmul.f32 %v7750_v53, %v4039_v7  ;;  %v4187_v13 = vmul.f32 %v5210_v49, %v4144_v27  ;;  %v4193_v0 = vadd.f32 %v4189_v51, %v4181_v40  ;;  %v4061_v1 = vsel %vm1400_vm2, %v4056_v46, 0.0  ;;  %v6131_v7 = vld [vmem:[%s8100_s2 + $0x18] sm:$0xff]   ;;  %v6132_v27 = vld [vmem:[%s8100_s2 + $0x10] sm:$0xff]   ;;  %v6134_v51 = vld [vmem:[%s8100_s2] sm:$0xff]  }
 0xdbf   : > { %v5745_v52 = vpop.f32.mrf.mxu0  ;;  %v5757_v35 = vpop.f32.mrf.mxu1  ;;  %5775 = vmatpush3.bf16.msra.mxu1 %v6131_v7 }
 0xdc0   : > { %v4058_v43 = vsel %vm1400_vm2, %v4054_v37, 0.0  ;;  %v4057_v47 = vmul.f32 %v7777_v60, %v5745_v52  ;;  %v4190_v44 = vmul.f32 %v5757_v35, %v5210_v49  ;;  %v4191_v56 = vadd.f32 %v4187_v13, %v4179_v16  ;;  %5776 = vmatprep.subr.bf16.mxu1 %v6827_v14  ;;  %v4372_v37 = vld [vmem:[%s8102_s3] sm:$0x3] }
 0xdc1   : > { %v4042_v55 = vpop.f32.mrf.mxu0  ;;  %v4147_v57 = vpop.f32.mrf.mxu1 }
 0xdc2   : > { %v4055_v58 = vmul.f32 %v7761_v2, %v4042_v55  ;;  %v4188_v5 = vmul.f32 %v5210_v49, %v4147_v57  ;;  %v4063_v32 = vsel %vm1400_vm2, %v4057_v47, 0.0  ;;  %v4194_v9 = vadd.f32 %v4190_v44, %v4182_v21  ;;  %v6133_v49 = vld [vmem:[%s8100_s2 + $0x8] sm:$0xff]   ;;  %s8108_s2 = smov %s8107_s15 }
 0xdc3   : > { %v5760_v12 = vpop.f32.mrf.mxu1  ;;  %5777 = vmatpush3.bf16.msra.mxu1 %v6132_v27 }
 0xdc4   : > { %v4059_v4 = vsel %vm1400_vm2, %v4055_v58, 0.0  ;;  %v4201_v20 = vmul.f32 %v5760_v12, %v5211_v10  ;;  %v4192_v22 = vadd.f32 %v4188_v5, %v4180_v19  ;;  %5778 = vmatprep.subr.bf16.mxu1 %v6827_v14 }
 0xdc5   : > { %v4060_v50 = vadd.f32 %v4059_v4, %v4058_v43  ;;  %v4160_v61 = vpop.f32.mrf.mxu1 }
 0xdc6   : > { %v4205_v54 = vadd.f32 %v4201_v20, %v4193_v0  ;;  %v4199_v63 = vmul.f32 %v5211_v10, %v4160_v61 }
 0xdc7   : > { %v4062_v28 = vadd.f32 %v4061_v1, %v4060_v50  ;;  %v5761_v59 = vpop.f32.mrf.mxu1  ;;  %5779 = vmatpush3.bf16.msra.mxu1 %v6133_v49 }
 0xdc8   : > { %4292 = vst.msk [vmem:[#allocation38 + $0x10] sm:$0xff] %vm1400_vm2, %v4205_v54  ;;  %v4203_v33 = vadd.f32 %v4199_v63, %v4191_v56  ;;  %v4202_v34 = vmul.f32 %v5761_v59, %v5211_v10  ;;  %v4213_v8 = vmul.f32 %v5212_v38, %v4205_v54  ;;  %5780 = vmatprep.subr.bf16.mxu1 %v6827_v14 }
 0xdc9   : > { %v4064_v30 = vadd.f32 %v4063_v32, %v4062_v28  ;;  %v4163_v36 = vpop.f32.mrf.mxu1  ;;  %v6135_v32 = vld [vmem:[%s8107_s15 + $0x18] sm:$0xff]   ;;  %s6618_s15 = scalar_lea.vmem %s4696_s0, 16 }
 0xdca   : > { %4290 = vst.msk [vmem:[#allocation38] sm:$0xff] %vm1400_vm2, %v4203_v33  ;;  %v4206_v15 = vadd.f32 %v4202_v34, %v4194_v9  ;;  %v4200_v26 = vmul.f32 %v5211_v10, %v4163_v36  ;;  %v4211_v62 = vmul.f32 %v5212_v38, %v4203_v33  ;;  %p6619_p7 = scmp.ne.s32.totalorder %s4696_s0, %s6618_s15 }
 0xdcb   : > { %v4065_v18 = vrot.slane %v4064_v30, 4  ;;  %5781 = vmatpush3.bf16.msra.mxu1 %v6134_v51 }
 0xdcc   : > { %v4214_v39 = vmul.f32 %v5212_v38, %v4206_v15  ;;  %4293 = vst.msk [vmem:[#allocation38 + $0x18] sm:$0xff] %vm1400_vm2, %v4206_v15  ;;  %v4204_v17 = vadd.f32 %v4200_v26, %v4192_v22  ;;  %5808 = vmatprep.subr.bf16.mxu1 %v6827_v14  ;;  %v6136_v26 = vld [vmem:[%s8108_s2 + $0x10] sm:$0xff]   ;;  %p6620_p10 = pnand %p6619_p7, %p8109_p9 }
 0xdcd   : > { %v4066_v31 = vadd.f32 %v4065_v18, %v4064_v30  ;;  %v6137_v18 = vld [vmem:[%s8108_s2 + $0x8] sm:$0xff]  }
 0xdce   : > { %v4216_v42 = vpack.c.bf16 %v4214_v39, %v4213_v8  ;;  %v4212_v24 = vmul.f32 %v5212_v38, %v4204_v17  ;;  %4291 = vst.msk [vmem:[#allocation38 + $0x8] sm:$0xff] %vm1400_vm2, %v4204_v17  ;;  %v6138_v38 = vld [vmem:[%s8108_s2] sm:$0xff]   ;;  %v5225_v39 = vld [vmem:[#allocation32] ss:$0 sm:$0xff]  ;;  %p6621_p8 = pneg %p6620_p10  ;;  %s6624_s2 = scalar_lea.vmem %s4696_s0, 32 }
 0xdcf   : > { %v4067_v11 = vrot.slane %v4066_v31, 2  ;;  %p6626_p5 = scmp.lt.s32.totalorder %s6624_s2, %s6618_s15 }
 0xdd0   : > { %v4215_v45 = vpack.c.bf16 %v4212_v24, %v4211_v62  ;;  %v4588_v24 = vld [vmem:[#allocation5] sm:$0xff] }
 0xdd1   : > { %v4068_v25 = vadd.f32 %v4067_v11, %v4066_v31  ;;  %v5226_v31 = vld [vmem:[#allocation34] ss:$0 sm:$0xff]  ;;  %v4589_v11 = vmul.f32 %v7436_v6, %v4588_v24  ;;  %p6627_p6 = por %p6626_p5, %p6625_p12 }
 0xdd2   : > { %5770 = vmatprep.mubr.msk.bf16.mxu0 %vm1400_vm2, %v4215_v45 }
 0xdd3   : > { %v4069_v3 = vrot.slane %v4068_v25, 1  ;;  %5771 = vmatmul.mubr.msk.bf16.vlgmr.msra.gmra.mxu0 %vm1400_vm2, %v4216_v42  ;;  %p6628_p11 = pnand %p6627_p6, %p6621_p8 }
 0xdd4   : > { %5788 = vmatprep.mubr.msk.f32.mxu0 %vm6828_vm3, %v6827_v14  ;;  %5787 = vmatpush3.msk.msra.mxu0 %vm2417_vm8, %v4372_v37 }
 0xdd5   : > { %v4070_v48 = vadd.f32 %v4069_v3, %v4068_v25  ;;  %5791 = vmatprep.subr.bf16.mxu0 %v6827_v14 }
 0xdd7   : > { %4071 = vst.msk [vmem:[#allocation2 + $0x6] sm:$0x1] %vm2762_vm12, %v4070_v48 }
 0xe93   : > { %v5772_v52 = vpop.f32.mrf.mxu0 }
 0xe94   : > { %v4274_v55 = vmul.f32 %v7773_v23, %v5772_v52 }
 0xe95   : > { %v4257_v35 = vpop.f32.mrf.mxu0 }
 0xe96   : > { %v4272_v46 = vmul.f32 %v7750_v53, %v4257_v35  ;;  %v4279_v16 = vsel %vm1400_vm2, %v4274_v55, 0.0 }
 0xe97   : > { %v5773_v29 = vpop.f32.mrf.mxu0 }
 0xe98   : > { %v4276_v13 = vsel %vm1400_vm2, %v4272_v46, 0.0  ;;  %v4275_v58 = vmul.f32 %v7777_v60, %v5773_v29 }
 0xe99   : > { %v4260_v40 = vpop.f32.mrf.mxu0 }
 0xe9a   : > { %v4273_v57 = vmul.f32 %v7761_v2, %v4260_v40  ;;  %v4281_v12 = vsel %vm1400_vm2, %v4275_v58, 0.0 }
 0xe9c   : > { %v4277_v0 = vsel %vm1400_vm2, %v4273_v57, 0.0 }
 0xe9d   : > { %v4278_v43 = vadd.f32 %v4277_v0, %v4276_v13 }
 0xe9f   : > { %v4280_v10 = vadd.f32 %v4279_v16, %v4278_v43 }
 0xea1   : > { %v4282_v47 = vadd.f32 %v4281_v12, %v4280_v10 }
 0xea3   : > { %v4283_v44 = vrot.slane %v4282_v47, 4 }
 0xea5   : > { %v4284_v53 = vadd.f32 %v4283_v44, %v4282_v47 }
 0xea7   : > { %v4285_v4 = vrot.slane %v4284_v53, 2 }
 0xea9   : > { %v4286_v20 = vadd.f32 %v4285_v4, %v4284_v53 }
 0xeab   : > { %v4287_v23 = vrot.slane %v4286_v20, 1 }
 0xead   : > { %v4288_v1 = vadd.f32 %v4287_v23, %v4286_v20 }
 0xeaf   : > { %4289 = vst.msk [vmem:[#allocation2 + $0x7] sm:$0x1] %vm2762_vm12, %v4288_v1 }
 0xeb6   : > { %v4294_v2 = vld [vmem:[#allocation2] sm:$0xff] }
 0xeb7   : > { %v4295_v21 = vpack.c.bf16 %v4294_v2, %v4294_v2 }
 0xeb9   : > { %5783 = vmatmul.mubr.msk.bf16.vlgmr.msra.gmra.mxu1 %vm1400_vm2, %v4295_v21 }
 0xeba   : > { %5816 = vmatprep.mubr.msk.bf16.mxu1 %vm6828_vm3, %v6827_v14  ;;  %5809 = vmatpush3.bf16.msra.mxu1 %v6135_v32 }
 0xebb   : > { %5810 = vmatprep.subr.bf16.mxu1 %v6827_v14 }
 0xebe   : > { %5811 = vmatpush3.bf16.msra.mxu1 %v6136_v26 }
 0xebf   : > { %5812 = vmatprep.subr.bf16.mxu1 %v6827_v14 }
 0xec2   : > { %5813 = vmatpush3.bf16.msra.mxu1 %v6137_v18 }
 0xec3   : > { %5814 = vmatprep.subr.bf16.mxu1 %v6827_v14 }
 0xec6   : > { %5815 = vmatpush3.bf16.msra.mxu1 %v6138_v38 }
 0xf79   : > { %v4365_v60 = vpop.f32.mrf.mxu1 }
 0xf7a   : > { %v4371_v50 = vmul.f32 0.03125, %v4365_v60 }
 0xf7b   : > { %v5784_v61 = vpop.f32.mrf.mxu1 }
 0xf7c   : > { %5789 = vmatmul.mubr.msk.f32.vlgmr.msra.gmra.mxu0 %vm2410_vm11, %v4371_v50 }
 0xf7d   : > { %v4368_v56 = vpop.f32.mrf.mxu1  ;;  %5792 = vmatpush3.bf16.msra.mxu0 %v6131_v7  ;;  %5799 = vmatprep.mubr.msk.bf16.mxu0 %vm6828_vm3, %v6827_v14 }
 0xf7e   : > { %5793 = vmatprep.subr.bf16.mxu0 %v6827_v14 }
 0xf7f   : > { %v5785_v5 = vpop.f32.mrf.mxu1 }
 0xf81   : > { %5794 = vmatpush3.bf16.msra.mxu0 %v6132_v27 }
 0xf82   : > { %5795 = vmatprep.subr.bf16.mxu0 %v6827_v14 }
 0xf85   : > { %5796 = vmatpush3.bf16.msra.mxu0 %v6133_v49 }
 0xf86   : > { %5797 = vmatprep.subr.bf16.mxu0 %v6827_v14 }
 0xf89   : > { %5798 = vmatpush3.bf16.msra.mxu0 %v6134_v51 }
 0xf8a   : > { %5803 = vmatprep.subr.mxu0 %v6827_v14 }
0x103c   : > { %v4445_v54 = vpop.f32.mrf.mxu0 }
0x103d   : > { %v4449_v63 = vsub.f32 %v4294_v2, %v4445_v54 }
0x103e   : > { %v5790_v28 = vpop.f32.mrf.mxu0 }
0x103f   : > { %v4450_v19 = vmul.f32 %v4449_v63, %v4449_v63 }
0x1041   : > { %v4451_v59 = vpack.c.bf16 %v4450_v19, %v4450_v19 }
0x1043   : > { %5800 = vmatmul.mubr.msk.bf16.vlgmr.msra.gmra.mxu0 %vm1400_vm2, %v4451_v59 }
0x1044   : > { %5804 = vmatpush3.msk.msra.mxu0 %vm2417_vm8, %v4372_v37  ;;  %5805 = vmatprep.mubr.msk.f32.mxu0 %vm6828_vm3, %v6827_v14 }
0x1103   : > { %v4489_v9 = vpop.f32.mrf.mxu0 }
0x1104   : > { %v4495_v33 = vmul.f32 0.03125, %v4489_v9 }
0x1105   : > { %v5801_v34 = vpop.f32.mrf.mxu0 }
0x1106   : > { %v4496_v30 = vadd.f32 0.00064, %v4495_v33 }
0x1107   : > { %v4492_v36 = vpop.f32.mrf.mxu0 }
0x1108   : > { %6165 = vrsqrt.f32 %v4496_v30 }
0x1109   : > { %v5802_v22 = vpop.f32.mrf.mxu0 }
0x1115   : > { %v6166_v15 = vpop.eup %6165 }
0x1116   : > { %5806 = vmatmul.mubr.msk.f32.vlgmr.msra.gmra.mxu0 %vm2410_vm11, %v6166_v15 }
0x11d6   : > { %v4567_v8 = vpop.f32.mrf.mxu0 }
0x11d7   : > { %v4571_v17 = vmul.f32 %v4567_v8, %v4449_v63 }
0x11d8   : > { %v5807_v62 = vpop.f32.mrf.mxu0 }
0x11d9   : > { %v4579_v42 = vmul.f32 %v5225_v39, %v4571_v17 }
0x11db   : > { %v4587_v45 = vadd.f32 %v5226_v31, %v4579_v42 }
0x11dd   : > { %v4590_v25 = vadd.f32 %v4589_v11, %v4587_v45 }
0x11df   : > { %v4591_v3 = vmul.f32 %v4590_v25, %v7359_v41 }
0x11e1   : > { %v4592_v48 = vpack.c.bf16 %v4591_v3, %v4591_v3 }
0x11e3   : > { %5817 = vmatmul.mubr.msk.bf16.vlgmr.msra.gmra.mxu1 %vm1400_vm2, %v4592_v48 }
0x11e4   : > { %6631 = shalt.err (!%p6628_p11)
}
0x11e5   : > { %p8110_p1 = pmov %p8109_p9  ;;  %s8111_s8 = sld [smem:[#allocation75_spill]] }
0x11e6   : > { %s6830_s3 = smov [#allocation38]  }
0x11e7   : > { %s4705_s6 = sshll.u32 %s6830_s3, 4  ;;  %p8112_p0 = pmov %p8110_p1  ;;  %s4706_s6 = int_to_ptr.vmem [resolvable:$true] %s4705_s6 }
0x11e8   : > { %s6642_s18 = scalar_lea.vmem %s4706_s6, 512  ;;  %p6649_p13 = scmp.lt.s32.totalorder %s4706_s6, %s4706_s6 }
0x11e9   : > { %p6643_p3 = scmp.ne.s32.totalorder %s4706_s6, %s6642_s18  ;;  %p6650_p7 = scmp.lt.s32.totalorder %s6642_s18, %s6642_s18 }
0x11eb   : > { %5890 = dma.vmem_to_hbm [thread:$0]  (%p8110_p1), %s4696_s0, 16, %s8111_s8, [#allocation37]  }
0x11ec   : > { %p6644_p2 = pnand %p6643_p3, %p8112_p0  ;;  %p6651_p9 = por %p6650_p7, %p6649_p13 }
0x11ee   : > { %p6645_p4 = pneg %p6644_p2 }
0x11f0   : > { %p6652_p10 = pnand %p6651_p9, %p6645_p4 }
0x11f2   : > { %6655 = shalt.err (!%p6652_p10)
}
0x11f3   : > { %s6831_s2 = smov 128   ;;  %s8113_s3 = sld [smem:[#allocation81_spill]]  ;;  %v6175_v41 = vld [vmem:[%s7235_s26] sm:$0xff] }
0x11f4   : > { %s6832_s0 = smov 8   ;;  %p8114_p8 = pmov %p8112_p0 }
0x11f5   : > { %s5233_s15 = sshll.u32 %s7055_s22, 7  ;;  %s8115_s7 = scalar_lea.vmem [#allocation35], %s7231_s1 }
0x11f6   : > { %5892 = dma.vmem_to_hbm [thread:$0]  (%p8114_p8), %s4706_s6, 512, %s7032_s4, [#allocation37], %s6831_s2, %s6831_s2, %s6832_s0  }
0x11f7   : > { %s4684_s8 = sshll.u32 %s8115_s7, 4  ;;  %s7936_s18 = scalar_lea.hbm %s7022_s5, %s5233_s15  ;;  %s7938_s8 = int_to_ptr.vmem [resolvable:$true] %s4684_s8 }
0x11f8   : > { %s8116_s9 = smov %s8115_s7  ;;  %s8117_s10 = sand.u32 1, %s6758_s16  }
0x11f9   : > { %s4671_s6 = scalar_lea.sflag [#allocation10], %s8117_s10  ;;  %s6666_s2 = scalar_lea.vmem %s7938_s8, 128 }
0x11fa   : > { %p6667_p12 = scmp.ne.s32.totalorder %s7938_s8, %s6666_s2  ;;  %p8118_p5 = scmp.ne.s32.totalorder %s8113_s3, 0 }
0x11fb   : > { %s6833_s26 = smov [#allocation35]  }
0x11fc   : > { %p6668_p6 = pnand %p6667_p12, %p8118_p5  ;;  %s6670_s7 = sshll.u32 %s6833_s26, 4  ;;  %s6671_s7 = int_to_ptr.vmem [resolvable:$false] %s6670_s7 }
0x11fd   : > { %s6672_s0 = scalar_lea.vmem %s6671_s7, 256  ;;  %p6673_p1 = scmp.lt.s32.totalorder %s7938_s8, %s6671_s7 }
0x11fe   : > { %p6669_p11 = pneg %p6668_p6  ;;  %p6674_p3 = scmp.lt.s32.totalorder %s6672_s0, %s6666_s2 }
0x1200   : > { %p6675_p0 = por %p6674_p3, %p6673_p1 }
0x1202   : > { %p6676_p2 = pnand %p6675_p0, %p6669_p11 }
0x12a3   : > { %v4662_v14 = vpop.f32.mrf.mxu1 }
0x12a4   : > { %v4668_v6 = vadd.f32 %v6175_v41, %v4662_v14 }
0x12a5   : > { %v5818_v7 = vpop.f32.mrf.mxu1 }
0x12a6   : > { %4669 = vst.msk [vmem:[%s8116_s9] sm:$0xff] %vm1400_vm2, %v4668_v6 }
0x12a7   : > { %v4665_v27 = vpop.f32.mrf.mxu1 }
0x12a8   : > { %6679 = shalt.err (!%p6676_p2)
}
0x12a9   : > { %s6680_s9 = scalar_lea.hbm %s7936_s18, 128  ;;  %s6684_s1 = scalar_lea.hbm %s7022_s5, 256 }
0x12aa   : > { %p6681_p4 = scmp.ne.s32.totalorder %s7936_s18, %s6680_s9  ;;  %p6685_p9 = scmp.lt.s32.totalorder %s7936_s18, %s7022_s5 }
0x12ab   : > { %p6686_p10 = scmp.lt.s32.totalorder %s6684_s1, %s6680_s9 }
0x12ac   : > { %p6682_p13 = pnand %p6681_p4, %p8118_p5 }
0x12ad   : > { %p6687_p8 = por %p6686_p10, %p6685_p9 }
0x12ae   : > { %p6683_p7 = pneg %p6682_p13 }
0x12b0   : > { %p6688_p12 = pnand %p6687_p8, %p6683_p7 }
0x12b2   : > { %6691 = shalt.err (!%p6688_p12)
}
0x12b3   : > { %5888 = dma.vmem_to_hbm [thread:$0]  (%p8118_p5), %s7938_s8, 128, %s7936_s18, %s4671_s6   ;;  %v5819_v49 = vpop.f32.mrf.mxu1 }
0x12b4   : > { %p8119_p6 = scmp.eq.s32.totalorder %s7055_s22, 1 }
0x12b6   : > { %6745 = dma.done.wait (%p8119_p6), [#allocation37], 528   ;;  %p8120_p11 = pmov %p8119_p6 }
0x12b8   : > { %6747 = vsyncadd (%p8120_p11), [#allocation37], 4294966768 }
0x12b9 PF: > { %s8121_s10 = sld [smem:[#allocation78_spill]] }
0x12ba   : > { %s8122_s15 = sld [smem:[#allocation76_spill]] }
0x12bb   : > { %s8123_s2 = sld [smem:[#allocation82_spill]] }
0x12bf   : > { %p5992_p1 = scmp.ge.s32.totalorder %s8121_s10, 2 }
0x12c0   : > { %s4728_s26 = sand.u32 1, %s8122_s15  }
0x12c1   : > { %p8124_p3 = scmp.ne.s32.totalorder %s8123_s2, 0  ;;  %s4729_s3 = scalar_lea.sflag [#allocation10], %s4728_s26 }
0x12c3   : > { %p5951_p0 = pnand %p5992_p1, %p8124_p3 }
0x12c5   : > { %p5952_p2 = pneg %p5951_p0 }
0x12c7   : > { %6749 = dma.done.wait (%p5952_p2), %s4729_s3, 128  }
0x12c8   : > { %6751 = vsyncadd (%p5952_p2), %s4729_s3, 4294967168  ;;  %s8125_s0 = sld [smem:[#allocation79_spill]]  ;;  %s8128_s15 = smov %s6758_s16 }
0x12c9   : > { %s8126_s8 = sld [smem:[#allocation77_spill]] }
0x12ca   : > { %s8127_s18 = sld [smem:[#allocation80_spill]] }
0x12ce   : > { %p98_p5 = scmp.ge.s32.totalorder %s8125_s0, 4  }
0x12cf   : > { %s8129_s16 = smov %s8126_s8 }
0x12d0   :  { %100 = sbr.rel (!%p98_p5) target bundleno = 84 (0x54), region = 329 }
0x12d5   :  { %4734 = vsyncpa [#allocation9], 1 }
0x12d6   :  { %4736 = vsyncpa [#allocation9 + $0x1], 1 }
0x12d7   :  { %4737 = vsyncpa [#allocation12], 1 }
0x12d8   :  { %4738 = vsyncpa [#allocation15], 1 }
0x12d9   :  { %4739 = vsyncpa [#allocation18], 1 }
0x12da   :  { %4740 = vsyncpa [#allocation21], 1 }
0x12db   :  { %4741 = vsyncpa [#allocation24], 1 }
0x12dc   :  { %4742 = vsyncpa [#allocation27], 1 }
0x12dd   :  { %4743 = vsyncpa [#allocation30], 1 }
0x12de   :  { %4744 = vsyncpa [#allocation33], 1 }
0x12df   :  { %4745 = vsyncpa [#allocation10], 1 }
0x12e0   :  { %4747 = vsyncpa [#allocation10 + $0x1], 1 }
0x12e1   :  { %4748 = vsyncpa [#allocation37], 1 }

</bundles_post_ra>
